<compile_context>
chip_gen: v7x
topology: tpu7x:2x2x1
jax: 0.10.0
libtpu: 0.0.40
codegen_flags: <defaults>
</compile_context>

<pallas_src>
import functools

import jax
import jax.numpy as jnp
from jax.experimental import pallas as pl
from jax.experimental.pallas import tpu as pltpu


# ----------------------------------------------------------------------------
# parafac (CP-ALS) in plain JAX — glue, not kernel code.
# ----------------------------------------------------------------------------
def _unfold(t, mode):
    return jnp.moveaxis(t, mode, 0).reshape(t.shape[mode], -1)


def _khatri_rao(a, b):
    i, r = a.shape
    j = b.shape[0]
    return (a[:, None, :] * b[None, :, :]).reshape(i * j, r)


def _init_factor(unfolded, rank):
    # Top-`rank` eigenvectors of the small Gram matrix == left singular vectors
    # of `unfolded` (up to sign); much cheaper than an SVD on TPU.
    gram = unfolded @ unfolded.T
    _, vecs = jnp.linalg.eigh(gram)           # ascending eigenvalues
    return vecs[:, ::-1][:, :rank]


def _parafac_mode0(x, rank, n_iter):
    """CP-ALS on a 3-way tensor x (I,J,K); returns the mode-0 factor (I, rank)."""
    x0, x1, x2 = _unfold(x, 0), _unfold(x, 1), _unfold(x, 2)
    factors = (_init_factor(x0, rank),
               _init_factor(x1, rank),
               _init_factor(x2, rank))

    def step(_, fac):
        a, b, c = fac
        v = (b.T @ b) * (c.T @ c)
        a = jnp.linalg.solve(v.T, (x0 @ _khatri_rao(b, c)).T).T
        v = (a.T @ a) * (c.T @ c)
        b = jnp.linalg.solve(v.T, (x1 @ _khatri_rao(a, c)).T).T
        v = (a.T @ a) * (b.T @ b)
        c = jnp.linalg.solve(v.T, (x2 @ _khatri_rao(a, b)).T).T
        return (a, b, c)

    a, _, _ = jax.lax.fori_loop(0, n_iter, step, factors)
    return a


# ----------------------------------------------------------------------------
# Pallas kernel 1: excitation (rank_fc + fc + sigmoid) for the WHOLE batch,
# executed once (grid=(1,)).  rank_fc is a single block-diagonal matmul pair
# (no per-batch Python unroll); fc is batched over B.  Everything is a few KiB.
# ----------------------------------------------------------------------------
def _scale_kernel(y_ref, wr1b_ref, wr2s_ref, wf1t_ref, wf2t_ref, scale_ref):
    # y_ref   : (B*RP, C)   per-item mode-0 CP factor, rank on sublanes, stacked over B
    # wr1b_ref: (B*RP, B*RP) kron(I_B, W1_pad)          (block diagonal)
    # wr2s_ref: (B,   B*RP)  kron(I_B, W2_row_pad)      (per-batch selection row)
    # wf1t_ref: (C,   HP)    fc layer-1 weight transposed, zero-padded cols
    # wf2t_ref: (HP,  C)     fc layer-2 weight transposed, zero-padded rows
    # scale_ref: (B, C)
    h = jnp.maximum(
        jnp.dot(wr1b_ref[...], y_ref[...], preferred_element_type=jnp.float32), 0.0)  # (B*RP, C)
    s = jnp.dot(wr2s_ref[...], h, preferred_element_type=jnp.float32)                 # (B, C)
    t = jnp.maximum(
        jnp.dot(s, wf1t_ref[...], preferred_element_type=jnp.float32), 0.0)           # (B, HP)
    z = jnp.dot(t, wf2t_ref[...], preferred_element_type=jnp.float32)                 # (B, C)
    # exact sigmoid (z is tiny, no need for the approximate reciprocal)
    scale_ref[...] = 1.0 / (1.0 + jnp.exp(-z))


# ----------------------------------------------------------------------------
# Pallas kernel 2: lane-dense rescale  out = x * scale
#   x tile : (TR, LW)  with LW = G*HW (multiple of 128 when possible)
#   s tile : (TR, G)   per-channel scales for the G channels packed in each row
# The (G, LW) 0/1 expansion matrix is generated in-kernel from 2-D iotas
# (few VPU ops hidden under the x DMA); the scale broadcast is an exact matmul
# so no x-sized broadcast ever touches HBM.
# ----------------------------------------------------------------------------
def _rescale_kernel(s_ref, x_ref, o_ref, *, hw):
    g = s_ref.shape[1]
    lw = x_ref.shape[1]
    lane = jax.lax.broadcasted_iota(jnp.int32, (g, lw), 1)
    row = jax.lax.broadcasted_iota(jnp.int32, (g, lw), 0)
    expand = ((lane >= row * hw) & (lane < (row + 1) * hw)).astype(jnp.float32)  # (G, LW)
    sc = jnp.dot(s_ref[...], expand, preferred_element_type=jnp.float32)         # (TR, LW)
    o_ref[...] = x_ref[...] * sc


def _round_up(n, m):
    return ((n + m - 1) // m) * m


def _pick_group(c, hw):
    """Smallest g dividing c with g*hw a multiple of 128 (lane-dense rows)."""
    for g in range(1, c + 1):
        if c % g == 0 and (g * hw) % 128 == 0:
            return g
    return c  # fallback: merge all channels; last dim == full dim is still legal


def _pick_row_tile(rows, lane_w, elem_bytes=4,
                   target_bytes=4 << 20, min_par_bytes=1 << 20):
    """Row tile: multiple of 8, ~4 MiB per x block, partial last block allowed.

    Prefers >= 2 grid steps (dual-TC sharding on v7x) only when each step still
    moves >= min_par_bytes, so single-TC chips keep the largest possible tile.
    """
    if rows <= 8:
        return rows
    row_bytes = lane_w * elem_bytes
    tr = max(8, min((rows // 8) * 8, max(8, (target_bytes // row_bytes) // 8 * 8)))
    if pl.cdiv(rows, tr) < 2:
        half = _round_up((rows + 1) // 2, 8)
        if 8 <= half < rows and half * row_bytes >= min_par_bytes:
            tr = half
    return tr


def dese_layer(x, wr1, wr2, wf1, wf2, *, n_als_iter=25):
    """x: (B, C, H, W) float32; weights in PyTorch Linear (out, in) convention."""
    bsz, c, h, w = x.shape
    hw = h * w
    rank = wr1.shape[0]
    hid = wf1.shape[0]
    f32 = jnp.float32

    # ---- parafac mode-0 factors per batch item (plain JAX glue) ----
    y = jax.vmap(lambda xi: _parafac_mode0(xi, rank, n_als_iter))(x)  # (B, C, rank)

    # ---- pad tiny contraction dims to 8 (exact: zeros propagate, relu(0)=0) ----
    rp = _round_up(rank, 8)
    hp = _round_up(hid, 8)

    y_t = jnp.zeros((bsz, rp, c), f32).at[:, :rank, :].set(
        jnp.swapaxes(y, 1, 2).astype(f32))
    y_stack = y_t.reshape(bsz * rp, c)                               # (B*RP, C)

    wr1_p = jnp.zeros((rp, rp), f32).at[:rank, :rank].set(wr1.astype(f32))
    wr2_row = jnp.zeros((1, rp), f32).at[:, :rank].set(wr2.astype(f32))
    eye_b = jnp.eye(bsz, dtype=f32)
    wr1_blk = jnp.kron(eye_b, wr1_p)                                 # (B*RP, B*RP)
    wr2_sel = jnp.kron(eye_b, wr2_row)                               # (B, B*RP)
    wf1_t = jnp.zeros((c, hp), f32).at[:, :hid].set(wf1.T.astype(f32))
    wf2_t = jnp.zeros((hp, c), f32).at[:hid, :].set(wf2.T.astype(f32))

    # ---- kernel 1: per-batch channel scales, computed once ----
    scale = pl.pallas_call(
        _scale_kernel,
        out_shape=jax.ShapeDtypeStruct((bsz, c), f32),
        grid=(1,),
        in_specs=[
            pl.BlockSpec((bsz * rp, c), lambda i: (0, 0)),
            pl.BlockSpec((bsz * rp, bsz * rp), lambda i: (0, 0)),
            pl.BlockSpec((bsz, bsz * rp), lambda i: (0, 0)),
            pl.BlockSpec((c, hp), lambda i: (0, 0)),
            pl.BlockSpec((hp, c), lambda i: (0, 0)),
        ],
        out_specs=pl.BlockSpec((bsz, c), lambda i: (0, 0)),
        compiler_params=pltpu.CompilerParams(
            dimension_semantics=("arbitrary",),
            vmem_limit_bytes=16 * 2**20,
        ),
    )(y_stack, wr1_blk, wr2_sel, wf1_t, wf2_t)

    # ---- kernel 2: lane-dense streaming rescale ----
    g = _pick_group(c, hw)             # channels packed per row
    lw = g * hw                        # lane width (multiple of 128 when possible)
    rows = (bsz * c) // g
    tr = _pick_row_tile(rows, lw)

    x2 = x.reshape(rows, lw).astype(f32)      # free reshape (contiguous)
    s2 = scale.reshape(rows, g)               # free reshape

    # explicit VMEM budget from actual block sizes (double-buffered in/out),
    # capped at 40 MiB so it also fits v7x's 64 MiB physical VMEM.
    x_blk = 4 * tr * lw
    s_blk = 4 * tr * g
    vmem_need = 4 * x_blk + 2 * s_blk
    vmem_limit = int(min(40 * 2**20, max(8 * 2**20, vmem_need + (4 * 2**20))))

    out2 = pl.pallas_call(
        functools.partial(_rescale_kernel, hw=hw),
        out_shape=jax.ShapeDtypeStruct((rows, lw), f32),
        grid=(pl.cdiv(rows, tr),),
        in_specs=[
            pl.BlockSpec((tr, g), lambda i: (i, 0)),     # scales
            pl.BlockSpec((tr, lw), lambda i: (i, 0)),    # x rows (lane-dense)
        ],
        out_specs=pl.BlockSpec((tr, lw), lambda i: (i, 0)),
        compiler_params=pltpu.CompilerParams(
            dimension_semantics=("parallel",),
            vmem_limit_bytes=vmem_limit,
        ),
    )(s2, x2)

    return out2.reshape(bsz, c, h, w)


if __name__ == "__main__":
    # Shapes consistent with the module: DeSELayer(channel=64, rank=3),
    # input like torch.rand(B, 64, 4, 4) with B=2.
    B, C, H, W = 2, 64, 4, 4
    RANK, RED = 3, 16

    key = jax.random.PRNGKey(0)
    kx, k1, k2, k3, k4 = jax.random.split(key, 5)

    x = jax.random.uniform(kx, (B, C, H, W), dtype=jnp.float32)

    def _lin_init(k, out_f, in_f):
        bound = 1.0 / jnp.sqrt(in_f)
        return jax.random.uniform(k, (out_f, in_f), dtype=jnp.float32,
                                  minval=-bound, maxval=bound)

    # PyTorch Linear weights are stored as (out_features, in_features).
    wr1 = _lin_init(k1, RANK, RANK)       # nn.Linear(rank, rank, bias=False)
    wr2 = _lin_init(k2, 1, RANK)          # nn.Linear(rank, 1, bias=False)
    wf1 = _lin_init(k3, C // RED, C)      # nn.Linear(C, C//16, bias=False)
    wf2 = _lin_init(k4, C, C // RED)      # nn.Linear(C//16, C, bias=False)

    fn = jax.jit(functools.partial(dese_layer, n_als_iter=25))
    out = fn(x, wr1, wr2, wf1, wf2)
    jax.block_until_ready(out)

    assert out.shape == (B, C, H, W), out.shape
    assert out.dtype == jnp.float32
    assert bool(jnp.all(jnp.isfinite(out)))
    print("KERNEL_OK")
</pallas_src>

<mosaic_0001>
module attributes {stable_mosaic.version = 11 : i64} {
  func.func @_scale_kernel(%arg0: i32, %arg1: memref<16x64xf32, #tpu.memory_space<vmem>>, %arg2: memref<16x16xf32, #tpu.memory_space<vmem>>, %arg3: memref<2x16xf32, #tpu.memory_space<vmem>>, %arg4: memref<64x8xf32, #tpu.memory_space<vmem>>, %arg5: memref<8x64xf32, #tpu.memory_space<vmem>>, %arg6: memref<2x64xf32, #tpu.memory_space<vmem>>) attributes {dimension_semantics = [#tpu.dimension_semantics<arbitrary>], iteration_bounds = array<i64: 1>, scalar_prefetch = 0 : i64, scratch_operands = 0 : i64, tpu.core_type = #tpu.core_type<tc>, window_params = [{pipeline_mode = #tpu.pipeline_mode<synchronous>, transform_indices = @transform_0, window_bounds = array<i64: 16, 64>}, {pipeline_mode = #tpu.pipeline_mode<synchronous>, transform_indices = @transform_1, window_bounds = array<i64: 16, 16>}, {pipeline_mode = #tpu.pipeline_mode<synchronous>, transform_indices = @transform_2, window_bounds = array<i64: 2, 16>}, {pipeline_mode = #tpu.pipeline_mode<synchronous>, transform_indices = @transform_3, window_bounds = array<i64: 64, 8>}, {pipeline_mode = #tpu.pipeline_mode<synchronous>, transform_indices = @transform_4, window_bounds = array<i64: 8, 64>}, {pipeline_mode = #tpu.pipeline_mode<synchronous>, transform_indices = @transform_5, window_bounds = array<i64: 2, 64>}]} {
    %c0 = arith.constant 0 : index
    %c0_0 = arith.constant 0 : index
    %0 = vector.load %arg2[%c0, %c0_0] : memref<16x16xf32, #tpu.memory_space<vmem>>, vector<16x16xf32>
    %c0_1 = arith.constant 0 : index
    %c0_2 = arith.constant 0 : index
    %1 = vector.load %arg1[%c0_1, %c0_2] : memref<16x64xf32, #tpu.memory_space<vmem>>, vector<16x64xf32>
    %cst = arith.constant dense<0.000000e+00> : vector<16x64xf32>
    %2 = tpu.matmul %0, %1, %cst {dimension_numbers = #tpu.dot_dimension_numbers<[1], [0], [0], [1], [0, 0, 1, 1], [], []>} : vector<16x16xf32>, vector<16x64xf32>, vector<16x64xf32> -> vector<16x64xf32>
    %cst_3 = arith.constant 0.000000e+00 : f32
    %3 = vector.broadcast %cst_3 : f32 to vector<16x64xf32>
    %4 = arith.maximumf %2, %3 : vector<16x64xf32>
    %c0_4 = arith.constant 0 : index
    %c0_5 = arith.constant 0 : index
    %5 = vector.load %arg3[%c0_4, %c0_5] : memref<2x16xf32, #tpu.memory_space<vmem>>, vector<2x16xf32>
    %cst_6 = arith.constant dense<0.000000e+00> : vector<2x64xf32>
    %6 = tpu.matmul %5, %4, %cst_6 {dimension_numbers = #tpu.dot_dimension_numbers<[1], [0], [0], [1], [0, 0, 1, 1], [], []>} : vector<2x16xf32>, vector<16x64xf32>, vector<2x64xf32> -> vector<2x64xf32>
    %c0_7 = arith.constant 0 : index
    %c0_8 = arith.constant 0 : index
    %7 = vector.load %arg4[%c0_7, %c0_8] : memref<64x8xf32, #tpu.memory_space<vmem>>, vector<64x8xf32>
    %cst_9 = arith.constant dense<0.000000e+00> : vector<2x8xf32>
    %8 = tpu.matmul %6, %7, %cst_9 {dimension_numbers = #tpu.dot_dimension_numbers<[1], [0], [0], [1], [0, 0, 1, 1], [], []>} : vector<2x64xf32>, vector<64x8xf32>, vector<2x8xf32> -> vector<2x8xf32>
    %cst_10 = arith.constant 0.000000e+00 : f32
    %9 = vector.broadcast %cst_10 : f32 to vector<2x8xf32>
    %10 = arith.maximumf %8, %9 : vector<2x8xf32>
    %c0_11 = arith.constant 0 : index
    %c0_12 = arith.constant 0 : index
    %11 = vector.load %arg5[%c0_11, %c0_12] : memref<8x64xf32, #tpu.memory_space<vmem>>, vector<8x64xf32>
    %cst_13 = arith.constant dense<0.000000e+00> : vector<2x64xf32>
    %12 = tpu.matmul %10, %11, %cst_13 {dimension_numbers = #tpu.dot_dimension_numbers<[1], [0], [0], [1], [0, 0, 1, 1], [], []>} : vector<2x8xf32>, vector<8x64xf32>, vector<2x64xf32> -> vector<2x64xf32>
    %cst_14 = arith.constant 0.000000e+00 : f32
    %13 = vector.broadcast %cst_14 : f32 to vector<2x64xf32>
    %14 = arith.subf %13, %12 : vector<2x64xf32>
    %15 = math.exp %14 : vector<2x64xf32>
    %cst_15 = arith.constant 1.000000e+00 : f32
    %16 = vector.broadcast %cst_15 : f32 to vector<2x64xf32>
    %17 = arith.addf %16, %15 : vector<2x64xf32>
    %cst_16 = arith.constant 1.000000e+00 : f32
    %18 = vector.broadcast %cst_16 : f32 to vector<2x64xf32>
    %19 = arith.divf %18, %17 : vector<2x64xf32>
    %c0_17 = arith.constant 0 : index
    %c0_18 = arith.constant 0 : index
    %20 = vector.load %arg6[%c0_17, %c0_18] : memref<2x64xf32, #tpu.memory_space<vmem>>, vector<2x64xf32>
    tpu.vector_store %arg6[%c0_17, %c0_18], %19 {strides = array<i32>} : memref<2x64xf32, #tpu.memory_space<vmem>>, vector<2x64xf32>,
    return
  }
  func.func @transform_0(%arg0: i32) -> (i32, i32) {
    %c0_i32 = arith.constant 0 : i32
    %c0_i32_0 = arith.constant 0 : i32
    %c0_i32_1 = arith.constant 0 : i32
    return %c0_i32, %c0_i32_0 : i32, i32
  }
  func.func @transform_1(%arg0: i32) -> (i32, i32) {
    %c0_i32 = arith.constant 0 : i32
    %c0_i32_0 = arith.constant 0 : i32
    %c0_i32_1 = arith.constant 0 : i32
    return %c0_i32, %c0_i32_0 : i32, i32
  }
  func.func @transform_2(%arg0: i32) -> (i32, i32) {
    %c0_i32 = arith.constant 0 : i32
    %c0_i32_0 = arith.constant 0 : i32
    %c0_i32_1 = arith.constant 0 : i32
    return %c0_i32, %c0_i32_0 : i32, i32
  }
  func.func @transform_3(%arg0: i32) -> (i32, i32) {
    %c0_i32 = arith.constant 0 : i32
    %c0_i32_0 = arith.constant 0 : i32
    %c0_i32_1 = arith.constant 0 : i32
    return %c0_i32, %c0_i32_0 : i32, i32
  }
  func.func @transform_4(%arg0: i32) -> (i32, i32) {
    %c0_i32 = arith.constant 0 : i32
    %c0_i32_0 = arith.constant 0 : i32
    %c0_i32_1 = arith.constant 0 : i32
    return %c0_i32, %c0_i32_0 : i32, i32
  }
  func.func @transform_5(%arg0: i32) -> (i32, i32) {
    %c0_i32 = arith.constant 0 : i32
    %c0_i32_0 = arith.constant 0 : i32
    %c0_i32_1 = arith.constant 0 : i32
    return %c0_i32, %c0_i32_0 : i32, i32
  }
}

module attributes {stable_mosaic.version = 11 : i64} {
  func.func @_rescale_kernel(%arg0: i32, %arg1: memref<16x8xf32, #tpu.memory_space<vmem>>, %arg2: memref<16x128xf32, #tpu.memory_space<vmem>>, %arg3: memref<16x128xf32, #tpu.memory_space<vmem>>) attributes {dimension_semantics = [#tpu.dimension_semantics<parallel>], iteration_bounds = array<i64: 1>, scalar_prefetch = 0 : i64, scratch_operands = 0 : i64, tpu.core_type = #tpu.core_type<tc>, window_params = [{transform_indices = @transform_0, window_bounds = array<i64: 16, 8>}, {transform_indices = @transform_1, window_bounds = array<i64: 16, 128>}, {transform_indices = @transform_2, window_bounds = array<i64: 16, 128>}]} {
    %0 = tpu.iota {dimensions = array<i32: 1>} : vector<8x128xi32>
    %1 = tpu.iota {dimensions = array<i32: 0>} : vector<8x128xi32>
    %c16_i32 = arith.constant 16 : i32
    %2 = vector.broadcast %c16_i32 : i32 to vector<8x128xi32>
    %3 = arith.muli %1, %2 : vector<8x128xi32>
    %4 = arith.cmpi sge, %0, %3 : vector<8x128xi32>
    %c1_i32 = arith.constant 1 : i32
    %5 = vector.broadcast %c1_i32 : i32 to vector<8x128xi32>
    %6 = arith.addi %1, %5 : vector<8x128xi32>
    %c16_i32_0 = arith.constant 16 : i32
    %7 = vector.broadcast %c16_i32_0 : i32 to vector<8x128xi32>
    %8 = arith.muli %6, %7 : vector<8x128xi32>
    %9 = arith.cmpi slt, %0, %8 : vector<8x128xi32>
    %10 = arith.andi %4, %9 : vector<8x128xi1>
    %11 = arith.extui %10 : vector<8x128xi1> to vector<8x128xi32>
    %12 = arith.sitofp %11 : vector<8x128xi32> to vector<8x128xf32>
    %c0 = arith.constant 0 : index
    %c0_1 = arith.constant 0 : index
    %13 = vector.load %arg1[%c0, %c0_1] : memref<16x8xf32, #tpu.memory_space<vmem>>, vector<16x8xf32>
    %cst = arith.constant dense<0.000000e+00> : vector<16x128xf32>
    %14 = tpu.matmul %13, %12, %cst {dimension_numbers = #tpu.dot_dimension_numbers<[1], [0], [0], [1], [0, 0, 1, 1], [], []>} : vector<16x8xf32>, vector<8x128xf32>, vector<16x128xf32> -> vector<16x128xf32>
    %c0_2 = arith.constant 0 : index
    %c0_3 = arith.constant 0 : index
    %15 = vector.load %arg2[%c0_2, %c0_3] : memref<16x128xf32, #tpu.memory_space<vmem>>, vector<16x128xf32>
    %16 = arith.mulf %15, %14 : vector<16x128xf32>
    %c0_4 = arith.constant 0 : index
    %c0_5 = arith.constant 0 : index
    %17 = vector.load %arg3[%c0_4, %c0_5] : memref<16x128xf32, #tpu.memory_space<vmem>>, vector<16x128xf32>
    tpu.vector_store %arg3[%c0_4, %c0_5], %16 {strides = array<i32>} : memref<16x128xf32, #tpu.memory_space<vmem>>, vector<16x128xf32>,
    return
  }
  func.func @transform_0(%arg0: i32) -> (i32, i32) {
    %c0_i32 = arith.constant 0 : i32
    %c0_i32_0 = arith.constant 0 : i32
    return %arg0, %c0_i32 : i32, i32
  }
  func.func @transform_1(%arg0: i32) -> (i32, i32) {
    %c0_i32 = arith.constant 0 : i32
    %c0_i32_0 = arith.constant 0 : i32
    return %arg0, %c0_i32 : i32, i32
  }
  func.func @transform_2(%arg0: i32) -> (i32, i32) {
    %c0_i32 = arith.constant 0 : i32
    %c0_i32_0 = arith.constant 0 : i32
    return %arg0, %c0_i32 : i32, i32
  }
}

</mosaic_0001>

<bundles_post_ra>
// kernel: reverse
= control target key start
LH: loop header
LB: loop body
LE: loop exit
PB: predicated region body
PF: predicated region fallthrough
CT: control target
= control target key end

     0   :  { %2 = vsyncpa [#allocation4], 0  ;;  %v56_v2 = vld [vmem:[#allocation1 + $0x8] sm:$0xf]  ;;  %v63_v3 = vld [vmem:[#allocation1] sm:$0xf]  ;;  %v73_v6 = vlaneseq  ;;  %s182_s0 = inlined_call_operand.vmem [shape: f32[2,64,3], index: 0, kind: input, shape index: {}]   ;;  %s183_s1 = inlined_call_operand.hbm [shape: f32[2,64,3], index: 1, kind: output, shape index: {}]  }
   0x1   :  { %v19_v0 = vld [vmem:[%s182_s0] sm:$0xf]  ;;  %v21_v1 = vld [vmem:[%s182_s0 + $0x4] sm:$0xf]  ;;  %58 = vst [vmem:[#allocation0 + $0x10] sm:$0xf] %v56_v2 }
   0x2   :  { %20 = vst [vmem:[#allocation1 + $0x4] sm:$0xf] %v19_v0  ;;  %22 = vst [vmem:[#allocation1 + $0xc] sm:$0xf] %v21_v1  ;;  %v74_v11 = vshrl.u32 %v73_v6, 7  ;;  %s151_s0 = smov [#allocation3]  }
   0x3   :  { %64 = vst [vmem:[#allocation0] sm:$0xf] %v63_v3  ;;  %s105_s10 = sshll.u32 %s151_s0, 4  ;;  %s106_s10 = int_to_ptr.vmem [resolvable:$true] %s105_s10 }
   0x4   :  { %vm75_vm0 = vcmp.lt.s32.totalorder %v74_v11, 3  ;;  %s127_s11 = scalar_lea.vmem %s106_s10, 128  ;;  %p132_p1 = scmp.lt.s32.totalorder %s106_s10, %s106_s10 }
   0x5   :  { %p128_p0 = scmp.ne.s32.totalorder %s106_s10, %s127_s11  ;;  %p133_p2 = scmp.lt.s32.totalorder %s127_s11, %s127_s11 }
   0x7   :  { %p134_p3 = por %p133_p2, %p132_p1 }
   0x8   :  { %v80_v8 = vld [vmem:[#allocation0 + $0x17] ss:$-1 sm:$0xff] }
   0x9   :  { %v51_v4 = vld [vmem:[#allocation1 + $0xc] sm:$0xf]  ;;  %v60_v5 = vld [vmem:[#allocation1 + $0x4] sm:$0xf]  ;;  %v81_v10 = vrot.slane %v80_v8, 5  ;;  %p135_p4 = pnand %p134_p3, %p128_p0 }
   0xa   :  { %53 = vst [vmem:[#allocation0 + $0x18] sm:$0xf] %v51_v4  ;;  %62 = vst [vmem:[#allocation0 + $0x8] sm:$0xf] %v60_v5  ;;  %v66_v7 = vld [vmem:[#allocation0 + $0x7] ss:$-1 sm:$0xff] }
   0xb   :  { %v67_v9 = vrot.slane %v66_v7, 5  ;;  %82 = vst [vmem:[#allocation2 + $0x8] sm:$0xff] %v81_v10 }
   0xd   :  { %68 = vst [vmem:[#allocation2] sm:$0xff] %v67_v9 }
  0x11   :  { %v71_v12 = vld [vmem:[#allocation0 + $0xf] ss:$-1 sm:$0xff]  ;;  %v85_v13 = vld [vmem:[#allocation0 + $0x1f] ss:$-1 sm:$0xff] }
  0x12   :  { %v72_v14 = vrot.slane %v71_v12, 5  ;;  %v86_v15 = vrot.slane %v85_v13, 5 }
  0x14   :  { %76 = vst.msk [vmem:[#allocation2] sm:$0xff] %vm75_vm0, %v72_v14  ;;  %90 = vst.msk [vmem:[#allocation2 + $0x8] sm:$0xff] %vm75_vm0, %v86_v15 }
  0x1b   :  { %v94_v16 = vld [vmem:[#allocation2] sm:$0xf]  ;;  %v98_v17 = vld [vmem:[#allocation2 + $0x8] sm:$0xf] }
  0x1c   :  { %96 = vst [vmem:[#allocation3] sm:$0xf] %v94_v16  ;;  %101 = vst [vmem:[#allocation3 + $0x4] sm:$0xf] %v98_v17 }
  0x1d   :  { %138 = shalt.err (!%p135_p4)
}
  0x1e   :  { %s139_s14 = scalar_lea.hbm %s183_s1, 128 }
  0x1f   :  { %p140_p5 = scmp.ne.s32.totalorder %s183_s1, %s139_s14  ;;  %p143_p6 = scmp.lt.u32.totalorder %s139_s14, %s183_s1 }
  0x21   :  { %p145_p7 = pnand %p143_p6, %p140_p5 }
  0x23   :  { %148 = shalt.err (!%p145_p7)
}
  0x24   :  { %s152_s19 = smov 64   ;;  %s153_s20 = smov 4  }
  0x25   :  { %111 = dma.vmem_to_hbm [thread:$0]  %s106_s10, 128, %s183_s1, [#allocation4], %s152_s19, %s152_s19, %s153_s20  }
  0x26   :  { %149 = dma.done.wait [#allocation4], 128  }
  0x27   :  { %150 = vsyncadd [#allocation4], 4294967168 }
  0x28   :  { %113 = vsyncpa [#allocation4], 1 }

// kernel: custom-call.21
= control target key start
LH: loop header
LB: loop body
LE: loop exit
PB: predicated region body
PF: predicated region fallthrough
CT: control target
= control target key end

     0   :  { %s4272_s0 = inlined_call_operand.vmem [shape: f32[2,32,32], index: 0, kind: input, shape index: {}]   ;;  %s4273_s1 = inlined_call_operand.vmem [shape: f32[2,32,32], index: 1, kind: input, shape index: {}]   ;;  %s4274_s2 = inlined_call_operand.vmem [shape: f32[2,32,32], index: 2, kind: input, shape index: {}]   ;;  %s4275_s3 = inlined_call_operand.vmem [shape: f32[2,32,32], index: 3, kind: input, shape index: {}]   ;;  %s4276_s4 = inlined_call_operand.vmem [shape: f32[2,32], index: 4, kind: output, shape index: {0}]   ;;  %s4277_s5 = inlined_call_operand.vmem [shape: f32[2,32], index: 5, kind: output, shape index: {1}]   ;;  %s4278_s6 = inlined_call_operand.vmem [shape: f32[2,32,32], index: 6, kind: output, shape index: {2}]   ;;  %s4279_s7 = inlined_call_operand.vmem [shape: f32[2,32,32], index: 7, kind: output, shape index: {3}]   ;;  %s4280_s8 = inlined_call_operand.vmem [shape: f32[2,32,32], index: 8, kind: output, shape index: {4}]   ;;  %s4281_s9 = inlined_call_operand.vmem [shape: f32[2,32,32], index: 9, kind: output, shape index: {5}]  }
   0x1   :  { %4288 = sst [smem:[#allocation28_spill]] %s4272_s0 }
   0x2   :  { %4289 = sst [smem:[#allocation29_spill]] %s4273_s1 }
   0x3   :  { %4290 = sst [smem:[#allocation30_spill]] %s4274_s2 }
   0x4   :  { %4291 = sst [smem:[#allocation31_spill]] %s4275_s3 }
   0x5   :  { %4292 = sst [smem:[#allocation32_spill]] %s4280_s8 }
   0x6   :  { %4293 = sst [smem:[#allocation33_spill]] %s4281_s9 }
   0x7   :  { %s3253_s30 = smov 0   ;;  %s3255_s10 = smov 0  }
   0x8   :  { %s3257_s11 = smov 0  }
   0x9 LB: > { %4294 = sst [smem:[#allocation25_spill]] %s3186_s10  ;;  %s3269_s12 = sadd.s32 4294967295, %s3190_s11   ;;  %s3190_s11 = sphi %s3257_s11, %s4318_s11   ;;  %s3186_s10 = sphi %s3255_s10, %s4320_s10   ;;  %s3182_s30 = sphi %s3253_s30, %s4319_s30  }
   0xa   : > { %s3272_s13 = sadd.s32 1, %s3190_s11   ;;  %s20_s14 = sshrl.u32 %s3190_s11, 3 }
   0xb   : > { %4295 = sst [smem:[#allocation26_spill]] %s3272_s13  ;;  %s21_s15 = sshrl.u32 %s3272_s13, 3 }
   0xc   : > { %s22_s16 = ssub.s32 %s20_s14, %s21_s15  ;;  %s25_s17 = sadd.s32 1, %s3186_s10 }
   0xd   : > { %p23_p0 = scmp.eq.s32.totalorder %s22_s16, 0  ;;  %p35_p1 = scmp.ne.s32.totalorder %s3186_s10, %s3182_s30 }
   0xe   : > { %p36_p2 = scmp.eq.s32.totalorder %s3269_s12, 1  ;;  %p2742_p4 = scmp.ge.s32.totalorder %s3190_s11, 2 }
   0xf   : > { %s3281_s18 = scalar_select %p23_p0, %s3186_s10, %s25_s17  }
  0x10   : > { %p3283_p3 = por %p36_p2, %p35_p1  ;;  %86 = sbr.rel (%p2742_p4) target bundleno = 35 (0x23), region = 16 }
  0x11   : > { %4296 = sst [smem:[#allocation27_spill]] %s3281_s18  ;;  %s88_s20 = sand.u32 (!%p2742_p4), 1, %s3190_s11  }
  0x12   : > { %s2744_s21 = sshll.u32 (!%p2742_p4), %s3190_s11, 5  ;;  %s3290_s22 = sshll.u32 (!%p2742_p4), %s88_s20, 5 }
  0x13   : > { %s4298_s0 = sld [smem:[#allocation28_spill]] (!%p2742_p4)  ;;  %s90_s26 = scalar_lea.vmem (!%p2742_p4), [#allocation0], %s3290_s22 }
  0x14   : > { %s4299_s1 = sld [smem:[#allocation29_spill]] (!%p2742_p4)  ;;  %s4300_s2 = sld [smem:[#allocation30_spill]] (!%p2742_p4) }
  0x15   : > { %s119_s17 = scalar_lea.vmem (!%p2742_p4), [#allocation1], %s3290_s22  ;;  %s4301_s3 = sld [smem:[#allocation31_spill]] (!%p2742_p4) }
  0x19   : > { %s92_s25 = scalar_lea.vmem %s4298_s0, %s2744_s21 }
  0x1a   : > { %v105_v0 = vld [vmem:[%s92_s25] sm:$0xff]  ;;  %v107_v1 = vld [vmem:[%s92_s25 + $0x8] sm:$0xff]  ;;  %v109_v2 = vld [vmem:[%s92_s25 + $0x10] sm:$0xff]  ;;  %s121_s29 = scalar_lea.vmem %s4299_s1, %s2744_s21  ;;  %s150_s16 = scalar_lea.vmem %s4300_s2, %s2744_s21 }
  0x1b   : > { %106 = vst [vmem:[%s90_s26] sm:$0xff] %v105_v0  ;;  %108 = vst [vmem:[%s90_s26 + $0x8] sm:$0xff] %v107_v1  ;;  %v111_v3 = vld [vmem:[%s92_s25 + $0x18] sm:$0xff]  ;;  %v134_v4 = vld [vmem:[%s121_s29] sm:$0xff]  ;;  %s179_s24 = scalar_lea.vmem %s4301_s3, %s2744_s21  ;;  %s148_s25 = scalar_lea.vmem [#allocation2], %s3290_s22 }
  0x1c   : > { %110 = vst [vmem:[%s90_s26 + $0x10] sm:$0xff] %v109_v2  ;;  %112 = vst [vmem:[%s90_s26 + $0x18] sm:$0xff] %v111_v3  ;;  %v136_v5 = vld [vmem:[%s121_s29 + $0x8] sm:$0xff]  ;;  %v138_v6 = vld [vmem:[%s121_s29 + $0x10] sm:$0xff]  ;;  %s177_s26 = scalar_lea.vmem [#allocation3], %s3290_s22 }
  0x1d   : > { %135 = vst [vmem:[%s119_s17] sm:$0xff] %v134_v4  ;;  %137 = vst [vmem:[%s119_s17 + $0x8] sm:$0xff] %v136_v5  ;;  %v140_v7 = vld [vmem:[%s121_s29 + $0x18] sm:$0xff]  ;;  %v163_v8 = vld [vmem:[%s150_s16] sm:$0xff] }
  0x1e   : > { %139 = vst [vmem:[%s119_s17 + $0x10] sm:$0xff] %v138_v6  ;;  %v165_v9 = vld [vmem:[%s150_s16 + $0x8] sm:$0xff]  ;;  %141 = vst [vmem:[%s119_s17 + $0x18] sm:$0xff] %v140_v7  ;;  %v167_v10 = vld [vmem:[%s150_s16 + $0x10] sm:$0xff] }
  0x1f   : > { %164 = vst [vmem:[%s148_s25] sm:$0xff] %v163_v8  ;;  %166 = vst [vmem:[%s148_s25 + $0x8] sm:$0xff] %v165_v9  ;;  %v169_v11 = vld [vmem:[%s150_s16 + $0x18] sm:$0xff]  ;;  %v192_v12 = vld [vmem:[%s179_s24] sm:$0xff] }
  0x20   : > { %168 = vst [vmem:[%s148_s25 + $0x10] sm:$0xff] %v167_v10  ;;  %170 = vst [vmem:[%s148_s25 + $0x18] sm:$0xff] %v169_v11  ;;  %v194_v13 = vld [vmem:[%s179_s24 + $0x8] sm:$0xff]  ;;  %v196_v14 = vld [vmem:[%s179_s24 + $0x10] sm:$0xff] }
  0x21   : > { %193 = vst [vmem:[%s177_s26] sm:$0xff] %v192_v12  ;;  %v198_v15 = vld [vmem:[%s179_s24 + $0x18] sm:$0xff]  ;;  %195 = vst [vmem:[%s177_s26 + $0x8] sm:$0xff] %v194_v13 }
  0x22   : > { %197 = vst [vmem:[%s177_s26 + $0x10] sm:$0xff] %v196_v14  ;;  %199 = vst [vmem:[%s177_s26 + $0x18] sm:$0xff] %v198_v15 }
  0x23 PF: > { %p2751_p5 = scmp.ge.s32.totalorder %s3190_s11, 1  ;;  %p204_p6 = scmp.lt.s32.totalorder %s3190_s11, 3 }
  0x25   : > { %p205_p7 = pnand %p2751_p5, %p204_p6 }
  0x27   : > { %208 = sbr.rel (%p205_p7) target bundleno = 1200 (0x4b0), region = 96 }
  0x2e   : > { %s211_s21 = sand.u32 1, %s3269_s12   ;;  %s245_s27 = sand.u32 1, %s3182_s30   ;;  %v361_v16 = vlaneseq  ;;  %v3200_v31 = vmov 0.0  }
  0x2f   : > { %s3312_s22 = sshll.u32 %s211_s21, 5  ;;  %s3314_s28 = sshll.u32 %s245_s27, 1 }
  0x30   : > { %v3316_v17 = vshrl.u32 %v361_v16, 7  ;;  %s213_s29 = scalar_lea.vmem [#allocation0], %s3312_s22  ;;  %s217_s11 = scalar_lea.vmem [#allocation1], %s3312_s22  ;;  %v3320_v24 = vand.u32 127, %v361_v16 }
  0x31   : > { %v273_v18 = vld [vmem:[%s213_s29] sm:$0xff]  ;;  %v2762_v19 = vld [vmem:[%s213_s29 + $0x8] sm:$0xff]  ;;  %v2764_v20 = vld [vmem:[%s213_s29 + $0x10] sm:$0xff]  ;;  %s221_s30 = scalar_lea.vmem [#allocation2], %s3312_s22  ;;  %s3330_s14 = scalar_lea.vmem [#allocation8], %s3312_s22 }
  0x32   : > { %v2766_v21 = vld [vmem:[%s213_s29 + $0x18] sm:$0xff]  ;;  %v288_v22 = vld [vmem:[%s217_s11] sm:$0xff]  ;;  %v2768_v23 = vld [vmem:[%s217_s11 + $0x8] sm:$0xff]  ;;  %v3323_v17 = vmov %v3316_v17  ;;  %332 = vst [vmem:[%s3330_s14] sm:$0xff] %v3200_v31  ;;  %s3337_s15 = scalar_lea.vmem [#allocation9], %s3312_s22  ;;  %s272_s16 = smov [#allocation12]  ;;  %v363_v24 = vmov %v3320_v24  ;;  %vm2541_vm8 = vcmp.lt.s32.totalorder %v3320_v24, 32 }
  0x33   : > { %v2770_v25 = vld [vmem:[%s217_s11 + $0x10] sm:$0xff]  ;;  %v2772_v26 = vld [vmem:[%s217_s11 + $0x18] sm:$0xff]  ;;  %v303_v27 = vld [vmem:[%s221_s30] sm:$0xff]  ;;  %v3327_v17 = vmov %v3316_v17  ;;  %2786 = vst [vmem:[%s3330_s14 + $0x8] sm:$0xff] %v3200_v31  ;;  %v376_v32 = vadd.s32 8, %v3323_v17  ;;  %s287_s17 = smov [#allocation13]  ;;  %v397_v24 = vmov %v3320_v24  ;;  %vm370_vm0 = vcmp.eq.s32.totalorder %v3323_v17, %v363_v24 }
  0x34   : > { %v2774_v28 = vld [vmem:[%s221_s30 + $0x8] sm:$0xff]  ;;  %v2776_v29 = vld [vmem:[%s221_s30 + $0x10] sm:$0xff]  ;;  %v2778_v30 = vld [vmem:[%s221_s30 + $0x18] sm:$0xff]  ;;  %2787 = vst [vmem:[%s3330_s14 + $0x10] sm:$0xff] %v3200_v31  ;;  %s225_s20 = scalar_lea.vmem [#allocation3], %s3312_s22  ;;  %s3346_s23 = scalar_lea.vmem [#allocation10], %s3312_s22  ;;  %vm404_vm4 = vcmp.eq.s32.totalorder %v3327_v17, %v397_v24 }
  0x35   : > { %2788 = vst [vmem:[%s3330_s14 + $0x18] sm:$0xff] %v3200_v31  ;;  %339 = vst [vmem:[%s3337_s15] sm:$0xff] %v3200_v31  ;;  %v318_v33 = vld [vmem:[%s225_s20] sm:$0xff]  ;;  %v2780_v34 = vld [vmem:[%s225_s20 + $0x8] sm:$0xff]  ;;  %s3353_s24 = scalar_lea.vmem [#allocation11], %s3312_s22  ;;  %v383_v36 = vadd.s32 16, %v3323_v17  ;;  %s302_s25 = smov [#allocation14]  ;;  %vm377_vm1 = vcmp.eq.s32.totalorder %v376_v32, %v363_v24 }
  0x36   : > { %2789 = vst [vmem:[%s3337_s15 + $0x8] sm:$0xff] %v3200_v31  ;;  %2790 = vst [vmem:[%s3337_s15 + $0x10] sm:$0xff] %v3200_v31  ;;  %v2782_v35 = vld [vmem:[%s225_s20 + $0x10] sm:$0xff]  ;;  %s317_s26 = smov [#allocation15]  ;;  %v2784_v37 = vld [vmem:[%s225_s20 + $0x18] sm:$0xff]  ;;  %v390_v38 = vadd.s32 24, %v3323_v17  ;;  %s360_s14 = smov %s3330_s14 }
  0x37   : > { %2791 = vst [vmem:[%s3337_s15 + $0x18] sm:$0xff] %v3200_v31  ;;  %346 = vst [vmem:[%s3346_s23] sm:$0xff] %v3200_v31  ;;  %v410_v39 = vadd.s32 8, %v3327_v17  ;;  %v417_v40 = vadd.s32 16, %v3327_v17  ;;  %v424_v41 = vadd.s32 24, %v3327_v17  ;;  %vm384_vm2 = vcmp.eq.s32.totalorder %v383_v36, %v363_v24  ;;  %s2537_s22 = smov [#allocation12]  ;;  %s2581_s29 = smov [#allocation13] }
  0x38   : > { %2792 = vst [vmem:[%s3346_s23 + $0x8] sm:$0xff] %v3200_v31  ;;  %2793 = vst [vmem:[%s3346_s23 + $0x10] sm:$0xff] %v3200_v31  ;;  %vm391_vm3 = vcmp.eq.s32.totalorder %v390_v38, %v363_v24  ;;  %v2536_v17 = vmov %v3316_v17  ;;  %s3394_s11 = smov [#allocation14]  ;;  %s2651_s30 = smov [#allocation15] }
  0x39   : > { %2794 = vst [vmem:[%s3346_s23 + $0x18] sm:$0xff] %v3200_v31  ;;  %353 = vst [vmem:[%s3353_s24] sm:$0xff] %v3200_v31  ;;  %vm411_vm5 = vcmp.eq.s32.totalorder %v410_v39, %v397_v24  ;;  %vm418_vm6 = vcmp.eq.s32.totalorder %v417_v40, %v397_v24  ;;  %vm425_vm7 = vcmp.eq.s32.totalorder %v424_v41, %v397_v24  ;;  %v2577_v24 = vmov %v3320_v24 }
  0x3a   : > { %2795 = vst [vmem:[%s3353_s24 + $0x8] sm:$0xff] %v3200_v31  ;;  %2796 = vst [vmem:[%s3353_s24 + $0x10] sm:$0xff] %v3200_v31  ;;  %v2533_v24 = vmov %v3320_v24  ;;  %v2552_v12 = vadd.s32 8, %v2536_v17 }
  0x3b   : > { %2797 = vst [vmem:[%s3353_s24 + $0x18] sm:$0xff] %v3200_v31  ;;  %274 = vst [vmem:[%s272_s16] sm:$0xff] %v273_v18  ;;  %s394_s24 = smov %s3353_s24  ;;  %vm2546_vm9 = vcmp.eq.s32.totalorder %v2536_v17, %v2533_v24  ;;  %v2570_v31 = vadd.s32 24, %v2536_v17 }
  0x3c   : > { %2763 = vst [vmem:[%s272_s16 + $0x8] sm:$0xff] %v2762_v19  ;;  %2765 = vst [vmem:[%s272_s16 + $0x10] sm:$0xff] %v2764_v20  ;;  %v367_v42 = vld [vmem:[%s360_s14] sm:$0xff]  ;;  %v2798_v43 = vld [vmem:[%s360_s14 + $0x8] sm:$0xff]  ;;  %vm2553_vm10 = vcmp.eq.s32.totalorder %v2552_v12, %v2533_v24 }
  0x3d   : > { %2767 = vst [vmem:[%s272_s16 + $0x18] sm:$0xff] %v2766_v21  ;;  %289 = vst [vmem:[%s287_s17] sm:$0xff] %v288_v22  ;;  %v2800_v44 = vld [vmem:[%s360_s14 + $0x10] sm:$0xff]  ;;  %v371_v45 = vsel %vm370_vm0, 1.0, %v367_v42  ;;  %v378_v46 = vsel %vm377_vm1, 1.0, %v2798_v43  ;;  %v2802_v48 = vld [vmem:[%s360_s14 + $0x18] sm:$0xff]  ;;  %vm2571_vm12 = vcmp.eq.s32.totalorder %v2570_v31, %v2533_v24 }
  0x3e   : > { %2769 = vst [vmem:[%s287_s17 + $0x8] sm:$0xff] %v2768_v23  ;;  %2771 = vst [vmem:[%s287_s17 + $0x10] sm:$0xff] %v2770_v25  ;;  %v385_v47 = vsel %vm384_vm2, 1.0, %v2800_v44  ;;  %v392_v51 = vsel %vm391_vm3, 1.0, %v2802_v48 }
  0x3f   : > { %2773 = vst [vmem:[%s287_s17 + $0x18] sm:$0xff] %v2772_v26  ;;  %304 = vst [vmem:[%s302_s25] sm:$0xff] %v303_v27 }
  0x40   : > { %2775 = vst [vmem:[%s302_s25 + $0x8] sm:$0xff] %v2774_v28  ;;  %2777 = vst [vmem:[%s302_s25 + $0x10] sm:$0xff] %v2776_v29 }
  0x41   : > { %2779 = vst [vmem:[%s302_s25 + $0x18] sm:$0xff] %v2778_v30  ;;  %319 = vst [vmem:[%s317_s26] sm:$0xff] %v318_v33  ;;  %v2561_v30 = vadd.s32 16, %v2536_v17  ;;  %v2580_v17 = vmov %v3316_v17 }
  0x42   : > { %2781 = vst [vmem:[%s317_s26 + $0x8] sm:$0xff] %v2780_v34  ;;  %2783 = vst [vmem:[%s317_s26 + $0x10] sm:$0xff] %v2782_v35  ;;  %v401_v49 = vld [vmem:[%s394_s24] sm:$0xff]  ;;  %v2804_v50 = vld [vmem:[%s394_s24 + $0x8] sm:$0xff]  ;;  %v2615_v17 = vmov %v3316_v17 }
  0x43   : > { %2785 = vst [vmem:[%s317_s26 + $0x18] sm:$0xff] %v2784_v37  ;;  %372 = vst [vmem:[%s360_s14] sm:$0xff] %v371_v45  ;;  %v405_v52 = vsel %vm404_vm4, 1.0, %v401_v49  ;;  %v412_v53 = vsel %vm411_vm5, 1.0, %v2804_v50  ;;  %v2806_v54 = vld [vmem:[%s394_s24 + $0x10] sm:$0xff]  ;;  %v2808_v55 = vld [vmem:[%s394_s24 + $0x18] sm:$0xff]  ;;  %vm2562_vm11 = vcmp.eq.s32.totalorder %v2561_v30, %v2533_v24  ;;  %v2612_v24 = vmov %v3320_v24 }
  0x44   : > { %2799 = vst [vmem:[%s360_s14 + $0x8] sm:$0xff] %v378_v46  ;;  %2801 = vst [vmem:[%s360_s14 + $0x10] sm:$0xff] %v385_v47  ;;  %v419_v56 = vsel %vm418_vm6, 1.0, %v2806_v54  ;;  %v426_v57 = vsel %vm425_vm7, 1.0, %v2808_v55  ;;  %v2543_v58 = vld [vmem:[%s2537_s22] sm:$0xff]  ;;  %v2810_v59 = vld [vmem:[%s2537_s22 + $0x8] sm:$0xff]  ;;  %v2650_v17 = vmov %v3316_v17  ;;  %v2647_v24 = vmov %v3320_v24 }
  0x45   : > { %2803 = vst [vmem:[%s360_s14 + $0x18] sm:$0xff] %v392_v51  ;;  %406 = vst [vmem:[%s394_s24] sm:$0xff] %v405_v52  ;;  %v2811_v60 = vld [vmem:[%s2537_s22 + $0x10] sm:$0xff]  ;;  %v2544_v61 = vsel %vm2541_vm8, %v2543_v58, 0.0  ;;  %v2550_v62 = vsel %vm2541_vm8, %v2810_v59, 0.0  ;;  %v2812_v0 = vld [vmem:[%s2537_s22 + $0x18] sm:$0xff]  ;;  %vm2660_vm13 = vcmp.eq.s32.totalorder %v2650_v17, %v2647_v24 }
  0x46   : > { %2805 = vst [vmem:[%s394_s24 + $0x8] sm:$0xff] %v412_v53  ;;  %2807 = vst [vmem:[%s394_s24 + $0x10] sm:$0xff] %v419_v56  ;;  %v2559_v63 = vsel %vm2541_vm8, %v2811_v60, 0.0  ;;  %v2587_v1 = vld [vmem:[%s2581_s29] sm:$0xff]  ;;  %v2545_v2 = vmul.f32 %v2544_v61, %v2544_v61  ;;  %v2551_v3 = vmul.f32 %v2550_v62, %v2550_v62  ;;  %v2568_v5 = vsel %vm2541_vm8, %v2812_v0, 0.0  ;;  %v2813_v6 = vld [vmem:[%s2581_s29 + $0x8] sm:$0xff] }
  0x47   : > { %2809 = vst [vmem:[%s394_s24 + $0x18] sm:$0xff] %v426_v57  ;;  %v2560_v4 = vmul.f32 %v2559_v63, %v2559_v63  ;;  %v2588_v7 = vsel %vm2541_vm8, %v2587_v1, 0.0  ;;  %v2569_v9 = vmul.f32 %v2568_v5, %v2568_v5  ;;  %v2814_v10 = vld [vmem:[%s2581_s29 + $0x10] sm:$0xff]  ;;  %v2594_v11 = vsel %vm2541_vm8, %v2813_v6, 0.0  ;;  %v2815_v15 = vld [vmem:[%s2581_s29 + $0x18] sm:$0xff] }
  0x48   : > { %v2556_v8 = vadd.f32 %v2551_v3, %v2545_v2  ;;  %v2589_v14 = vmul.f32 %v2588_v7, %v2588_v7  ;;  %v2600_v16 = vsel %vm2541_vm8, %v2814_v10, 0.0  ;;  %v2595_v19 = vmul.f32 %v2594_v11, %v2594_v11  ;;  %v2622_v20 = vld [vmem:[%s3394_s11] sm:$0xff]  ;;  %v2816_v22 = vld [vmem:[%s3394_s11 + $0x8] sm:$0xff]  ;;  %v2817_v35 = vld [vmem:[%s3394_s11 + $0x10] sm:$0xff] }
  0x49   : > { %v2606_v21 = vsel %vm2541_vm8, %v2815_v15, 0.0  ;;  %v2547_v23 = vsel %vm2546_vm9, 0.0, %v2545_v2  ;;  %v2601_v26 = vmul.f32 %v2600_v16, %v2600_v16  ;;  %v2554_v27 = vsel %vm2553_vm10, 0.0, %v2551_v3  ;;  %v2818_v38 = vld [vmem:[%s3394_s11 + $0x18] sm:$0xff] }
  0x4a   : > { %v2565_v13 = vadd.f32 %v2560_v4, %v2556_v8  ;;  %v2623_v28 = vsel %vm2541_vm8, %v2622_v20, 0.0  ;;  %v2555_v29 = vadd.f32 %v2554_v27, %v2547_v23  ;;  %v2607_v33 = vmul.f32 %v2606_v21, %v2606_v21  ;;  %v2657_v45 = vld [vmem:[%s2651_s30] sm:$0xff]  ;;  %v2819_v50 = vld [vmem:[%s2651_s30 + $0x8] sm:$0xff]  ;;  %v2820_v55 = vld [vmem:[%s2651_s30 + $0x10] sm:$0xff] }
  0x4b   : > { %v2629_v34 = vsel %vm2541_vm8, %v2816_v22, 0.0  ;;  %v2624_v37 = vmul.f32 %v2623_v28, %v2623_v28  ;;  %v2563_v39 = vsel %vm2562_vm11, 0.0, %v2560_v4  ;;  %v2572_v40 = vsel %vm2571_vm12, 0.0, %v2569_v9  ;;  %v2821_v60 = vld [vmem:[%s2651_s30 + $0x18] sm:$0xff] }
  0x4c   : > { %v2574_v18 = vadd.f32 %v2569_v9, %v2565_v13  ;;  %v2635_v41 = vsel %vm2541_vm8, %v2817_v35, 0.0  ;;  %v2564_v42 = vadd.f32 %v2563_v39, %v2555_v29  ;;  %v2630_v44 = vmul.f32 %v2629_v34, %v2629_v34 }
  0x4d   : > { %v2641_v46 = vsel %vm2541_vm8, %v2818_v38, 0.0  ;;  %v2636_v49 = vmul.f32 %v2635_v41, %v2635_v41  ;;  %v2658_v51 = vsel %vm2541_vm8, %v2657_v45, 0.0  ;;  %v2666_v56 = vsel %vm2541_vm8, %v2819_v50, 0.0 }
  0x4e   : > { %v2591_v25 = vadd.f32 %v2589_v14, %v2574_v18  ;;  %v2573_v47 = vadd.f32 %v2572_v40, %v2564_v42  ;;  %v2642_v54 = vmul.f32 %v2641_v46, %v2641_v46  ;;  %v2659_v59 = vmul.f32 %v2658_v51, %v2658_v51 }
  0x4f   : > { %v2675_v61 = vsel %vm2541_vm8, %v2820_v55, 0.0  ;;  %v2667_v0 = vmul.f32 %v2666_v56, %v2666_v56  ;;  %v2684_v1 = vsel %vm2541_vm8, %v2821_v60, 0.0  ;;  %v2668_v6 = vadd.s32 8, %v2650_v17 }
  0x50   : > { %v2597_v32 = vadd.f32 %v2595_v19, %v2591_v25  ;;  %v2590_v52 = vadd.f32 %v2589_v14, %v2573_v47  ;;  %v2676_v4 = vmul.f32 %v2675_v61, %v2675_v61  ;;  %v2685_v8 = vmul.f32 %v2684_v1, %v2684_v1 }
  0x51   : > { %v2677_v10 = vadd.s32 16, %v2650_v17  ;;  %vm2669_vm14 = vcmp.eq.s32.totalorder %v2668_v6, %v2647_v24  ;;  %v2686_v13 = vadd.s32 24, %v2650_v17  ;;  %v2661_v15 = vsel %vm2660_vm13, 0.0, %v2659_v59 }
  0x52   : > { %v2603_v36 = vadd.f32 %v2601_v26, %v2597_v32  ;;  %v2596_v57 = vadd.f32 %v2595_v19, %v2590_v52  ;;  %v2670_v18 = vsel %vm2669_vm14, 0.0, %v2667_v0 }
  0x53   : > { %vm2678_vm15 = vcmp.eq.s32.totalorder %v2677_v10, %v2647_v24  ;;  %vm2687_vm0 = vcmp.eq.s32.totalorder %v2686_v13, %v2647_v24 }
  0x54   : > { %v2609_v43 = vadd.f32 %v2607_v33, %v2603_v36  ;;  %v2602_v62 = vadd.f32 %v2601_v26, %v2596_v57  ;;  %v2679_v20 = vsel %vm2678_vm15, 0.0, %v2676_v4  ;;  %v2688_v22 = vsel %vm2687_vm0, 0.0, %v2685_v8 }
  0x56   : > { %v2626_v48 = vadd.f32 %v2624_v37, %v2609_v43  ;;  %v2608_v2 = vadd.f32 %v2607_v33, %v2602_v62 }
  0x58   : > { %v2632_v53 = vadd.f32 %v2630_v44, %v2626_v48  ;;  %v2625_v5 = vadd.f32 %v2624_v37, %v2608_v2 }
  0x5a   : > { %v2638_v58 = vadd.f32 %v2636_v49, %v2632_v53  ;;  %v2631_v9 = vadd.f32 %v2630_v44, %v2625_v5 }
  0x5c   : > { %v2644_v63 = vadd.f32 %v2642_v54, %v2638_v58  ;;  %v2637_v12 = vadd.f32 %v2636_v49, %v2631_v9 }
  0x5e   : > { %v2663_v3 = vadd.f32 %v2659_v59, %v2644_v63  ;;  %v2643_v16 = vadd.f32 %v2642_v54, %v2637_v12 }
  0x60   : > { %v2672_v7 = vadd.f32 %v2667_v0, %v2663_v3  ;;  %v2662_v19 = vadd.f32 %v2661_v15, %v2643_v16 }
  0x62   : > { %v2681_v11 = vadd.f32 %v2676_v4, %v2672_v7  ;;  %v2671_v21 = vadd.f32 %v2670_v18, %v2662_v19 }
  0x64   : > { %v2690_v14 = vadd.f32 %v2685_v8, %v2681_v11  ;;  %v2680_v23 = vadd.f32 %v2679_v20, %v2671_v21 }
  0x66   : > { %2691 = vadd.xlane.f32.xlu0 %v2690_v14  ;;  %v2689_v25 = vadd.f32 %v2688_v22, %v2680_v23 }
  0x6a   : > { %2699 = vadd.xlane.f32.xlu0 %v2689_v25 }
  0xf3   : > { %v2692_v26 = vpop.xlane.xlu0 %2691 }
  0xf4   : > { %v2693_v27 = vrot.slane %v2692_v26, 4 }
  0xf6   : > { %v2694_v28 = vadd.f32 %v2693_v27, %v2692_v26 }
  0xf7   : > { %v2700_v30 = vpop.xlane.xlu0 %2699 }
  0xf8   : > { %v2695_v29 = vrot.slane %v2694_v28, 2  ;;  %v2701_v31 = vrot.slane %v2700_v30, 4 }
  0xfa   : > { %v2702_v32 = vadd.f32 %v2701_v31, %v2700_v30  ;;  %v2696_v33 = vadd.f32 %v2695_v29, %v2694_v28 }
  0xfc   : > { %v2703_v34 = vrot.slane %v2702_v32, 2  ;;  %v2697_v36 = vrot.slane %v2696_v33, 1 }
  0xfe   : > { %v2704_v35 = vadd.f32 %v2703_v34, %v2702_v32  ;;  %v2698_v39 = vadd.f32 %v2697_v36, %v2696_v33 }
 0x100   : > { %v2705_v37 = vrot.slane %v2704_v35, 1 }
 0x102   : > { %v2706_v38 = vadd.f32 %v2705_v37, %v2704_v35 }
 0x104   : > { %3101 = vpush %v2706_v38 }
 0x105   : > { %3103 = vpush %v2698_v39 }
 0x135   : > { %s3102_s16 = spop %3101 }
 0x136   : > { %s3104_s17 = spop %3103 }
 0x137   : > { %s2709_s20 = smul.f32 1e-10, %s3104_s17 }
 0x139   : > { %p2710_p8 = scmp.le.f32.partialorder %s3102_s16, %s2709_s20 }
 0x13a   : > { %s3425_s25 = smov (!%p2710_p8), 0  }
 0x13b   : > { %2713 = sbr.rel (%p2710_p8) target bundleno = 1145 (0x479), region = 586 }
 0x142 LB: >> { %s3430_s26 = smov 0   ;;  %s3194_s25 = sphi %s3425_s25, %s4311_s25  }
 0x143 LB: >>> { %s628_s22 = smov [#allocation12]  ;;  %v632_v24 = vmov %v3320_v24  ;;  %v635_v17 = vmov %v3316_v17  ;;  %s666_s29 = smov [#allocation13]  ;;  %s3198_s26 = sphi %s3430_s26, %s627_s26  }
 0x144   : >>> { %v670_v24 = vmov %v3320_v24  ;;  %v673_v17 = vmov %v3316_v17  ;;  %v636_v40 = vld [vmem:[%s628_s22] sm:$0xff]  ;;  %vm639_vm1 = vcmp.eq.s32.totalorder %v635_v17, %v632_v24  ;;  %v2822_v41 = vld [vmem:[%s628_s22 + $0x8] sm:$0xff]  ;;  %v644_v42 = vadd.s32 8, %v635_v17  ;;  %v2823_v46 = vld [vmem:[%s628_s22 + $0x10] sm:$0xff]  ;;  %s704_s11 = smov [#allocation15]  ;;  %s629_s30 = smov [#allocation16] }
 0x145   : >>> { %v650_v43 = vadd.s32 16, %v635_v17  ;;  %v656_v44 = vadd.s32 24, %v635_v17  ;;  %v640_v45 = vsel %vm639_vm1, %v636_v40, 0.0  ;;  %v2824_v47 = vld [vmem:[%s628_s22 + $0x18] sm:$0xff]  ;;  %vm677_vm2 = vcmp.eq.s32.totalorder %v673_v17, %v670_v24  ;;  %v674_v50 = vld [vmem:[%s666_s29] sm:$0xff]  ;;  %v2825_v51 = vld [vmem:[%s666_s29 + $0x8] sm:$0xff]  ;;  %s3469_s14 = smov %s3330_s14  ;;  %s3472_s15 = smov %s3337_s15 }
 0x146   : >>> { %v682_v48 = vadd.s32 8, %v673_v17  ;;  %v688_v49 = vadd.s32 16, %v673_v17  ;;  %vm645_vm3 = vcmp.eq.s32.totalorder %v644_v42, %v632_v24  ;;  %v2826_v52 = vld [vmem:[%s666_s29 + $0x10] sm:$0xff]  ;;  %v694_v53 = vadd.s32 24, %v673_v17  ;;  %v2827_v56 = vld [vmem:[%s666_s29 + $0x18] sm:$0xff]  ;;  %v712_v59 = vld [vmem:[%s704_s11] sm:$0xff]  ;;  %s3478_s23 = smov %s3346_s23  ;;  %s3481_s24 = smov %s3353_s24 }
 0x147   : >>> { %vm651_vm4 = vcmp.eq.s32.totalorder %v650_v43, %v632_v24  ;;  %vm657_vm5 = vcmp.eq.s32.totalorder %v656_v44, %v632_v24  ;;  %v646_v54 = vsel %vm645_vm3, %v2822_v41, %v640_v45  ;;  %v678_v55 = vsel %vm677_vm2, %v674_v50, 0.0  ;;  %v2828_v0 = vld [vmem:[%s704_s11 + $0x8] sm:$0xff]  ;;  %v2829_v4 = vld [vmem:[%s704_s11 + $0x10] sm:$0xff]  ;;  %v2830_v8 = vld [vmem:[%s704_s11 + $0x18] sm:$0xff]  ;;  %s667_s16 = smov [#allocation17]  ;;  %s705_s17 = smov [#allocation18] }
 0x148   : >>> { %vm683_vm6 = vcmp.eq.s32.totalorder %v682_v48, %v670_v24  ;;  %vm689_vm7 = vcmp.eq.s32.totalorder %v688_v49, %v670_v24  ;;  %v652_v57 = vsel %vm651_vm4, %v2823_v46, %v646_v54  ;;  %vm695_vm9 = vcmp.eq.s32.totalorder %v694_v53, %v670_v24  ;;  %s746_s20 = smov [#allocation17]  ;;  %s744_s22 = smov [#allocation16] }
 0x149   : >>> { %v684_v58 = vsel %vm683_vm6, %v2825_v51, %v678_v55  ;;  %v708_v24 = vmov %v3320_v24  ;;  %v658_v60 = vsel %vm657_vm5, %v2824_v47, %v652_v57  ;;  %v711_v17 = vmov %v3316_v17  ;;  %s748_s29 = smov [#allocation18]  ;;  %s783_s11 = smov [#allocation19] }
 0x14a   : >>> { %v690_v61 = vsel %vm689_vm7, %v2826_v52, %v684_v58  ;;  %v659_v62 = vrot.slane %v658_v60, 4  ;;  %vm715_vm10 = vcmp.eq.s32.totalorder %v711_v17, %v708_v24  ;;  %v720_v1 = vadd.s32 8, %v711_v17  ;;  %s851_s27 = smov [#allocation23]  ;;  %s3913_s21 = smov [#allocation14] }
 0x14b   : >>> { %v696_v63 = vsel %vm695_vm9, %v2827_v56, %v690_v61  ;;  %v716_v3 = vsel %vm715_vm10, %v712_v59, 0.0  ;;  %v726_v5 = vadd.s32 16, %v711_v17  ;;  %v732_v6 = vadd.s32 24, %v711_v17  ;;  %s3924_s0 = smov [#allocation13]  ;;  %s4302_s1 = smov 127  }
 0x14c   : >>> { %v697_v2 = vrot.slane %v696_v63, 4  ;;  %v660_v7 = vadd.f32 %v659_v62, %v658_v60  ;;  %vm721_vm11 = vcmp.eq.s32.totalorder %v720_v1, %v708_v24  ;;  %v813_v17 = vmov %v3316_v17  ;;  %s3931_s2 = smov [#allocation12]  ;;  %s3934_s3 = smov [#allocation14] }
 0x14d   : >>> { %v722_v10 = vsel %vm721_vm11, %v2828_v0, %v716_v3  ;;  %vm727_vm12 = vcmp.eq.s32.totalorder %v726_v5, %v708_v24  ;;  %vm733_vm13 = vcmp.eq.s32.totalorder %v732_v6, %v708_v24  ;;  %v829_v17 = vmov %v3316_v17  ;;  %s3944_s18 = smov [#allocation15]  ;;  %s3948_s10 = smov [#allocation13] }
 0x14e   : >>> { %v698_v9 = vadd.f32 %v697_v2, %v696_v63  ;;  %v661_v11 = vrot.slane %v660_v7, 2  ;;  %v728_v12 = vsel %vm727_vm12, %v2829_v4, %v722_v10  ;;  %v876_v17 = vmov %v3316_v17  ;;  %s3954_s13 = smov [#allocation15]  ;;  %s3960_s9 = smov [#allocation14] }
 0x14f   : >>> { %v734_v14 = vsel %vm733_vm13, %v2830_v8, %v728_v12  ;;  %v814_v60 = vadd.s32 8, %v813_v17  ;;  %v810_v24 = vmov %v3320_v24  ;;  %v798_v17 = vmov %v3316_v17  ;;  %s3963_s8 = smov [#allocation15]  ;;  %s627_s26 = sadd.s32 1, %s3198_s26  }
 0x150   : >>> { %v699_v13 = vrot.slane %v698_v9, 2  ;;  %v662_v15 = vadd.f32 %v661_v11, %v660_v7  ;;  %v735_v16 = vrot.slane %v734_v14, 4  ;;  %v795_v24 = vmov %v3320_v24  ;;  %p624_p9 = scmp.ge.s32.totalorder %s627_s26, 63  }
 0x151   : >>> { %v830_v61 = vadd.s32 16, %v829_v17  ;;  %v826_v24 = vmov %v3320_v24  ;;  %v877_v62 = vadd.s32 8, %v876_v17  ;;  %v892_v17 = vmov %v3316_v17 }
 0x152   : >>> { %v700_v18 = vadd.f32 %v699_v13, %v698_v9  ;;  %v663_v19 = vrot.slane %v662_v15, 1  ;;  %v736_v20 = vadd.f32 %v735_v16, %v734_v14  ;;  %v873_v24 = vmov %v3320_v24 }
 0x153   : >>> { %vm815_vm2 = vcmp.eq.s32.totalorder %v814_v60, %v810_v24  ;;  %vm800_vm3 = vcmp.eq.s32.totalorder %v798_v17, %v795_v24  ;;  %vm831_vm4 = vcmp.eq.s32.totalorder %v830_v61, %v826_v24  ;;  %v889_v24 = vmov %v3320_v24 }
 0x154   : >>> { %v701_v21 = vrot.slane %v700_v18, 1  ;;  %v664_v22 = vadd.f32 %v663_v19, %v662_v15  ;;  %v737_v23 = vrot.slane %v736_v20, 2  ;;  %vm878_vm5 = vcmp.eq.s32.totalorder %v877_v62, %v873_v24 }
 0x155   : >>> { %v893_v1 = vadd.s32 16, %v892_v17  ;;  %v858_v24 = vmov %v3320_v24  ;;  %v861_v17 = vmov %v3316_v17  ;;  %vm1581_vm11 = vcmp.eq.s32.totalorder %v3316_v17, 0 }
 0x156   : >>> { %v702_v25 = vadd.f32 %v701_v21, %v700_v18  ;;  %665 = vst [vmem:[%s629_s30] sm:$0x1] %v664_v22  ;;  %v738_v26 = vadd.f32 %v737_v23, %v736_v20  ;;  %s785_s30 = smov [#allocation20]  ;;  %v908_v17 = vmov %v3316_v17  ;;  %vm863_vm7 = vcmp.eq.s32.totalorder %v861_v17, %v858_v24 }
 0x157   : >>> { %v845_v17 = vmov %v3316_v17  ;;  %vm894_vm6 = vcmp.eq.s32.totalorder %v893_v1, %v889_v24  ;;  %v909_v10 = vadd.s32 24, %v908_v17  ;;  %v905_v24 = vmov %v3320_v24 }
 0x158   : >>> { %703 = vst [vmem:[%s667_s16] sm:$0x1] %v702_v25  ;;  %v739_v27 = vrot.slane %v738_v26, 1  ;;  %s742_s16 = smov [#allocation21]  ;;  %v846_v11 = vadd.s32 24, %v845_v17  ;;  %v842_v24 = vmov %v3320_v24  ;;  %vm4282_vm12 = vcmp.eq.s32.totalorder %v3316_v17, 7 }
 0x159   : >>> { %s787_s16 = smov %s742_s16  ;;  %vm910_vm9 = vcmp.eq.s32.totalorder %v909_v10, %v905_v24  ;;  %v3762_v17 = vmov %v3316_v17 }
 0x15a   : >>> { %v740_v28 = vadd.f32 %v739_v27, %v738_v26  ;;  %vm847_vm10 = vcmp.eq.s32.totalorder %v846_v11, %v842_v24  ;;  %v1166_v17 = vmov %v3316_v17  ;;  %v1201_v24 = vmov %v3320_v24 }
 0x15b   : >>> { %vm1208_vm13 = vcmp.eq.s32.totalorder %v3762_v17, %v1201_v24  ;;  %v1163_v24 = vmov %v3320_v24 }
 0x15c   : >>> { %741 = vst [vmem:[%s705_s17] sm:$0x1] %v740_v28  ;;  %s743_s17 = smov [#allocation22]  ;;  %v3786_v24 = vmov %v3320_v24 }
 0x15d   : >>> { %v745_v31 = vld [vmem:[%s744_s22] sm:$0xff]  ;;  %s789_s17 = smov %s743_s17  ;;  %s791_s22 = smov [#allocation21] }
 0x15e   : >>> { %v768_v44 = vand.u32 2147483647, %v745_v31 }
 0x15f   : >>> { %v747_v29 = vld [vmem:[%s746_s20] sm:$0xff]  ;;  %s806_s20 = smov [#allocation21] }
 0x160   : >>> { %v751_v30 = vmul.f32 2.0, %v747_v29  ;;  %v769_v49 = vand.u32 2147483647, %v747_v29 }
 0x162   : >>> { %3152 = vrcp.f32 %v751_v30 }
 0x163   : >>> { %v749_v32 = vld [vmem:[%s748_s29] sm:$0xff]  ;;  %s822_s29 = smov [#allocation21] }
 0x164   : >>> { %v750_v33 = vsub.f32 %v749_v32, %v745_v31  ;;  %v770_v45 = vand.u32 2147483647, %v749_v32 }
 0x166   : >>> { %v771_v48 = vmin.f32 %v768_v44, %v770_v45 }
 0x168   : >>> { %v772_v50 = vmul.f32 1.1920929e-08, %v771_v48 }
 0x16a   : >>> { %vm773_vm1 = vcmp.le.f32.partialorder %v769_v49, %v772_v50 }
 0x16c   : >>> { %v3153_v34 = vpop.eup %3152 }
 0x16d   : >>> { %v753_v35 = vmul.f32 %v3153_v34, %v750_v33  ;;  %v1750_v33 = vld [vmem:[%s3472_s15] sm:$0xff] }
 0x16f   : >>> { %v755_v36 = vmul.f32 %v753_v35, %v753_v35  ;;  %vm754_vm0 = vcmp.ge.f32.partialorder %v753_v35, 0.0 }
 0x171   : >>> { %v756_v37 = vadd.f32 1.0, %v755_v36  ;;  %v1752_v36 = vld [vmem:[%s3481_s24] sm:$0xff] }
 0x173   : >>> { %3154 = vrsqrt.f32 %v756_v37  ;;  %vm759_vm14 = vcmp.eq.f32.partialorder %v756_v37, inf  ;;  %v762_v39 = vand.u32 2147483648, %v756_v37  ;;  %vm761_vm15 = vcmp.eq.f32.partialorder %v756_v37, 0.0 }
 0x17d   : >>> { %v3155_v38 = vpop.eup %3154 }
 0x17e   : >>> { %v758_v40 = vmul.f32 %v3155_v38, %v756_v37 }
 0x180   : >>> { %v760_v41 = vsel %vm759_vm14, %v756_v37, %v758_v40 }
 0x181   : >>> { %v763_v42 = vsel %vm761_vm15, %v762_v39, %v760_v41 }
 0x182   : >>> { %v764_v43 = vxor.u32 2147483648, %v763_v42 }
 0x184   : >>> { %v765_v46 = vsel %vm754_vm0, %v763_v42, %v764_v43 }
 0x185   : >>> { %v766_v47 = vadd.f32 %v765_v46, %v753_v35  ;;  %v1751_v35 = vld [vmem:[%s3478_s23] sm:$0xff] }
 0x187   : >>> { %3156 = vrcp.f32 %v766_v47 }
 0x191   : >>> { %v3157_v51 = vpop.eup %3156 }
 0x192   : >>> { %v774_v52 = vsel %vm773_vm1, 0.0, %v3157_v51  ;;  %vm1171_vm1 = vcmp.eq.s32.totalorder %v1166_v17, %v1163_v24 }
 0x193   : >>> { %v775_v53 = vmul.f32 %v774_v52, %v774_v52  ;;  %v779_v54 = vmul.f32 %v774_v52, %v747_v29 }
 0x195   : >>> { %v776_v55 = vadd.f32 1.0, %v775_v53  ;;  %v780_v56 = vsub.f32 %v745_v31, %v779_v54  ;;  %v782_v57 = vadd.f32 %v779_v54, %v749_v32  ;;  %v1749_v32 = vld [vmem:[%s3469_s14] sm:$0xff] }
 0x197   : >>> { %3158 = vrsqrt.f32 %v776_v55  ;;  %784 = vst [vmem:[%s783_s11] sm:$0xff] %v780_v56  ;;  %786 = vst [vmem:[%s785_s30] sm:$0xff] %v782_v57  ;;  %s869_s11 = smov [#allocation22]  ;;  %s885_s30 = smov [#allocation22] }
 0x1a1   : >>> { %v3159_v58 = vpop.eup %3158 }
 0x1a2   : >>> { %788 = vst [vmem:[%s787_s16] sm:$0xff] %v3159_v58  ;;  %v778_v59 = vmul.f32 %v3159_v58, %v774_v52  ;;  %s854_s16 = smov [#allocation22] }
 0x1a4   : >>> { %790 = vst [vmem:[%s789_s17] sm:$0xff] %v778_v59  ;;  %s901_s17 = smov [#allocation22] }
 0x1a9   : >>> { %v807_v63 = vld [vmem:[%s806_s20] ss:$0 sm:$0xff]  ;;  %s838_s20 = smov [#allocation21] }
 0x1aa   : >>> { %v792_v0 = vld [vmem:[%s791_s22] ss:$0 sm:$0xff]  ;;  %v816_v2 = vsel %vm815_vm2, %v807_v63, 0.0  ;;  %s804_s22 = smov [#allocation23] }
 0x1ab   : >>> { %v801_v3 = vsel %vm800_vm3, %v792_v0, 0.0  ;;  %v823_v4 = vld [vmem:[%s822_s29] ss:$0 sm:$0xff]  ;;  %817 = vadd.xlane.f32.xlu1 %v816_v2  ;;  %s819_s29 = smov [#allocation23] }
 0x1ac   : >>> { %802 = vadd.xlane.f32.xlu0 %v801_v3  ;;  %v870_v5 = vld [vmem:[%s869_s11] ss:$0 sm:$0xff]  ;;  %v832_v6 = vsel %vm831_vm4, %v823_v4, 0.0  ;;  %s835_s11 = smov [#allocation23] }
 0x1ad   : >>> { %v879_v7 = vsel %vm878_vm5, %v870_v5, 0.0  ;;  %v886_v8 = vld [vmem:[%s885_s30] ss:$0 sm:$0xff]  ;;  %s867_s30 = smov [#allocation24] }
 0x1ae   : >>> { %v855_v9 = vld [vmem:[%s854_s16] ss:$0 sm:$0xff]  ;;  %v895_v12 = vsel %vm894_vm6, %v886_v8, 0.0  ;;  %s882_s16 = smov [#allocation24] }
 0x1af   : >>> { %880 = vadd.xlane.f32.xlu1 %v879_v7  ;;  %v864_v13 = vsel %vm863_vm7, %v855_v9, 0.0  ;;  %v902_v14 = vld [vmem:[%s901_s17] ss:$0 sm:$0xff]  ;;  %s898_s17 = smov [#allocation24] }
 0x1b0   : >>> { %833 = vadd.xlane.f32.xlu0 %v832_v6  ;;  %v839_v15 = vld [vmem:[%s838_s20] ss:$0 sm:$0xff]  ;;  %v911_v16 = vsel %vm910_vm9, %v902_v14, 0.0  ;;  %s914_s20 = smov [#allocation24] }
 0x1b1   : >>> { %v848_v18 = vsel %vm847_vm10, %v839_v15, 0.0 }
 0x1b3   : >>> { %896 = vadd.xlane.f32.xlu1 %v895_v12 }
 0x1b4   : >>> { %865 = vadd.xlane.f32.xlu0 %v864_v13 }
 0x1b7   : >>> { %912 = vadd.xlane.f32.xlu1 %v911_v16 }
 0x1b8   : >>> { %849 = vadd.xlane.f32.xlu0 %v848_v18 }
 0x238   : >>> { %v818_v19 = vpop.xlane.xlu1 %817 }
 0x239   : >>> { %v803_v20 = vpop.xlane.xlu0 %802 }
 0x23a   : >>> { %805 = vst [vmem:[%s804_s22] sm:$0xff] %v803_v20  ;;  %s3459_s22 = smov [#allocation12] }
 0x23b   : >>> { %2831 = vst [vmem:[%s819_s29 + $0x8] sm:$0xff] %v818_v19  ;;  %s3461_s29 = smov [#allocation13]  ;;  %v925_v28 = vld [vmem:[%s3459_s22] sm:$0xff] }
 0x23c   : >>> { %v881_v22 = vpop.xlane.xlu1 %880  ;;  %v926_v29 = vld [vmem:[%s3461_s29] sm:$0xff] }
 0x23d   : >>> { %v834_v21 = vpop.xlane.xlu0 %833 }
 0x23e   : >>> { %2832 = vst [vmem:[%s835_s11 + $0x10] sm:$0xff] %v834_v21  ;;  %s3463_s11 = smov [#allocation14] }
 0x23f   : >>> { %v927_v30 = vld [vmem:[%s3463_s11] sm:$0xff] }
 0x240   : >>> { %v897_v23 = vpop.xlane.xlu1 %896 }
 0x241   : >>> { %v866_v25 = vpop.xlane.xlu0 %865 }
 0x242   : >>> { %868 = vst [vmem:[%s867_s30] sm:$0xff] %v866_v25  ;;  %s3465_s30 = smov [#allocation15] }
 0x243   : >>> { %2834 = vst [vmem:[%s882_s16 + $0x8] sm:$0xff] %v881_v22  ;;  %s919_s16 = smov [#allocation24]  ;;  %v928_v31 = vld [vmem:[%s3465_s30] sm:$0xff] }
 0x244   : >>> { %2835 = vst [vmem:[%s898_s17 + $0x10] sm:$0xff] %v897_v23  ;;  %v913_v26 = vpop.xlane.xlu1 %912  ;;  %s1743_s17 = smov [#allocation24] }
 0x245   : >>> { %v850_v27 = vpop.xlane.xlu0 %849  ;;  %2836 = vst [vmem:[%s914_s20 + $0x18] sm:$0xff] %v913_v26  ;;  %s1741_s20 = smov [#allocation23] }
 0x246   : >>> { %2833 = vst [vmem:[%s851_s27 + $0x18] sm:$0xff] %v850_v27  ;;  %s917_s27 = smov [#allocation23] }
 0x24c   : >>> { %v920_v34 = vld [vmem:[%s919_s16] sm:$0xff]  ;;  %s948_s16 = smov [#allocation24] }
 0x24d   : >>> { %v930_v37 = vmul.f32 %v927_v30, %v920_v34  ;;  %v933_v38 = vmul.f32 %v928_v31, %v920_v34  ;;  %v935_v39 = vmul.f32 %v925_v28, %v920_v34  ;;  %v938_v40 = vmul.f32 %v926_v29, %v920_v34  ;;  %v1744_v41 = vld [vmem:[%s1743_s17] sm:$0xff]  ;;  %s945_s17 = smov [#allocation23]  ;;  %v2838_v0 = vld [vmem:[%s948_s16 + $0x8] sm:$0xff]  ;;  %s982_s16 = smov [#allocation24] }
 0x24e   : >>> { %v918_v42 = vld [vmem:[%s917_s27] sm:$0xff]  ;;  %v1754_v47 = vmul.f32 %v1751_v35, %v1744_v41  ;;  %v1757_v48 = vmul.f32 %v1752_v36, %v1744_v41  ;;  %v1759_v49 = vmul.f32 %v1749_v32, %v1744_v41  ;;  %v1762_v50 = vmul.f32 %v1750_v33, %v1744_v41  ;;  %s3491_s27 = smov [#allocation12]  ;;  %v2837_v1 = vld [vmem:[%s945_s17 + $0x8] sm:$0xff]  ;;  %s979_s17 = smov [#allocation23] }
 0x24f   : >>> { %v929_v43 = vmul.f32 %v925_v28, %v918_v42  ;;  %v932_v44 = vmul.f32 %v926_v29, %v918_v42  ;;  %v936_v45 = vmul.f32 %v927_v30, %v918_v42  ;;  %v939_v46 = vmul.f32 %v928_v31, %v918_v42  ;;  %v1742_v51 = vld [vmem:[%s1741_s20] sm:$0xff]  ;;  %s1772_s20 = smov [#allocation24] }
 0x250   : >>> { %v1753_v56 = vmul.f32 %v1749_v32, %v1742_v51  ;;  %v1756_v57 = vmul.f32 %v1750_v33, %v1742_v51  ;;  %v1760_v58 = vmul.f32 %v1751_v35, %v1742_v51  ;;  %v1763_v59 = vmul.f32 %v1752_v36, %v1742_v51  ;;  %v2996_v20 = vld [vmem:[%s1772_s20 + $0x8] sm:$0xff]  ;;  %s1803_s20 = smov [#allocation23] }
 0x251   : >>> { %v931_v52 = vsub.f32 %v929_v43, %v930_v37  ;;  %v934_v53 = vsub.f32 %v932_v44, %v933_v38  ;;  %v937_v54 = vadd.f32 %v936_v45, %v935_v39  ;;  %v940_v55 = vadd.f32 %v939_v46, %v938_v40  ;;  %v2848_v38 = vld [vmem:[%s982_s16 + $0x10] sm:$0xff]  ;;  %s1016_s16 = smov [#allocation24] }
 0x252   : >>> { %v1755_v60 = vsub.f32 %v1753_v56, %v1754_v47  ;;  %v1758_v61 = vsub.f32 %v1756_v57, %v1757_v48  ;;  %v1761_v62 = vadd.f32 %v1760_v58, %v1759_v49  ;;  %v1764_v63 = vadd.f32 %v1763_v59, %v1762_v50  ;;  %v2847_v39 = vld [vmem:[%s979_s17 + $0x10] sm:$0xff]  ;;  %s1013_s17 = smov [#allocation23] }
 0x253   : >>> { %941 = vst [vmem:[%s3459_s22] sm:$0xff] %v931_v52  ;;  %942 = vst [vmem:[%s3461_s29] sm:$0xff] %v934_v53  ;;  %s3497_s22 = smov [#allocation13]  ;;  %s3499_s29 = smov [#allocation14]  ;;  %v3005_v56 = vld [vmem:[%s1803_s20 + $0x10] sm:$0xff] }
 0x254   : >>> { %943 = vst [vmem:[%s3463_s11] sm:$0xff] %v937_v54  ;;  %944 = vst [vmem:[%s3465_s30] sm:$0xff] %v940_v55  ;;  %s3501_s11 = smov [#allocation15]  ;;  %s1769_s30 = smov [#allocation23] }
 0x255   : >>> { %1765 = vst [vmem:[%s3469_s14] sm:$0xff] %v1755_v60  ;;  %1766 = vst [vmem:[%s3472_s15] sm:$0xff] %v1758_v61  ;;  %s3504_s14 = smov %s3330_s14  ;;  %s3507_s15 = smov %s3337_s15  ;;  %v2995_v14 = vld [vmem:[%s1769_s30 + $0x8] sm:$0xff] }
 0x256   : >>> { %1767 = vst [vmem:[%s3478_s23] sm:$0xff] %v1761_v62  ;;  %1768 = vst [vmem:[%s3481_s24] sm:$0xff] %v1764_v63  ;;  %s3510_s23 = smov %s3346_s23  ;;  %s3516_s24 = smov %s3353_s24 }
 0x257   : >>> { %s3529_s30 = smov [#allocation13]  ;;  %s1837_s20 = smov [#allocation23] }
 0x25a   : >>> { %v2839_v2 = vld [vmem:[%s3491_s27 + $0x8] sm:$0xff] }
 0x25b   : >>> { %v2840_v3 = vld [vmem:[%s3497_s22 + $0x8] sm:$0xff]  ;;  %v963_v6 = vmul.f32 %v2839_v2, %v2837_v1  ;;  %v969_v9 = vmul.f32 %v2839_v2, %v2838_v0 }
 0x25c   : >>> { %v2841_v4 = vld [vmem:[%s3499_s29 + $0x8] sm:$0xff]  ;;  %v966_v8 = vmul.f32 %v2840_v3, %v2837_v1  ;;  %v972_v12 = vmul.f32 %v2840_v3, %v2838_v0 }
 0x25d   : >>> { %v2842_v5 = vld [vmem:[%s3501_s11 + $0x8] sm:$0xff]  ;;  %v964_v7 = vmul.f32 %v2841_v4, %v2838_v0  ;;  %v970_v11 = vmul.f32 %v2841_v4, %v2837_v1 }
 0x25e   : >>> { %v967_v10 = vmul.f32 %v2842_v5, %v2838_v0  ;;  %v973_v13 = vmul.f32 %v2842_v5, %v2837_v1  ;;  %v2997_v16 = vld [vmem:[%s3504_s14 + $0x8] sm:$0xff] }
 0x25f   : >>> { %v965_v15 = vsub.f32 %v963_v6, %v964_v7  ;;  %v2998_v18 = vld [vmem:[%s3507_s15 + $0x8] sm:$0xff]  ;;  %v971_v22 = vadd.f32 %v970_v11, %v969_v9  ;;  %v1787_v26 = vmul.f32 %v2997_v16, %v2995_v14  ;;  %v1793_v30 = vmul.f32 %v2997_v16, %v2996_v20  ;;  %v2857_v11 = vld [vmem:[%s1013_s17 + $0x18] sm:$0xff]  ;;  %s1049_s17 = smov [#allocation22] }
 0x260   : >>> { %v2999_v19 = vld [vmem:[%s3510_s23 + $0x8] sm:$0xff]  ;;  %v968_v21 = vsub.f32 %v966_v8, %v967_v10  ;;  %v974_v23 = vadd.f32 %v973_v13, %v972_v12  ;;  %v1790_v28 = vmul.f32 %v2998_v18, %v2995_v14  ;;  %v1796_v32 = vmul.f32 %v2998_v18, %v2996_v20  ;;  %v2858_v10 = vld [vmem:[%s1016_s16 + $0x18] sm:$0xff]  ;;  %s1047_s16 = smov [#allocation21] }
 0x261   : >>> { %v3000_v25 = vld [vmem:[%s3516_s24 + $0x8] sm:$0xff]  ;;  %2843 = vst [vmem:[%s3491_s27 + $0x8] sm:$0xff] %v965_v15  ;;  %v1788_v27 = vmul.f32 %v2999_v19, %v2996_v20  ;;  %2845 = vst [vmem:[%s3499_s29 + $0x8] sm:$0xff] %v971_v22  ;;  %v1794_v31 = vmul.f32 %v2999_v19, %v2995_v14  ;;  %s3527_s27 = smov [#allocation12]  ;;  %s3535_s29 = smov [#allocation15] }
 0x262   : >>> { %v1791_v29 = vmul.f32 %v3000_v25, %v2996_v20  ;;  %2844 = vst [vmem:[%s3497_s22 + $0x8] sm:$0xff] %v968_v21  ;;  %2846 = vst [vmem:[%s3501_s11 + $0x8] sm:$0xff] %v974_v23  ;;  %v1797_v33 = vmul.f32 %v3000_v25, %v2995_v14  ;;  %s3533_s22 = smov [#allocation14]  ;;  %s1806_s11 = smov [#allocation24] }
 0x263   : >>> { %v1789_v34 = vsub.f32 %v1787_v26, %v1788_v27  ;;  %v1795_v36 = vadd.f32 %v1794_v31, %v1793_v30  ;;  %v3006_v50 = vld [vmem:[%s1806_s11 + $0x10] sm:$0xff]  ;;  %s3563_s11 = smov [#allocation12] }
 0x264   : >>> { %v1792_v35 = vsub.f32 %v1790_v28, %v1791_v29  ;;  %v1798_v37 = vadd.f32 %v1797_v33, %v1796_v32  ;;  %v3015_v29 = vld [vmem:[%s1837_s20 + $0x18] sm:$0xff]  ;;  %s3631_s20 = smov [#allocation13] }
 0x265   : >>> { %3001 = vst [vmem:[%s3504_s14 + $0x8] sm:$0xff] %v1789_v34  ;;  %3003 = vst [vmem:[%s3510_s23 + $0x8] sm:$0xff] %v1795_v36  ;;  %s3541_s14 = smov %s3330_s14  ;;  %s3550_s23 = smov %s3346_s23 }
 0x266   : >>> { %3002 = vst [vmem:[%s3507_s15 + $0x8] sm:$0xff] %v1792_v35  ;;  %3004 = vst [vmem:[%s3516_s24 + $0x8] sm:$0xff] %v1798_v37  ;;  %s3544_s15 = smov %s3337_s15  ;;  %s3553_s24 = smov %s3353_s24 }
 0x268   : >>> { %v2849_v40 = vld [vmem:[%s3527_s27 + $0x10] sm:$0xff] }
 0x269   : >>> { %v2850_v41 = vld [vmem:[%s3529_s30 + $0x10] sm:$0xff]  ;;  %v997_v44 = vmul.f32 %v2849_v40, %v2847_v39  ;;  %v1003_v45 = vmul.f32 %v2849_v40, %v2848_v38 }
 0x26a   : >>> { %v2851_v42 = vld [vmem:[%s3533_s22 + $0x10] sm:$0xff]  ;;  %v1000_v47 = vmul.f32 %v2850_v41, %v2847_v39  ;;  %v1006_v51 = vmul.f32 %v2850_v41, %v2848_v38 }
 0x26b   : >>> { %v2852_v43 = vld [vmem:[%s3535_s29 + $0x10] sm:$0xff]  ;;  %v998_v46 = vmul.f32 %v2851_v42, %v2848_v38  ;;  %v1004_v49 = vmul.f32 %v2851_v42, %v2847_v39 }
 0x26c   : >>> { %v1001_v48 = vmul.f32 %v2852_v43, %v2848_v38  ;;  %v1007_v52 = vmul.f32 %v2852_v43, %v2847_v39  ;;  %v3007_v57 = vld [vmem:[%s3541_s14 + $0x10] sm:$0xff] }
 0x26d   : >>> { %v999_v53 = vsub.f32 %v997_v44, %v998_v46  ;;  %v1005_v55 = vadd.f32 %v1004_v49, %v1003_v45  ;;  %v3008_v58 = vld [vmem:[%s3544_s15 + $0x10] sm:$0xff]  ;;  %v1821_v62 = vmul.f32 %v3007_v57, %v3005_v56  ;;  %v1827_v0 = vmul.f32 %v3007_v57, %v3006_v50  ;;  %v3606_v49 = vld [vmem:[%s1049_s17] ss:$0 sm:$0xff]  ;;  %s3638_s17 = smov [#allocation15] }
 0x26e   : >>> { %v1002_v54 = vsub.f32 %v1000_v47, %v1001_v48  ;;  %v1008_v59 = vadd.f32 %v1007_v52, %v1006_v51  ;;  %v3009_v60 = vld [vmem:[%s3550_s23 + $0x10] sm:$0xff]  ;;  %v1824_v63 = vmul.f32 %v3008_v58, %v3005_v56  ;;  %v1830_v4 = vmul.f32 %v3008_v58, %v3006_v50  ;;  %v3604_v48 = vld [vmem:[%s1047_s16] ss:$0 sm:$0xff]  ;;  %s3636_s16 = smov [#allocation14] }
 0x26f   : >>> { %v3010_v61 = vld [vmem:[%s3553_s24 + $0x10] sm:$0xff]  ;;  %2853 = vst [vmem:[%s3527_s27 + $0x10] sm:$0xff] %v999_v53  ;;  %2855 = vst [vmem:[%s3533_s22 + $0x10] sm:$0xff] %v1005_v55  ;;  %v1822_v1 = vmul.f32 %v3009_v60, %v3006_v50  ;;  %v1828_v3 = vmul.f32 %v3009_v60, %v3005_v56  ;;  %s3565_s27 = smov [#allocation14]  ;;  %s3572_s22 = smov [#allocation15] }
 0x270   : >>> { %v1825_v2 = vmul.f32 %v3010_v61, %v3006_v50  ;;  %2854 = vst [vmem:[%s3529_s30 + $0x10] sm:$0xff] %v1002_v54  ;;  %2856 = vst [vmem:[%s3535_s29 + $0x10] sm:$0xff] %v1008_v59  ;;  %v1831_v5 = vmul.f32 %v3010_v61, %v3005_v56  ;;  %s3570_s30 = smov [#allocation13]  ;;  %s1840_s29 = smov [#allocation24] }
 0x271   : >>> { %v1823_v6 = vsub.f32 %v1821_v62, %v1822_v1  ;;  %v1829_v8 = vadd.f32 %v1828_v3, %v1827_v0  ;;  %v3016_v26 = vld [vmem:[%s1840_s29 + $0x18] sm:$0xff]  ;;  %s3629_s29 = smov [#allocation12] }
 0x272   : >>> { %v1826_v7 = vsub.f32 %v1824_v63, %v1825_v2  ;;  %v1832_v9 = vadd.f32 %v1831_v5, %v1830_v4 }
 0x273   : >>> { %3011 = vst [vmem:[%s3541_s14 + $0x10] sm:$0xff] %v1823_v6  ;;  %3013 = vst [vmem:[%s3550_s23 + $0x10] sm:$0xff] %v1829_v8  ;;  %s3576_s14 = smov %s3330_s14  ;;  %s3585_s23 = smov %s3346_s23 }
 0x274   : >>> { %3012 = vst [vmem:[%s3544_s15 + $0x10] sm:$0xff] %v1826_v7  ;;  %3014 = vst [vmem:[%s3553_s24 + $0x10] sm:$0xff] %v1832_v9  ;;  %s3582_s15 = smov %s3337_s15  ;;  %s3589_s24 = smov %s3353_s24 }
 0x276   : >>> { %v2859_v12 = vld [vmem:[%s3563_s11 + $0x18] sm:$0xff] }
 0x277   : >>> { %v2861_v13 = vld [vmem:[%s3565_s27 + $0x18] sm:$0xff]  ;;  %v1031_v16 = vmul.f32 %v2859_v12, %v2857_v11  ;;  %v1037_v19 = vmul.f32 %v2859_v12, %v2858_v10 }
 0x278   : >>> { %v2860_v14 = vld [vmem:[%s3570_s30 + $0x18] sm:$0xff]  ;;  %v1032_v18 = vmul.f32 %v2861_v13, %v2858_v10  ;;  %v1038_v20 = vmul.f32 %v2861_v13, %v2857_v11 }
 0x279   : >>> { %v2862_v15 = vld [vmem:[%s3572_s22 + $0x18] sm:$0xff]  ;;  %v1034_v23 = vmul.f32 %v2860_v14, %v2857_v11  ;;  %v1040_v25 = vmul.f32 %v2860_v14, %v2858_v10 }
 0x27a   : >>> { %v1035_v21 = vmul.f32 %v2862_v15, %v2858_v10  ;;  %v1041_v22 = vmul.f32 %v2862_v15, %v2857_v11  ;;  %v1033_v27 = vsub.f32 %v1031_v16, %v1032_v18  ;;  %v1039_v28 = vadd.f32 %v1038_v20, %v1037_v19  ;;  %v3017_v30 = vld [vmem:[%s3576_s14 + $0x18] sm:$0xff] }
 0x27b   : >>> { %v3018_v31 = vld [vmem:[%s3582_s15 + $0x18] sm:$0xff]  ;;  %v1855_v36 = vmul.f32 %v3017_v30, %v3015_v29  ;;  %v1861_v39 = vmul.f32 %v3017_v30, %v3016_v26 }
 0x27c   : >>> { %v3019_v32 = vld [vmem:[%s3585_s23 + $0x18] sm:$0xff]  ;;  %v1036_v33 = vsub.f32 %v1034_v23, %v1035_v21  ;;  %v1042_v34 = vadd.f32 %v1041_v22, %v1040_v25  ;;  %2863 = vst [vmem:[%s3563_s11 + $0x18] sm:$0xff] %v1033_v27  ;;  %v1858_v38 = vmul.f32 %v3018_v31, %v3015_v29  ;;  %2865 = vst [vmem:[%s3565_s27 + $0x18] sm:$0xff] %v1039_v28  ;;  %s3600_s11 = smov [#allocation12]  ;;  %s3602_s27 = smov [#allocation14] }
 0x27d   : >>> { %v3020_v35 = vld [vmem:[%s3589_s24 + $0x18] sm:$0xff]  ;;  %v1856_v37 = vmul.f32 %v3019_v32, %v3016_v26  ;;  %v1862_v41 = vmul.f32 %v3019_v32, %v3015_v29  ;;  %v1864_v42 = vmul.f32 %v3018_v31, %v3016_v26 }
 0x27e   : >>> { %v1859_v40 = vmul.f32 %v3020_v35, %v3016_v26  ;;  %v1865_v43 = vmul.f32 %v3020_v35, %v3015_v29  ;;  %2864 = vst [vmem:[%s3570_s30 + $0x18] sm:$0xff] %v1036_v33  ;;  %2866 = vst [vmem:[%s3572_s22 + $0x18] sm:$0xff] %v1042_v34  ;;  %s3611_s30 = smov [#allocation13]  ;;  %s3613_s22 = smov [#allocation15] }
 0x27f   : >>> { %v1857_v44 = vsub.f32 %v1855_v36, %v1856_v37  ;;  %v1863_v46 = vadd.f32 %v1862_v41, %v1861_v39 }
 0x280   : >>> { %v1860_v45 = vsub.f32 %v1858_v38, %v1859_v40  ;;  %v1866_v47 = vadd.f32 %v1865_v43, %v1864_v42 }
 0x281   : >>> { %3021 = vst [vmem:[%s3576_s14 + $0x18] sm:$0xff] %v1857_v44  ;;  %3023 = vst [vmem:[%s3585_s23 + $0x18] sm:$0xff] %v1863_v46  ;;  %s3619_s14 = smov %s3330_s14  ;;  %s3641_s23 = smov %s3346_s23 }
 0x282   : >>> { %3022 = vst [vmem:[%s3582_s15 + $0x18] sm:$0xff] %v1860_v45  ;;  %3024 = vst [vmem:[%s3589_s24 + $0x18] sm:$0xff] %v1866_v47  ;;  %s3652_s15 = smov %s3337_s15  ;;  %s3681_s24 = smov %s3353_s24 }
 0x283   : >>> { %v1055_v50 = vld [vmem:[%s3600_s11] sm:$0xff] }
 0x284   : >>> { %v1057_v51 = vld [vmem:[%s3602_s27] sm:$0xff]  ;;  %v1059_v53 = vmul.f32 %v1055_v50, %v3604_v48  ;;  %v1062_v54 = vmul.f32 %v1055_v50, %v3606_v49 }
 0x285   : >>> { %v1056_v52 = vld [vmem:[%s3611_s30] sm:$0xff]  ;;  %v1065_v56 = vmul.f32 %v1057_v51, %v3604_v48  ;;  %v1068_v57 = vmul.f32 %v1057_v51, %v3606_v49 }
 0x286   : >>> { %v1058_v55 = vld [vmem:[%s3613_s22] sm:$0xff]  ;;  %v1060_v58 = vmul.f32 %v1056_v52, %v3606_v49  ;;  %v1063_v59 = vmul.f32 %v1056_v52, %v3604_v48 }
 0x287   : >>> { %v1066_v60 = vmul.f32 %v1058_v55, %v3606_v49  ;;  %v1069_v61 = vmul.f32 %v1058_v55, %v3604_v48 }
 0x288   : >>> { %v1873_v62 = vld [vmem:[%s3619_s14] ss:$0 sm:$0xff]  ;;  %v3026_v0 = vld [vmem:[%s3619_s14 + $0x7] ss:$0 sm:$0xff]  ;;  %v1061_v1 = vsub.f32 %v1059_v53, %v1060_v58  ;;  %v1064_v2 = vadd.f32 %v1063_v59, %v1062_v54  ;;  %v3027_v6 = vld [vmem:[%s3619_s14 + $0x7] sm:$0xfe] }
 0x289   : >>> { %v3025_v63 = vld [vmem:[%s3619_s14 - $0x1] sm:$0xfe]  ;;  %v1067_v3 = vsub.f32 %v1065_v56, %v1066_v60  ;;  %v1070_v4 = vadd.f32 %v1069_v61, %v1068_v57  ;;  %v3028_v7 = vld [vmem:[%s3619_s14 + $0xf] ss:$0 sm:$0xff]  ;;  %v3030_v8 = vld [vmem:[%s3619_s14 + $0xf] sm:$0xfe]  ;;  %v1891_v9 = vsel %vm1581_vm11, %v3026_v0, %v3027_v6 }
 0x28a   : >>> { %v1880_v5 = vsel %vm1581_vm11, %v1873_v62, %v3025_v63  ;;  %v1902_v10 = vsel %vm1581_vm11, %v3028_v7, %v3030_v8  ;;  %v3031_v11 = vld [vmem:[%s3619_s14 + $0x17] ss:$0 sm:$0xff]  ;;  %v3033_v12 = vld [vmem:[%s3619_s14 + $0x17] sm:$0xfe]  ;;  %v3034_v13 = vld [vmem:[%s3619_s14 + $0x1f] ss:$0 sm:$0xff]  ;;  %1071 = vst [vmem:[%s3600_s11] sm:$0xff] %v1061_v1 }
 0x28b   : >>> { %1883 = vst [vmem:[%s3619_s14] sm:$0xff] %v1880_v5  ;;  %1072 = vst [vmem:[%s3611_s30] sm:$0xff] %v1064_v2  ;;  %v1913_v14 = vsel %vm1581_vm11, %v3031_v11, %v3033_v12  ;;  %v1917_v15 = vld [vmem:[%s3641_s23] ss:$0 sm:$0xff]  ;;  %v3037_v16 = vld [vmem:[%s3641_s23 + $0x19] sm:$0x7f]  ;;  %s1103_s11 = smov [#allocation12]  ;;  %s1107_s30 = smov [#allocation14] }
 0x28c   : >>> { %1073 = vst [vmem:[%s3602_s27] sm:$0xff] %v1067_v3  ;;  %1074 = vst [vmem:[%s3613_s22] sm:$0xff] %v1070_v4  ;;  %v3038_v18 = vld [vmem:[%s3641_s23 + $0x18] ss:$0 sm:$0xff]  ;;  %v1926_v19 = vsel %vm4282_vm12, %v3034_v13, %v3037_v16  ;;  %v3040_v20 = vld [vmem:[%s3641_s23 + $0x11] sm:$0x7f]  ;;  %s1105_s27 = smov [#allocation13]  ;;  %s1109_s22 = smov [#allocation15] }
 0x28d   : >>> { %3029 = vst [vmem:[%s3619_s14 + $0x8] sm:$0xff] %v1891_v9  ;;  %3032 = vst [vmem:[%s3619_s14 + $0x10] sm:$0xff] %v1902_v10  ;;  %v3041_v21 = vld [vmem:[%s3641_s23 + $0x10] ss:$0 sm:$0xff]  ;;  %v3043_v22 = vld [vmem:[%s3641_s23 + $0x9] sm:$0x7f]  ;;  %v1935_v23 = vsel %vm4282_vm12, %v3038_v18, %v3040_v20 }
 0x28e   : >>> { %3035 = vst [vmem:[%s3619_s14 + $0x18] sm:$0xff] %v1913_v14  ;;  %3036 = vst [vmem:[%s3619_s14 + $0x1] sm:$0x1] %v1917_v15  ;;  %v1944_v25 = vsel %vm4282_vm12, %v3041_v21, %v3043_v22  ;;  %v3044_v26 = vld [vmem:[%s3641_s23 + $0x8] ss:$0 sm:$0xff] }
 0x28f   : >>> { %3039 = vst [vmem:[%s3641_s23 + $0x18] sm:$0xff] %v1926_v19  ;;  %v3046_v27 = vld [vmem:[%s3641_s23 + $0x1] sm:$0x7f]  ;;  %v1957_v28 = vld [vmem:[%s3652_s15] ss:$0 sm:$0xff]  ;;  %3042 = vst [vmem:[%s3641_s23 + $0x10] sm:$0xff] %v1935_v23 }
 0x290   : >>> { %3045 = vst [vmem:[%s3641_s23 + $0x8] sm:$0xff] %v1944_v25  ;;  %v1952_v29 = vsel %vm4282_vm12, %v3044_v26, %v3046_v27  ;;  %v3047_v30 = vld [vmem:[%s3652_s15 - $0x1] sm:$0xfe]  ;;  %v3048_v31 = vld [vmem:[%s3652_s15 + $0x7] ss:$0 sm:$0xff] }
 0x291   : >>> { %v3049_v32 = vld [vmem:[%s3652_s15 + $0x7] sm:$0xfe]  ;;  %1954 = vst [vmem:[%s3641_s23] sm:$0xff] %v1952_v29  ;;  %v1964_v33 = vsel %vm1581_vm11, %v1957_v28, %v3047_v30  ;;  %v3050_v35 = vld [vmem:[%s3652_s15 + $0xf] ss:$0 sm:$0xff]  ;;  %v3052_v36 = vld [vmem:[%s3652_s15 + $0xf] sm:$0xfe] }
 0x292   : >>> { %v1975_v34 = vsel %vm1581_vm11, %v3048_v31, %v3049_v32  ;;  %v3053_v37 = vld [vmem:[%s3652_s15 + $0x17] ss:$0 sm:$0xff]  ;;  %1967 = vst [vmem:[%s3652_s15] sm:$0xff] %v1964_v33  ;;  %v1986_v38 = vsel %vm1581_vm11, %v3050_v35, %v3052_v36  ;;  %v3055_v39 = vld [vmem:[%s3652_s15 + $0x17] sm:$0xfe]  ;;  %v3056_v40 = vld [vmem:[%s3652_s15 + $0x1f] ss:$0 sm:$0xff] }
 0x293   : >>> { %3051 = vst [vmem:[%s3652_s15 + $0x8] sm:$0xff] %v1975_v34  ;;  %v2001_v41 = vld [vmem:[%s3681_s24] ss:$0 sm:$0xff]  ;;  %3054 = vst [vmem:[%s3652_s15 + $0x10] sm:$0xff] %v1986_v38  ;;  %v1997_v42 = vsel %vm1581_vm11, %v3053_v37, %v3055_v39  ;;  %v3059_v43 = vld [vmem:[%s3681_s24 + $0x19] sm:$0x7f] }
 0x294   : >>> { %3058 = vst [vmem:[%s3652_s15 + $0x1] sm:$0x1] %v2001_v41  ;;  %v3060_v44 = vld [vmem:[%s3681_s24 + $0x18] ss:$0 sm:$0xff]  ;;  %v3062_v45 = vld [vmem:[%s3681_s24 + $0x11] sm:$0x7f]  ;;  %v2010_v46 = vsel %vm4282_vm12, %v3056_v40, %v3059_v43 }
 0x295   : >>> { %3057 = vst [vmem:[%s3652_s15 + $0x18] sm:$0xff] %v1997_v42  ;;  %v2019_v47 = vsel %vm4282_vm12, %v3060_v44, %v3062_v45  ;;  %v3063_v50 = vld [vmem:[%s3681_s24 + $0x10] ss:$0 sm:$0xff]  ;;  %v3065_v51 = vld [vmem:[%s3681_s24 + $0x9] sm:$0x7f]  ;;  %3061 = vst [vmem:[%s3681_s24 + $0x18] sm:$0xff] %v2010_v46 }
 0x296   : >>> { %v3066_v52 = vld [vmem:[%s3681_s24 + $0x8] ss:$0 sm:$0xff]  ;;  %3064 = vst [vmem:[%s3681_s24 + $0x10] sm:$0xff] %v2019_v47  ;;  %v2028_v53 = vsel %vm4282_vm12, %v3063_v50, %v3065_v51  ;;  %v3068_v54 = vld [vmem:[%s3681_s24 + $0x1] sm:$0x7f]  ;;  %v1214_v42 = vadd.s32 8, %v3762_v17 }
 0x297   : >>> { %v2867_v55 = vld [vmem:[%s3629_s29 + $0x8] sm:$0xff]  ;;  %3067 = vst [vmem:[%s3681_s24 + $0x8] sm:$0xff] %v2028_v53  ;;  %v2036_v57 = vsel %vm4282_vm12, %v3066_v52, %v3068_v54  ;;  %v1221_v43 = vadd.s32 16, %v3762_v17  ;;  %v3777_v17 = vmov %v3316_v17  ;;  %v1186_v44 = vadd.s32 16, %v1166_v17 }
 0x298   : >>> { %v2868_v56 = vld [vmem:[%s3631_s20 + $0x8] sm:$0xff]  ;;  %v1087_v58 = vmul.f32 %v2867_v55, %v3604_v48  ;;  %v1090_v60 = vmul.f32 %v2867_v55, %v3606_v49  ;;  %2038 = vst [vmem:[%s3681_s24] sm:$0xff] %v2036_v57  ;;  %v1194_v45 = vadd.s32 24, %v1166_v17  ;;  %v1248_v46 = vadd.s32 8, %v3777_v17 }
 0x299   : >>> { %v1088_v59 = vmul.f32 %v2868_v56, %v3606_v49  ;;  %v2869_v61 = vld [vmem:[%s3636_s16 + $0x8] sm:$0xff]  ;;  %v1091_v63 = vmul.f32 %v2868_v56, %v3604_v48  ;;  %v1255_v47 = vadd.s32 16, %v3777_v17  ;;  %v1262_v50 = vadd.s32 24, %v3777_v17 }
 0x29a   : >>> { %v2870_v62 = vld [vmem:[%s3638_s17 + $0x8] sm:$0xff]  ;;  %v1093_v0 = vmul.f32 %v2869_v61, %v3604_v48  ;;  %v1096_v2 = vmul.f32 %v2869_v61, %v3606_v49  ;;  %vm1215_vm14 = vcmp.eq.s32.totalorder %v1214_v42, %v1201_v24  ;;  %vm1222_vm15 = vcmp.eq.s32.totalorder %v1221_v43, %v1201_v24 }
 0x29b   : >>> { %v1094_v1 = vmul.f32 %v2870_v62, %v3606_v49  ;;  %v1089_v3 = vsub.f32 %v1087_v58, %v1088_v59  ;;  %v1097_v4 = vmul.f32 %v2870_v62, %v3604_v48  ;;  %v1092_v5 = vadd.f32 %v1091_v63, %v1090_v60 }
 0x29c   : >>> { %v3794_v24 = vmov %v3320_v24  ;;  %vm1187_vm3 = vcmp.eq.s32.totalorder %v1186_v44, %v1163_v24  ;;  %vm1195_vm4 = vcmp.eq.s32.totalorder %v1194_v45, %v1163_v24  ;;  %vm1242_vm5 = vcmp.eq.s32.totalorder %v3777_v17, %v3786_v24 }
 0x29d   : >>> { %v1095_v6 = vsub.f32 %v1093_v0, %v1094_v1  ;;  %2871 = vst [vmem:[%s3629_s29 + $0x8] sm:$0xff] %v1089_v3  ;;  %v1098_v7 = vadd.f32 %v1097_v4, %v1096_v2  ;;  %2872 = vst [vmem:[%s3631_s20 + $0x8] sm:$0xff] %v1092_v5  ;;  %s1131_s29 = smov [#allocation12]  ;;  %s1133_s20 = smov [#allocation13]  ;;  %vm1249_vm6 = vcmp.eq.s32.totalorder %v1248_v46, %v3786_v24 }
 0x29e   : >>> { %vm1256_vm7 = vcmp.eq.s32.totalorder %v1255_v47, %v3786_v24  ;;  %vm1263_vm9 = vcmp.eq.s32.totalorder %v1262_v50, %v3786_v24 }
 0x29f   : >>> { %2873 = vst [vmem:[%s3636_s16 + $0x8] sm:$0xff] %v1095_v6  ;;  %2874 = vst [vmem:[%s3638_s17 + $0x8] sm:$0xff] %v1098_v7  ;;  %s1135_s16 = smov [#allocation14]  ;;  %s1137_s17 = smov [#allocation15] }
 0x2a4   : >>> { %v2875_v8 = vld [vmem:[%s1103_s11 + $0x10] sm:$0xff] }
 0x2a5   : >>> { %v2876_v9 = vld [vmem:[%s1105_s27 + $0x10] sm:$0xff]  ;;  %v1115_v10 = vmul.f32 %v2875_v8, %v3604_v48  ;;  %v1118_v11 = vmul.f32 %v2875_v8, %v3606_v49 }
 0x2a6   : >>> { %v2877_v12 = vld [vmem:[%s1107_s30 + $0x10] sm:$0xff]  ;;  %v1116_v13 = vmul.f32 %v2876_v9, %v3606_v49  ;;  %v1119_v14 = vmul.f32 %v2876_v9, %v3604_v48 }
 0x2a7   : >>> { %v2878_v15 = vld [vmem:[%s1109_s22 + $0x10] sm:$0xff]  ;;  %v1121_v16 = vmul.f32 %v2877_v12, %v3604_v48  ;;  %v1124_v18 = vmul.f32 %v2877_v12, %v3606_v49 }
 0x2a8   : >>> { %v1122_v19 = vmul.f32 %v2878_v15, %v3606_v49  ;;  %v1125_v20 = vmul.f32 %v2878_v15, %v3604_v48  ;;  %v1117_v21 = vsub.f32 %v1115_v10, %v1116_v13  ;;  %v1120_v22 = vadd.f32 %v1119_v14, %v1118_v11 }
 0x2aa   : >>> { %v1123_v23 = vsub.f32 %v1121_v16, %v1122_v19  ;;  %v1126_v25 = vadd.f32 %v1125_v20, %v1124_v18  ;;  %2879 = vst [vmem:[%s1103_s11 + $0x10] sm:$0xff] %v1117_v21  ;;  %2880 = vst [vmem:[%s1105_s27 + $0x10] sm:$0xff] %v1120_v22  ;;  %s1160_s11 = smov [#allocation19]  ;;  %s3791_s27 = smov [#allocation13] }
 0x2ab   : >>> { %v1167_v53 = vld [vmem:[%s1160_s11] ss:$0 sm:$0xff]  ;;  %s3201_s11 = smov 1  }
 0x2ac   : >>> { %2881 = vst [vmem:[%s1107_s30 + $0x10] sm:$0xff] %v1123_v23  ;;  %2882 = vst [vmem:[%s1109_s22 + $0x10] sm:$0xff] %v1126_v25  ;;  %s1267_s30 = smov [#allocation20]  ;;  %s3799_s22 = smov [#allocation12] }
 0x2ad   : >>> { %v1274_v58 = vld [vmem:[%s1267_s30] ss:$0 sm:$0xff]  ;;  %s3896_s30 = smov [#allocation14] }
 0x2b1   : >>> { %v2883_v26 = vld [vmem:[%s1131_s29 + $0x18] sm:$0xff] }
 0x2b2   : >>> { %v2884_v27 = vld [vmem:[%s1133_s20 + $0x18] sm:$0xff]  ;;  %v1146_v29 = vmul.f32 %v2883_v26, %v3606_v49  ;;  %v1143_v31 = vmul.f32 %v2883_v26, %v3604_v48 }
 0x2b3   : >>> { %v1144_v28 = vmul.f32 %v2884_v27, %v3606_v49  ;;  %v1147_v30 = vmul.f32 %v2884_v27, %v3604_v48  ;;  %v2885_v32 = vld [vmem:[%s1135_s16 + $0x18] sm:$0xff] }
 0x2b4   : >>> { %v2886_v33 = vld [vmem:[%s1137_s17 + $0x18] sm:$0xff]  ;;  %v1149_v34 = vmul.f32 %v2885_v32, %v3604_v48  ;;  %v1152_v36 = vmul.f32 %v2885_v32, %v3606_v49 }
 0x2b5   : >>> { %v1150_v35 = vmul.f32 %v2886_v33, %v3606_v49  ;;  %v1153_v37 = vmul.f32 %v2886_v33, %v3604_v48  ;;  %v1148_v38 = vadd.f32 %v1147_v30, %v1146_v29  ;;  %v1145_v39 = vsub.f32 %v1143_v31, %v1144_v28 }
 0x2b6   : >>> { %v1228_v49 = vadd.s32 24, %v3762_v17  ;;  %v1178_v48 = vadd.s32 8, %v1166_v17  ;;  %v3781_v17 = vmov %v3316_v17 }
 0x2b7   : >>> { %v1151_v40 = vsub.f32 %v1149_v34, %v1150_v35  ;;  %v1154_v41 = vadd.f32 %v1153_v37, %v1152_v36  ;;  %2888 = vst [vmem:[%s1133_s20 + $0x18] sm:$0xff] %v1148_v38  ;;  %2887 = vst [vmem:[%s1131_s29 + $0x18] sm:$0xff] %v1145_v39  ;;  %v3797_v51 = vadd.s32 8, %v3781_v17  ;;  %v1293_v52 = vadd.s32 16, %v3781_v17  ;;  %s3802_s29 = smov [#allocation14]  ;;  %s3813_s20 = smov [#allocation15] }
 0x2b8   : >>> { %vm1229_vm0 = vcmp.eq.s32.totalorder %v1228_v49, %v1201_v24  ;;  %vm1179_vm2 = vcmp.eq.s32.totalorder %v1178_v48, %v1163_v24  ;;  %v1301_v54 = vadd.s32 24, %v3781_v17  ;;  %vm1278_vm10 = vcmp.eq.s32.totalorder %v3781_v17, %v3794_v24 }
 0x2b9   : >>> { %2889 = vst [vmem:[%s1135_s16 + $0x18] sm:$0xff] %v1151_v40  ;;  %2890 = vst [vmem:[%s1137_s17 + $0x18] sm:$0xff] %v1154_v41  ;;  %vm1286_vm12 = vcmp.eq.s32.totalorder %v3797_v51, %v3794_v24  ;;  %s3877_s16 = smov [#allocation13]  ;;  %s3880_s17 = smov [#allocation12] }
 0x2be   : >>> { %v1205_v55 = vld [vmem:[%s3791_s27] sm:$0xff]  ;;  %v2897_v56 = vld [vmem:[%s3791_s27 + $0x8] sm:$0xff]  ;;  %v2899_v57 = vld [vmem:[%s3791_s27 + $0x10] sm:$0xff] }
 0x2bf   : >>> { %v1209_v59 = vsel %vm1208_vm13, 0.0, %v1205_v55  ;;  %v1216_v60 = vsel %vm1215_vm14, 0.0, %v2897_v56  ;;  %v1223_v61 = vsel %vm1222_vm15, 0.0, %v2899_v57  ;;  %v2901_v62 = vld [vmem:[%s3791_s27 + $0x18] sm:$0xff]  ;;  %v1168_v63 = vld [vmem:[%s3799_s22] sm:$0xff]  ;;  %v2891_v0 = vld [vmem:[%s3799_s22 + $0x8] sm:$0xff]  ;;  %vm1294_vm13 = vcmp.eq.s32.totalorder %v1293_v52, %v3794_v24 }
 0x2c0   : >>> { %1210 = vst [vmem:[%s3791_s27] sm:$0xff] %v1209_v59  ;;  %2898 = vst [vmem:[%s3791_s27 + $0x8] sm:$0xff] %v1216_v60  ;;  %v1230_v1 = vsel %vm1229_vm0, 0.0, %v2901_v62  ;;  %v1172_v2 = vsel %vm1171_vm1, %v1167_v53, %v1168_v63  ;;  %v1180_v3 = vsel %vm1179_vm2, %v1167_v53, %v2891_v0  ;;  %v2893_v4 = vld [vmem:[%s3799_s22 + $0x10] sm:$0xff]  ;;  %v2895_v5 = vld [vmem:[%s3799_s22 + $0x18] sm:$0xff]  ;;  %vm1302_vm14 = vcmp.eq.s32.totalorder %v1301_v54, %v3794_v24 }
 0x2c1   : >>> { %2900 = vst [vmem:[%s3791_s27 + $0x10] sm:$0xff] %v1223_v61  ;;  %v1239_v6 = vld [vmem:[%s3802_s29] sm:$0xff]  ;;  %2902 = vst [vmem:[%s3791_s27 + $0x18] sm:$0xff] %v1230_v1  ;;  %v1188_v7 = vsel %vm1187_vm3, %v1167_v53, %v2893_v4  ;;  %v1196_v8 = vsel %vm1195_vm4, %v1167_v53, %v2895_v5  ;;  %v2903_v10 = vld [vmem:[%s3802_s29 + $0x8] sm:$0xff]  ;;  %s3887_s27 = smov [#allocation12]  ;;  %vm1320_vm15 = vcmp.eq.s32.totalorder %v3320_v24, 1 }
 0x2c2   : >>> { %1173 = vst [vmem:[%s3799_s22] sm:$0xff] %v1172_v2  ;;  %2892 = vst [vmem:[%s3799_s22 + $0x8] sm:$0xff] %v1180_v3  ;;  %v1243_v9 = vsel %vm1242_vm5, 0.0, %v1239_v6  ;;  %v2905_v11 = vld [vmem:[%s3802_s29 + $0x10] sm:$0xff]  ;;  %v2907_v12 = vld [vmem:[%s3802_s29 + $0x18] sm:$0xff]  ;;  %v1250_v13 = vsel %vm1249_vm6, 0.0, %v2903_v10  ;;  %vm1333_vm0 = vcmp.eq.s32.totalorder %v3320_v24, 31 }
 0x2c3   : >>> { %2894 = vst [vmem:[%s3799_s22 + $0x10] sm:$0xff] %v1188_v7  ;;  %2896 = vst [vmem:[%s3799_s22 + $0x18] sm:$0xff] %v1196_v8  ;;  %v1257_v14 = vsel %vm1256_vm7, 0.0, %v2905_v11  ;;  %v1264_v15 = vsel %vm1263_vm9, 0.0, %v2907_v12  ;;  %v1275_v16 = vld [vmem:[%s3813_s20] sm:$0xff]  ;;  %v2909_v18 = vld [vmem:[%s3813_s20 + $0x8] sm:$0xff] }
 0x2c4   : >>> { %1244 = vst [vmem:[%s3802_s29] sm:$0xff] %v1243_v9  ;;  %v2911_v19 = vld [vmem:[%s3813_s20 + $0x10] sm:$0xff]  ;;  %2904 = vst [vmem:[%s3802_s29 + $0x8] sm:$0xff] %v1250_v13  ;;  %v1279_v20 = vsel %vm1278_vm10, %v1274_v58, %v1275_v16  ;;  %v1287_v21 = vsel %vm1286_vm12, %v1274_v58, %v2909_v18  ;;  %v2913_v23 = vld [vmem:[%s3813_s20 + $0x18] sm:$0xff]  ;;  %s4283_s22 = smov 127   ;;  %vm1316_vm12 = vcmp.eq.s32.totalorder %v3320_v24, 0  ;;  %vm4303_vm1 = vcmp.eq.s32.totalorder %v3316_v17, 7 }
 0x2c5   : >>> { %2906 = vst [vmem:[%s3802_s29 + $0x10] sm:$0xff] %v1257_v14  ;;  %2908 = vst [vmem:[%s3802_s29 + $0x18] sm:$0xff] %v1264_v15  ;;  %v1295_v22 = vsel %vm1294_vm13, %v1274_v58, %v2911_v19  ;;  %v1303_v25 = vsel %vm1302_vm14, %v1274_v58, %v2913_v23  ;;  %s3899_s29 = smov [#allocation12]  ;;  %v435_v17 = vmov (%p624_p9), %v3316_v17  ;;  %v481_v24 = vmov (%p624_p9), %v3320_v24 }
 0x2c6   : >>> { %1280 = vst [vmem:[%s3813_s20] sm:$0xff] %v1279_v20  ;;  %2910 = vst [vmem:[%s3813_s20 + $0x8] sm:$0xff] %v1287_v21  ;;  %v484_v17 = vmov (%p624_p9), %v3316_v17  ;;  %v432_v24 = vmov (%p624_p9), %v3320_v24 }
 0x2c7   : >>> { %2912 = vst [vmem:[%s3813_s20 + $0x10] sm:$0xff] %v1295_v22  ;;  %2914 = vst [vmem:[%s3813_s20 + $0x18] sm:$0xff] %v1303_v25  ;;  %s3909_s20 = smov [#allocation13]  ;;  %vm447_vm9 = vcmp.eq.s32.totalorder (%p624_p9), %v435_v17, %v432_v24 }
 0x2c8   : >>> { %v1307_v26 = vld [vmem:[%s3877_s16] sm:$0xff]  ;;  %v2915_v31 = vld [vmem:[%s3909_s20 + $0x8] sm:$0xff]  ;;  %v2919_v34 = vld [vmem:[%s3924_s0 + $0x10] sm:$0xff] }
 0x2c9   : >>> { %1308 = vrot.lane.b32.xlu1 %v1307_v26, %s3201_s11  ;;  %v2923_v38 = vld [vmem:[%s3948_s10 + $0x18] sm:$0xff]  ;;  %vm4305_vm2 = vmmov %vm4303_vm1 }
 0x2ca   : >>> { %v3885_v27 = vld [vmem:[%s3880_s17] sm:$0xff]  ;;  %v3892_v28 = vld [vmem:[%s3887_s27 + $0x8] sm:$0xff]  ;;  %v3907_v30 = vld [vmem:[%s3899_s29 + $0x10] sm:$0xff] }
 0x2cb   : >>> { %1312 = vrot.lane.b32.xlu0 %v3885_v27, %s3201_s11  ;;  %v3937_v35 = vld [vmem:[%s3931_s2 + $0x18] sm:$0xff]  ;;  %vm4306_vm3 = vmmov %vm4303_vm1 }
 0x2cc   : >>> { %v3902_v29 = vld [vmem:[%s3896_s30] sm:$0xff]  ;;  %v3918_v32 = vld [vmem:[%s3913_s21 + $0x8] sm:$0xff]  ;;  %v3942_v36 = vld [vmem:[%s3934_s3 + $0x10] sm:$0xff] }
 0x2cd   : >>> { %1344 = vrot.lane.b32.xlu1 %v3892_v28, %s3201_s11  ;;  %v3966_v40 = vld [vmem:[%s3960_s9 + $0x18] sm:$0xff]  ;;  %vm4307_vm4 = vmmov %vm4303_vm1 }
 0x2ce   : >>> { %v2933_v37 = vld [vmem:[%s3944_s18 + $0x8] sm:$0xff]  ;;  %v2937_v39 = vld [vmem:[%s3954_s13 + $0x10] sm:$0xff]  ;;  %v2941_v41 = vld [vmem:[%s3963_s8 + $0x18] sm:$0xff] }
 0x2cf   : >>> { %1329 = vrot.lane.b32.xlu0 %v1307_v26, %s4283_s22  ;;  %s3920_s22 = smov [#allocation15]  ;;  %vm4308_vm5 = vmmov %vm4303_vm1 }
 0x2d0   : >>> { %v1441_v33 = vld [vmem:[%s3920_s22] sm:$0xff]  ;;  %vm4309_vm6 = vmmov %vm4303_vm1 }
 0x2d1   : >>> { %1446 = vrot.lane.b32.xlu1 %v3902_v29, %s3201_s11  ;;  %vm4310_vm7 = vmmov %vm4303_vm1 }
 0x2d3   : >>> { %1376 = vrot.lane.b32.xlu0 %v3907_v30, %s3201_s11 }
 0x2d5   : >>> { %1340 = vrot.lane.b32.xlu1 %v2915_v31, %s3201_s11 }
 0x2d7   : >>> { %1478 = vrot.lane.b32.xlu0 %v3918_v32, %s3201_s11 }
 0x2d9   : >>> { %1442 = vrot.lane.b32.xlu1 %v1441_v33, %s3201_s11 }
 0x2db   : >>> { %1372 = vrot.lane.b32.xlu0 %v2919_v34, %s3201_s11 }
 0x2dd   : >>> { %1361 = vrot.lane.b32.xlu1 %v2915_v31, %s4302_s1 }
 0x2df   : >>> { %1463 = vrot.lane.b32.xlu0 %v1441_v33, %s4302_s1 }
 0x2e1   : >>> { %1408 = vrot.lane.b32.xlu1 %v3937_v35, %s3201_s11 }
 0x2e3   : >>> { %1510 = vrot.lane.b32.xlu0 %v3942_v36, %s3201_s11 }
 0x2e5   : >>> { %1474 = vrot.lane.b32.xlu1 %v2933_v37, %s3201_s11 }
 0x2e7   : >>> { %1404 = vrot.lane.b32.xlu0 %v2923_v38, %s3201_s11 }
 0x2e9   : >>> { %1393 = vrot.lane.b32.xlu1 %v2919_v34, %s4302_s1 }
 0x2eb   : >>> { %1506 = vrot.lane.b32.xlu0 %v2937_v39, %s3201_s11 }
 0x2ed   : >>> { %1495 = vrot.lane.b32.xlu1 %v2933_v37, %s4302_s1 }
 0x2ef   : >>> { %1425 = vrot.lane.b32.xlu0 %v2923_v38, %s4302_s1 }
 0x2f1   : >>> { %1542 = vrot.lane.b32.xlu1 %v3966_v40, %s3201_s11 }
 0x2f3   : >>> { %1538 = vrot.lane.b32.xlu0 %v2941_v41, %s3201_s11 }
 0x2f5   : >>> { %1527 = vrot.lane.b32.xlu1 %v2937_v39, %s4302_s1 }
 0x2f9   : >>> { %1559 = vrot.lane.b32.xlu1 %v2941_v41, %s4302_s1  ;;  %s4048_s1 = smov [#allocation12] }
 0x33b   : >>> { %v1309_v42 = vpop.permute.xlu1 %1308 }
 0x33d   : >>> { %v1313_v43 = vpop.permute.xlu0 %1312 }
 0x33e   : >>> { %v1317_v49 = vsel %vm1316_vm12, %v3885_v27, %v1313_v43 }
 0x33f   : >>> { %v1321_v48 = vsel %vm1320_vm15, %v1309_v42, %v1317_v49  ;;  %v1345_v45 = vpop.permute.xlu1 %1344 }
 0x340   : >>> { %v1327_v44 = vsel %vm2541_vm8, %v1321_v48, 0.0  ;;  %v1349_v52 = vsel %vm1316_vm12, %v3892_v28, %v1345_v45 }
 0x341   : >>> { %v1330_v46 = vpop.permute.xlu0 %1329  ;;  %1431 = vst [vmem:[%s3880_s17] sm:$0xff] %v1327_v44 }
 0x342   : >>> { %v1334_v47 = vsel %vm1333_vm0, %v3885_v27, %v1330_v46 }
 0x343   : >>> { %1432 = vst [vmem:[%s3877_s16] sm:$0xff] %v1334_v47  ;;  %v1447_v50 = vpop.permute.xlu1 %1446 }
 0x344   : >>> { %v1451_v57 = vsel %vm1316_vm12, %v3902_v29, %v1447_v50 }
 0x345   : >>> { %v1377_v51 = vpop.permute.xlu0 %1376 }
 0x346   : >>> { %v1381_v59 = vsel %vm1316_vm12, %v3907_v30, %v1377_v51 }
 0x347   : >>> { %v1341_v53 = vpop.permute.xlu1 %1340 }
 0x348   : >>> { %v1353_v54 = vsel %vm1320_vm15, %v1341_v53, %v1349_v52 }
 0x349   : >>> { %v1479_v55 = vpop.permute.xlu0 %1478  ;;  %v1359_v56 = vsel %vm2541_vm8, %v1353_v54, 0.0 }
 0x34a   : >>> { %2927 = vst [vmem:[%s3887_s27 + $0x8] sm:$0xff] %v1359_v56  ;;  %v1483_v7 = vsel %vm1316_vm12, %v3918_v32, %v1479_v55 }
 0x34b   : >>> { %v1443_v58 = vpop.permute.xlu1 %1442 }
 0x34c   : >>> { %v1455_v60 = vsel %vm1320_vm15, %v1443_v58, %v1451_v57 }
 0x34d   : >>> { %v1373_v61 = vpop.permute.xlu0 %1372  ;;  %v1461_v62 = vsel %vm2541_vm8, %v1455_v60, 0.0 }
 0x34e   : >>> { %v1385_v63 = vsel %vm1320_vm15, %v1373_v61, %v1381_v59  ;;  %1565 = vst [vmem:[%s3896_s30] sm:$0xff] %v1461_v62 }
 0x34f   : >>> { %v1391_v0 = vsel %vm2541_vm8, %v1385_v63, 0.0  ;;  %v1362_v1 = vpop.permute.xlu1 %1361 }
 0x350   : >>> { %2929 = vst [vmem:[%s3899_s29 + $0x10] sm:$0xff] %v1391_v0  ;;  %v1366_v2 = vsel %vm1333_vm0, %v3892_v28, %v1362_v1 }
 0x351   : >>> { %v1464_v3 = vpop.permute.xlu0 %1463  ;;  %2928 = vst [vmem:[%s3909_s20 + $0x8] sm:$0xff] %v1366_v2 }
 0x352   : >>> { %v1468_v4 = vsel %vm1333_vm0, %v3902_v29, %v1464_v3 }
 0x353   : >>> { %1566 = vst [vmem:[%s3920_s22] sm:$0xff] %v1468_v4  ;;  %v1409_v5 = vpop.permute.xlu1 %1408 }
 0x354   : >>> { %v1413_v9 = vsel %vm1316_vm12, %v3937_v35, %v1409_v5 }
 0x355   : >>> { %v1511_v6 = vpop.permute.xlu0 %1510 }
 0x356   : >>> { %v1515_v16 = vsel %vm1316_vm12, %v3942_v36, %v1511_v6 }
 0x357   : >>> { %v1475_v8 = vpop.permute.xlu1 %1474 }
 0x358   : >>> { %v1487_v10 = vsel %vm1320_vm15, %v1475_v8, %v1483_v7 }
 0x359   : >>> { %v1405_v11 = vpop.permute.xlu0 %1404  ;;  %v1493_v12 = vsel %vm2541_vm8, %v1487_v10, 0.0 }
 0x35a   : >>> { %v1417_v13 = vsel %vm1320_vm15, %v1405_v11, %v1413_v9  ;;  %2945 = vst [vmem:[%s3913_s21 + $0x8] sm:$0xff] %v1493_v12 }
 0x35b   : >>> { %v1423_v14 = vsel %vm2541_vm8, %v1417_v13, 0.0  ;;  %v1394_v15 = vpop.permute.xlu1 %1393 }
 0x35c   : >>> { %2931 = vst [vmem:[%s3931_s2 + $0x18] sm:$0xff] %v1423_v14  ;;  %v1398_v18 = vsel %vm1333_vm0, %v3907_v30, %v1394_v15  ;;  %s4093_s2 = smov [#allocation14] }
 0x35d   : >>> { %v1507_v19 = vpop.permute.xlu0 %1506  ;;  %2930 = vst [vmem:[%s3924_s0 + $0x10] sm:$0xff] %v1398_v18  ;;  %s4084_s0 = smov [#allocation13] }
 0x35e   : >>> { %v1519_v20 = vsel %vm1320_vm15, %v1507_v19, %v1515_v16 }
 0x35f   : >>> { %v1525_v21 = vsel %vm2541_vm8, %v1519_v20, 0.0  ;;  %v1496_v22 = vpop.permute.xlu1 %1495 }
 0x360   : >>> { %2947 = vst [vmem:[%s3934_s3 + $0x10] sm:$0xff] %v1525_v21  ;;  %v1500_v23 = vsel %vm1333_vm0, %v3918_v32, %v1496_v22  ;;  %s1658_s3 = smov [#allocation15] }
 0x361   : >>> { %v1426_v25 = vpop.permute.xlu0 %1425  ;;  %2946 = vst [vmem:[%s3944_s18 + $0x8] sm:$0xff] %v1500_v23  ;;  %s555_s18 = smov (%p624_p9), [#allocation15] }
 0x362   : >>> { %v1430_v26 = vsel %vm1333_vm0, %v3937_v35, %v1426_v25 }
 0x363   : >>> { %2932 = vst [vmem:[%s3948_s10 + $0x18] sm:$0xff] %v1430_v26  ;;  %v1575_v27 = vld [vmem:[%s4048_s1] ss:$0 sm:$0xff]  ;;  %v2952_v29 = vld [vmem:[%s4048_s1 + $0x7] ss:$0 sm:$0xff]  ;;  %v1543_v34 = vpop.permute.xlu1 %1542  ;;  %s485_s10 = smov (%p624_p9), [#allocation13] }
 0x364   : >>> { %v2951_v28 = vld [vmem:[%s4048_s1 - $0x1] sm:$0xfe]  ;;  %v2953_v31 = vld [vmem:[%s4048_s1 + $0x7] sm:$0xfe]  ;;  %v2954_v32 = vld [vmem:[%s4048_s1 + $0xf] ss:$0 sm:$0xff]  ;;  %v1547_v42 = vsel %vm1316_vm12, %v3966_v40, %v1543_v34 }
 0x365   : >>> { %v1582_v30 = vsel %vm1581_vm11, %v1575_v27, %v2951_v28  ;;  %v2956_v33 = vld [vmem:[%s4048_s1 + $0xf] sm:$0xfe]  ;;  %v1593_v37 = vsel %vm1581_vm11, %v2952_v29, %v2953_v31  ;;  %v2957_v38 = vld [vmem:[%s4048_s1 + $0x17] ss:$0 sm:$0xff]  ;;  %v2959_v39 = vld [vmem:[%s4048_s1 + $0x17] sm:$0xfe]  ;;  %v1539_v43 = vpop.permute.xlu0 %1538 }
 0x366   : >>> { %1585 = vst [vmem:[%s4048_s1] sm:$0xff] %v1582_v30  ;;  %v1604_v35 = vsel %vm1581_vm11, %v2954_v32, %v2956_v33  ;;  %v2960_v41 = vld [vmem:[%s4048_s1 + $0x1f] ss:$0 sm:$0xff]  ;;  %2955 = vst [vmem:[%s4048_s1 + $0x8] sm:$0xff] %v1593_v37  ;;  %v1615_v49 = vsel %vm1581_vm11, %v2957_v38, %v2959_v39  ;;  %v1551_v48 = vsel %vm1320_vm15, %v1539_v43, %v1547_v42 }
 0x367   : >>> { %2958 = vst [vmem:[%s4048_s1 + $0x10] sm:$0xff] %v1604_v35  ;;  %2961 = vst [vmem:[%s4048_s1 + $0x18] sm:$0xff] %v1615_v49  ;;  %v1557_v44 = vsel %vm2541_vm8, %v1551_v48, 0.0  ;;  %v1528_v45 = vpop.permute.xlu1 %1527  ;;  %v454_v49 = vadd.s32 (%p624_p9), 8, %v435_v17 }
 0x368   : >>> { %2949 = vst [vmem:[%s3960_s9 + $0x18] sm:$0xff] %v1557_v44  ;;  %v1532_v46 = vsel %vm1333_vm0, %v3942_v36, %v1528_v45  ;;  %s436_s9 = smov (%p624_p9), [#allocation12] }
 0x369   : >>> { %2948 = vst [vmem:[%s3954_s13 + $0x10] sm:$0xff] %v1532_v46  ;;  %s4171_s13 = smov (%p624_p9), [#allocation14]  ;;  %vm455_vm10 = vcmp.eq.s32.totalorder (%p624_p9), %v454_v49, %v432_v24 }
 0x36a   : >>> { %v1659_v47 = vld [vmem:[%s4084_s0] ss:$0 sm:$0xff]  ;;  %v2974_v51 = vld [vmem:[%s4084_s0 + $0x7] ss:$0 sm:$0xff]  ;;  %v2975_v53 = vld [vmem:[%s4084_s0 + $0x7] sm:$0xfe] }
 0x36b   : >>> { %v2973_v50 = vld [vmem:[%s4084_s0 - $0x1] sm:$0xfe]  ;;  %v2976_v54 = vld [vmem:[%s4084_s0 + $0xf] ss:$0 sm:$0xff]  ;;  %v2978_v55 = vld [vmem:[%s4084_s0 + $0xf] sm:$0xfe]  ;;  %v1677_v36 = vsel %vm1581_vm11, %v2974_v51, %v2975_v53  ;;  %v1560_v60 = vpop.permute.xlu1 %1559 }
 0x36c   : >>> { %v1666_v52 = vsel %vm1581_vm11, %v1659_v47, %v2973_v50  ;;  %v1688_v56 = vsel %vm1581_vm11, %v2976_v54, %v2978_v55  ;;  %v2979_v57 = vld [vmem:[%s4084_s0 + $0x17] ss:$0 sm:$0xff]  ;;  %v2981_v58 = vld [vmem:[%s4084_s0 + $0x17] sm:$0xfe]  ;;  %v2982_v59 = vld [vmem:[%s4084_s0 + $0x1f] ss:$0 sm:$0xff]  ;;  %v1564_v62 = vsel %vm1333_vm0, %v3966_v40, %v1560_v60 }
 0x36d   : >>> { %1669 = vst [vmem:[%s4084_s0] sm:$0xff] %v1666_v52  ;;  %2977 = vst [vmem:[%s4084_s0 + $0x8] sm:$0xff] %v1677_v36  ;;  %v1699_v61 = vsel %vm1581_vm11, %v2979_v57, %v2981_v58  ;;  %v474_v60 = vadd.s32 (%p624_p9), 24, %v435_v17 }
 0x36e   : >>> { %2980 = vst [vmem:[%s4084_s0 + $0x10] sm:$0xff] %v1688_v56  ;;  %2983 = vst [vmem:[%s4084_s0 + $0x18] sm:$0xff] %v1699_v61 }
 0x36f   : >>> { %2950 = vst [vmem:[%s3963_s8 + $0x18] sm:$0xff] %v1564_v62  ;;  %v1619_v63 = vld [vmem:[%s4093_s2] ss:$0 sm:$0xff]  ;;  %v2963_v0 = vld [vmem:[%s4093_s2 + $0x19] sm:$0x7f]  ;;  %vm4304_vm11 = vmmov %vm4303_vm1  ;;  %s2039_s8 = sadd.s32 (%p624_p9), 1, %s3194_s25   ;;  %vm475_vm14 = vcmp.eq.s32.totalorder (%p624_p9), %v474_v60, %v432_v24 }
 0x370   : >>> { %v2964_v1 = vld [vmem:[%s4093_s2 + $0x18] ss:$0 sm:$0xff]  ;;  %2962 = vst [vmem:[%s4048_s1 + $0x1] sm:$0x1] %v1619_v63  ;;  %v1628_v2 = vsel %vm4303_vm1, %v2960_v41, %v2963_v0  ;;  %v2966_v3 = vld [vmem:[%s4093_s2 + $0x11] sm:$0x7f]  ;;  %s4311_s25 = smov (%p624_p9), %s2039_s8 }
 0x371   : >>> { %v2967_v4 = vld [vmem:[%s4093_s2 + $0x10] ss:$0 sm:$0xff]  ;;  %v2969_v5 = vld [vmem:[%s4093_s2 + $0x9] sm:$0x7f]  ;;  %2965 = vst [vmem:[%s4093_s2 + $0x18] sm:$0xff] %v1628_v2  ;;  %v1637_v40 = vsel %vm4304_vm11, %v2964_v1, %v2966_v3  ;;  %p620_p10 = scmp.ge.s32.totalorder (%p624_p9), %s2039_s8, 15 }
 0x372   : >>> { %v1646_v6 = vsel %vm4305_vm2, %v2967_v4, %v2969_v5  ;;  %v2970_v7 = vld [vmem:[%s4093_s2 + $0x8] ss:$0 sm:$0xff]  ;;  %v2972_v8 = vld [vmem:[%s4093_s2 + $0x1] sm:$0x7f]  ;;  %2968 = vst [vmem:[%s4093_s2 + $0x10] sm:$0xff] %v1637_v40 }
 0x373   : >>> { %2971 = vst [vmem:[%s4093_s2 + $0x8] sm:$0xff] %v1646_v6  ;;  %v1654_v9 = vsel %vm4306_vm3, %v2970_v7, %v2972_v8 }
 0x374   : >>> { %1656 = vst [vmem:[%s4093_s2] sm:$0xff] %v1654_v9 }
 0x375   : >> { %626 = sbr.rel (!%p624_p9) target bundleno = 323 (0x143), region = 581 }
 0x376   : >>> { %v1703_v10 = vld [vmem:[%s1658_s3] ss:$0 sm:$0xff]  ;;  %v2985_v11 = vld [vmem:[%s1658_s3 + $0x19] sm:$0x7f]  ;;  %v2986_v12 = vld [vmem:[%s1658_s3 + $0x18] ss:$0 sm:$0xff] }
 0x377   : >>> { %2984 = vst [vmem:[%s4084_s0 + $0x1] sm:$0x1] %v1703_v10  ;;  %v1712_v13 = vsel %vm4307_vm4, %v2982_v59, %v2985_v11  ;;  %v2988_v14 = vld [vmem:[%s1658_s3 + $0x11] sm:$0x7f]  ;;  %v2989_v15 = vld [vmem:[%s1658_s3 + $0x10] ss:$0 sm:$0xff] }
 0x378   : >>> { %v2991_v16 = vld [vmem:[%s1658_s3 + $0x9] sm:$0x7f]  ;;  %2987 = vst [vmem:[%s1658_s3 + $0x18] sm:$0xff] %v1712_v13  ;;  %v1721_v18 = vsel %vm4308_vm5, %v2986_v12, %v2988_v14  ;;  %v2992_v20 = vld [vmem:[%s1658_s3 + $0x8] ss:$0 sm:$0xff]  ;;  %v442_v23 = vld [vmem:[%s436_s9] sm:$0xff] (%p624_p9) }
 0x379   : >>> { %v1730_v19 = vsel %vm4309_vm6, %v2989_v15, %v2991_v16  ;;  %v2994_v21 = vld [vmem:[%s1658_s3 + $0x1] sm:$0x7f]  ;;  %2990 = vst [vmem:[%s1658_s3 + $0x10] sm:$0xff] %v1721_v18  ;;  %v3069_v25 = vld [vmem:[%s436_s9 + $0x8] sm:$0xff] (%p624_p9)  ;;  %v3070_v26 = vld [vmem:[%s436_s9 + $0x10] sm:$0xff] (%p624_p9)  ;;  %v443_v27 = vsel (%p624_p9), %vm2541_vm8, %v442_v23, 0.0 }
 0x37a   : >>> { %2993 = vst [vmem:[%s1658_s3 + $0x8] sm:$0xff] %v1730_v19  ;;  %v1738_v22 = vsel %vm4310_vm7, %v2992_v20, %v2994_v21  ;;  %v451_v28 = vsel (%p624_p9), %vm2541_vm8, %v3069_v25, 0.0  ;;  %v461_v29 = vsel (%p624_p9), %vm2541_vm8, %v3070_v26, 0.0  ;;  %v3071_v30 = vld [vmem:[%s436_s9 + $0x18] sm:$0xff] (%p624_p9)  ;;  %v444_v32 = vmul.f32 (%p624_p9), %v443_v27, %v443_v27 }
 0x37b   : >>> { %1740 = vst [vmem:[%s1658_s3] sm:$0xff] %v1738_v22  ;;  %v452_v33 = vmul.f32 (%p624_p9), %v451_v28, %v451_v28  ;;  %v462_v34 = vmul.f32 (%p624_p9), %v461_v29, %v461_v29  ;;  %v471_v37 = vsel (%p624_p9), %vm2541_vm8, %v3071_v30, 0.0  ;;  %v526_v51 = vld [vmem:[%s4171_s13] sm:$0xff] (%p624_p9)  ;;  %v3075_v53 = vld [vmem:[%s4171_s13 + $0x8] sm:$0xff] (%p624_p9)  ;;  %v464_v59 = vadd.s32 (%p624_p9), 16, %v435_v17  ;;  %v3076_v0 = vld [vmem:[%s4171_s13 + $0x10] sm:$0xff] (%p624_p9) }
 0x37c   : >> { %v472_v41 = vmul.f32 %v471_v37, %v471_v37  ;;  %v448_v54 = vsel %vm447_vm9, 0.0, %v444_v32  ;;  %v527_v57 = vsel %vm2541_vm8, %v526_v51, 0.0  ;;  %v533_v63 = vsel %vm2541_vm8, %v3075_v53, 0.0  ;;  %v3077_v3 = vld [vmem:[%s4171_s13 + $0x18] sm:$0xff] }
 0x37d   : >> { %v458_v39 = vadd.f32 %v452_v33, %v444_v32  ;;  %v456_v56 = vsel %vm455_vm10, 0.0, %v452_v33  ;;  %vm465_vm13 = vcmp.eq.s32.totalorder %v464_v59, %v432_v24  ;;  %v516_v24 = vmov %v3320_v24 }
 0x37e   : >> { %v491_v31 = vld [vmem:[%s485_s10] sm:$0xff]  ;;  %v3072_v35 = vld [vmem:[%s485_s10 + $0x8] sm:$0xff]  ;;  %v3073_v42 = vld [vmem:[%s485_s10 + $0x10] sm:$0xff]  ;;  %v457_v58 = vadd.f32 %v456_v56, %v448_v54  ;;  %v519_v17 = vmov %v3316_v17  ;;  %v528_v2 = vmul.f32 %v527_v57, %v527_v57  ;;  %v466_v4 = vsel %vm465_vm13, 0.0, %v462_v34 }
 0x37f   : >> { %v492_v38 = vsel %vm2541_vm8, %v491_v31, 0.0  ;;  %v498_v43 = vsel %vm2541_vm8, %v3072_v35, 0.0  ;;  %v468_v48 = vadd.f32 %v462_v34, %v458_v39  ;;  %v3074_v45 = vld [vmem:[%s485_s10 + $0x18] sm:$0xff]  ;;  %v504_v46 = vsel %vm2541_vm8, %v3073_v42, 0.0 }
 0x380   : >> { %v493_v44 = vmul.f32 %v492_v38, %v492_v38  ;;  %v499_v50 = vmul.f32 %v498_v43, %v498_v43  ;;  %v510_v52 = vsel %vm2541_vm8, %v3074_v45, 0.0  ;;  %v505_v36 = vmul.f32 %v504_v46, %v504_v46 }
 0x381   : >> { %v478_v47 = vadd.f32 %v472_v41, %v468_v48  ;;  %v511_v62 = vmul.f32 %v510_v52, %v510_v52  ;;  %v476_v5 = vsel %vm475_vm14, 0.0, %v472_v41  ;;  %v539_v40 = vsel %vm2541_vm8, %v3076_v0, 0.0 }
 0x382   : >> { %v467_v6 = vadd.f32 %v466_v4, %v457_v58  ;;  %v534_v8 = vmul.f32 %v533_v63, %v533_v63  ;;  %v561_v9 = vld [vmem:[%s555_s18] sm:$0xff]  ;;  %v545_v10 = vsel %vm2541_vm8, %v3077_v3, 0.0  ;;  %v540_v13 = vmul.f32 %v539_v40, %v539_v40  ;;  %v3078_v14 = vld [vmem:[%s555_s18 + $0x8] sm:$0xff]  ;;  %v3079_v20 = vld [vmem:[%s555_s18 + $0x10] sm:$0xff] }
 0x383   : >> { %v495_v55 = vadd.f32 %v493_v44, %v478_v47  ;;  %v562_v15 = vsel %vm2541_vm8, %v561_v9, 0.0  ;;  %v546_v19 = vmul.f32 %v545_v10, %v545_v10  ;;  %v572_v21 = vsel %vm2541_vm8, %v3078_v14, 0.0  ;;  %v3080_v26 = vld [vmem:[%s555_s18 + $0x18] sm:$0xff] }
 0x384   : >> { %v477_v11 = vadd.f32 %v476_v5, %v467_v6  ;;  %v563_v25 = vmul.f32 %v562_v15, %v562_v15  ;;  %v582_v27 = vsel %vm2541_vm8, %v3079_v20, 0.0  ;;  %v573_v30 = vmul.f32 %v572_v21, %v572_v21 }
 0x385   : >> { %v501_v61 = vadd.f32 %v499_v50, %v495_v55  ;;  %v554_v17 = vmov %v3316_v17  ;;  %v592_v31 = vsel %vm2541_vm8, %v3080_v26, 0.0  ;;  %v583_v34 = vmul.f32 %v582_v27, %v582_v27 }
 0x386   : >> { %v494_v16 = vadd.f32 %v493_v44, %v477_v11  ;;  %v551_v24 = vmov %v3320_v24  ;;  %v575_v35 = vadd.s32 8, %v554_v17  ;;  %v593_v39 = vmul.f32 %v592_v31, %v592_v31 }
 0x387   : >> { %v507_v1 = vadd.f32 %v505_v36, %v501_v61  ;;  %vm566_vm12 = vcmp.eq.s32.totalorder %v554_v17, %v551_v24  ;;  %v585_v42 = vadd.s32 16, %v554_v17  ;;  %v595_v48 = vadd.s32 24, %v554_v17 }
 0x388   : >> { %v500_v22 = vadd.f32 %v499_v50, %v494_v16  ;;  %vm576_vm15 = vcmp.eq.s32.totalorder %v575_v35, %v551_v24  ;;  %v567_v45 = vsel %vm566_vm12, 0.0, %v563_v25 }
 0x389   : >> { %v513_v7 = vadd.f32 %v511_v62, %v507_v1  ;;  %vm586_vm0 = vcmp.eq.s32.totalorder %v585_v42, %v551_v24  ;;  %v577_v47 = vsel %vm576_vm15, 0.0, %v573_v30  ;;  %vm596_vm1 = vcmp.eq.s32.totalorder %v595_v48, %v551_v24 }
 0x38a   : >> { %v506_v28 = vadd.f32 %v505_v36, %v500_v22  ;;  %v587_v51 = vsel %vm586_vm0, 0.0, %v583_v34  ;;  %v597_v53 = vsel %vm596_vm1, 0.0, %v593_v39 }
 0x38b   : >> { %v530_v12 = vadd.f32 %v528_v2, %v513_v7 }
 0x38c   : >> { %v512_v32 = vadd.f32 %v511_v62, %v506_v28 }
 0x38d   : >> { %v536_v18 = vadd.f32 %v534_v8, %v530_v12 }
 0x38e   : >> { %v529_v37 = vadd.f32 %v528_v2, %v512_v32 }
 0x38f   : >> { %v542_v23 = vadd.f32 %v540_v13, %v536_v18 }
 0x390   : >> { %v535_v41 = vadd.f32 %v534_v8, %v529_v37 }
 0x391   : >> { %v548_v29 = vadd.f32 %v546_v19, %v542_v23 }
 0x392   : >> { %v541_v49 = vadd.f32 %v540_v13, %v535_v41 }
 0x393   : >> { %v569_v33 = vadd.f32 %v563_v25, %v548_v29 }
 0x394   : >> { %v547_v46 = vadd.f32 %v546_v19, %v541_v49 }
 0x395   : >> { %v579_v38 = vadd.f32 %v573_v30, %v569_v33 }
 0x396   : >> { %v568_v50 = vadd.f32 %v567_v45, %v547_v46 }
 0x397   : >> { %v589_v43 = vadd.f32 %v583_v34, %v579_v38 }
 0x398   : >> { %v578_v52 = vadd.f32 %v577_v47, %v568_v50 }
 0x399   : >> { %v599_v44 = vadd.f32 %v593_v39, %v589_v43 }
 0x39a   : >> { %v588_v54 = vadd.f32 %v587_v51, %v578_v52 }
 0x39b   : >> { %600 = vadd.xlane.f32.xlu0 %v599_v44 }
 0x39c   : >> { %v598_v55 = vadd.f32 %v597_v53, %v588_v54 }
 0x39f   : >> { %608 = vadd.xlane.f32.xlu0 %v598_v55 }
 0x428   : >> { %v601_v36 = vpop.xlane.xlu0 %600 }
 0x429   : >> { %v602_v56 = vrot.slane %v601_v36, 4 }
 0x42b   : >> { %v603_v57 = vadd.f32 %v602_v56, %v601_v36 }
 0x42c   : >> { %v609_v59 = vpop.xlane.xlu0 %608 }
 0x42d   : >> { %v604_v58 = vrot.slane %v603_v57, 2  ;;  %v610_v60 = vrot.slane %v609_v59, 4 }
 0x42f   : >> { %v611_v61 = vadd.f32 %v610_v60, %v609_v59  ;;  %v605_v62 = vadd.f32 %v604_v58, %v603_v57 }
 0x431   : >> { %v612_v63 = vrot.slane %v611_v61, 2  ;;  %v606_v1 = vrot.slane %v605_v62, 1 }
 0x433   : >> { %v613_v0 = vadd.f32 %v612_v63, %v611_v61  ;;  %v607_v4 = vadd.f32 %v606_v1, %v605_v62 }
 0x435   : >> { %v614_v2 = vrot.slane %v613_v0, 1 }
 0x437   : >> { %v615_v3 = vadd.f32 %v614_v2, %v613_v0 }
 0x439   : >> { %3105 = vpush %v615_v3 }
 0x43a   : >> { %3107 = vpush %v607_v4 }
 0x46a   : >> { %s3106_s21 = spop %3105 }
 0x46b   : >> { %s3108_s26 = spop %3107 }
 0x46c   : >> { %s618_s16 = smul.f32 1e-10, %s3108_s26 }
 0x46e   : >> { %p619_p11 = scmp.le.f32.partialorder %s3106_s21, %s618_s16 }
 0x470   : >> { %p621_p12 = por %p620_p10, %p619_p11 }
 0x472   : > { %2041 = sbr.rel (!%p621_p12) target bundleno = 322 (0x142), region = 592 }
 0x479 PF: > { %s2046_s17 = smov [#allocation12]  ;;  %v2050_v24 = vmov %v3320_v24  ;;  %v2053_v17 = vmov %v3316_v17  ;;  %s2084_s25 = smov [#allocation15] }
 0x47a   : > { %v2088_v24 = vmov %v3320_v24  ;;  %v2091_v17 = vmov %v3316_v17  ;;  %v2054_v5 = vld [vmem:[%s2046_s17] sm:$0xff]  ;;  %vm2057_vm11 = vcmp.eq.s32.totalorder %v2053_v17, %v2050_v24  ;;  %v3081_v40 = vld [vmem:[%s2046_s17 + $0x8] sm:$0xff]  ;;  %v2062_v6 = vadd.s32 8, %v2053_v17  ;;  %v3082_v8 = vld [vmem:[%s2046_s17 + $0x10] sm:$0xff]  ;;  %s2042_s11 = sand.u32 7, %s3269_s12   ;;  %s4312_s22 = scalar_lea.vmem [#allocation5], %s3314_s28 }
 0x47b   : > { %vm2095_vm2 = vcmp.eq.s32.totalorder %v2091_v17, %v2088_v24  ;;  %v2058_v7 = vsel %vm2057_vm11, %v2054_v5, 0.0  ;;  %v2068_v9 = vadd.s32 16, %v2053_v17  ;;  %v2074_v10 = vadd.s32 24, %v2053_v17  ;;  %v3083_v12 = vld [vmem:[%s2046_s17 + $0x18] sm:$0xff]  ;;  %v2092_v13 = vld [vmem:[%s2084_s25] sm:$0xff]  ;;  %v3084_v14 = vld [vmem:[%s2084_s25 + $0x8] sm:$0xff] }
 0x47c   : > { %v2100_v11 = vadd.s32 8, %v2091_v17  ;;  %vm2063_vm8 = vcmp.eq.s32.totalorder %v2062_v6, %v2050_v24  ;;  %v2106_v15 = vadd.s32 16, %v2091_v17  ;;  %v2112_v16 = vadd.s32 24, %v2091_v17  ;;  %v3085_v20 = vld [vmem:[%s2084_s25 + $0x10] sm:$0xff]  ;;  %v3086_v22 = vld [vmem:[%s2084_s25 + $0x18] sm:$0xff]  ;;  %s2043_s27 = scalar_lea.vmem [#allocation4], %s2042_s11 }
 0x47d   : > { %v2064_v18 = vsel %vm2063_vm8, %v3081_v40, %v2058_v7  ;;  %vm2069_vm3 = vcmp.eq.s32.totalorder %v2068_v9, %v2050_v24  ;;  %vm2075_vm4 = vcmp.eq.s32.totalorder %v2074_v10, %v2050_v24  ;;  %v2096_v19 = vsel %vm2095_vm2, %v2092_v13, 0.0  ;;  %s2047_s27 = smov %s2043_s27  ;;  %s2045_s30 = scalar_lea.vmem [#allocation6], %s2042_s11 }
 0x47e   : > { %v2070_v21 = vsel %vm2069_vm3, %v3082_v8, %v2064_v18  ;;  %vm2101_vm5 = vcmp.eq.s32.totalorder %v2100_v11, %v2088_v24  ;;  %vm2107_vm6 = vcmp.eq.s32.totalorder %v2106_v15, %v2088_v24  ;;  %vm2113_vm7 = vcmp.eq.s32.totalorder %v2112_v16, %v2088_v24  ;;  %s2085_s30 = smov %s2045_s30  ;;  %s4313_s29 = scalar_lea.vmem [#allocation7], %s3314_s28 }
 0x47f   : > { %v2076_v23 = vsel %vm2075_vm4, %v3083_v12, %v2070_v21  ;;  %v2102_v25 = vsel %vm2101_vm5, %v3084_v14, %v2096_v19  ;;  %s2161_s20 = sshrl.u32 (%p3283_p3), %s3269_s12, 3  ;;  %s4314_s1 = scalar_lea.vmem (%p3283_p3), [#allocation5], %s3314_s28 }
 0x480   : > { %v2077_v26 = vrot.slane %v2076_v23, 4  ;;  %v2108_v27 = vsel %vm2107_vm6, %v3085_v20, %v2102_v25  ;;  %s3093_s0 = sshll.u32 (%p3283_p3), %s2161_s20, 1 }
 0x481   : > { %v2114_v28 = vsel %vm2113_vm7, %v3086_v22, %v2108_v27  ;;  %s2163_s8 = scalar_lea.vmem (%p3283_p3), %s4276_s4, %s3093_s0 }
 0x482   : > { %v2078_v29 = vadd.f32 %v2077_v26, %v2076_v23  ;;  %v2115_v30 = vrot.slane %v2114_v28, 4 }
 0x484   : > { %v2079_v31 = vrot.slane %v2078_v29, 2  ;;  %v2116_v32 = vadd.f32 %v2115_v30, %v2114_v28 }
 0x486   : > { %v2080_v33 = vadd.f32 %v2079_v31, %v2078_v29  ;;  %v2117_v17 = vrot.slane %v2116_v32, 2 }
 0x488   : > { %v2081_v34 = vrot.slane %v2080_v33, 1  ;;  %v2118_v37 = vadd.f32 %v2117_v17, %v2116_v32 }
 0x48a   : > { %v2082_v35 = vadd.f32 %v2081_v34, %v2080_v33  ;;  %v2119_v24 = vrot.slane %v2118_v37, 1 }
 0x48c   : > { %2083 = vst [vmem:[%s2047_s27] sm:$0x1] %v2082_v35  ;;  %v2120_v38 = vadd.f32 %v2119_v24, %v2118_v37 }
 0x48e   : > { %2121 = vst [vmem:[%s2085_s30] sm:$0x1] %v2120_v38 }
 0x490   : > { %2160 = sbr.rel (!%p3283_p3) target bundleno = 1181 (0x49d), region = 114 }
 0x493   : > { %v2125_v39 = vld [vmem:[#allocation4] sm:$0x3] }
 0x494   : > { %2127 = vst [vmem:[%s4312_s22] sm:$0x3] %v2125_v39 }
 0x495   : > { %v2131_v41 = vld [vmem:[#allocation6] sm:$0x3] }
 0x496   : > { %2133 = vst [vmem:[%s4313_s29] sm:$0x3] %v2131_v41 }
 0x49b   : > { %v2179_v42 = vld [vmem:[%s4314_s1] sm:$0x3] }
 0x49c   : > { %2180 = vst [vmem:[%s2163_s8] sm:$0x3] %v2179_v42 }
 0x49d PF: > { %2197 = sbr.rel (!%p3283_p3) target bundleno = 1189 (0x4a5), region = 148  ;;  %s2198_s9 = sshrl.u32 (%p3283_p3), %s3269_s12, 3 }
 0x49e   : > { %s4315_s10 = scalar_lea.vmem (%p3283_p3), [#allocation7], %s3314_s28  ;;  %s3094_s13 = sshll.u32 (%p3283_p3), %s2198_s9, 1 }
 0x49f   : > { %s2200_s26 = scalar_lea.vmem (%p3283_p3), %s4277_s5, %s3094_s13 }
 0x4a3   : > { %v2216_v43 = vld [vmem:[%s4315_s10] sm:$0x3] (%p3283_p3) }
 0x4a4   : > { %2217 = vst [vmem:[%s2200_s26] sm:$0x3] %v2216_v43 }
 0x4a5 PF: > { %s3095_s19 = sshll.u32 %s3269_s12, 5  ;;  %v2246_v49 = vld [vmem:[%s3330_s14] sm:$0xff]  ;;  %v2248_v48 = vld [vmem:[%s3330_s14 + $0x8] sm:$0xff]  ;;  %v2250_v44 = vld [vmem:[%s3330_s14 + $0x10] sm:$0xff]  ;;  %s4316_s30 = sld [smem:[#allocation32_spill]] }
 0x4a6   : > { %s2233_s17 = scalar_lea.vmem %s4278_s6, %s3095_s19  ;;  %v2252_v45 = vld [vmem:[%s3330_s14 + $0x18] sm:$0xff]  ;;  %s2258_s27 = scalar_lea.vmem %s4279_s7, %s3095_s19  ;;  %v2271_v46 = vld [vmem:[%s3337_s15] sm:$0xff]  ;;  %v2273_v47 = vld [vmem:[%s3337_s15 + $0x8] sm:$0xff] }
 0x4a7   : > { %2247 = vst [vmem:[%s2233_s17] sm:$0xff] %v2246_v49  ;;  %2249 = vst [vmem:[%s2233_s17 + $0x8] sm:$0xff] %v2248_v48  ;;  %v2275_v50 = vld [vmem:[%s3337_s15 + $0x10] sm:$0xff]  ;;  %v2277_v51 = vld [vmem:[%s3337_s15 + $0x18] sm:$0xff]  ;;  %s4317_s1 = sld [smem:[#allocation33_spill]] }
 0x4a8   : > { %2251 = vst [vmem:[%s2233_s17 + $0x10] sm:$0xff] %v2250_v44  ;;  %2253 = vst [vmem:[%s2233_s17 + $0x18] sm:$0xff] %v2252_v45  ;;  %v2296_v52 = vld [vmem:[%s3346_s23] sm:$0xff]  ;;  %v2298_v53 = vld [vmem:[%s3346_s23 + $0x8] sm:$0xff] }
 0x4a9   : > { %2272 = vst [vmem:[%s2258_s27] sm:$0xff] %v2271_v46  ;;  %2274 = vst [vmem:[%s2258_s27 + $0x8] sm:$0xff] %v2273_v47  ;;  %v2300_v54 = vld [vmem:[%s3346_s23 + $0x10] sm:$0xff]  ;;  %v2302_v55 = vld [vmem:[%s3346_s23 + $0x18] sm:$0xff] }
 0x4aa   : > { %2276 = vst [vmem:[%s2258_s27 + $0x10] sm:$0xff] %v2275_v50  ;;  %2278 = vst [vmem:[%s2258_s27 + $0x18] sm:$0xff] %v2277_v51  ;;  %v2321_v36 = vld [vmem:[%s3353_s24] sm:$0xff]  ;;  %v2323_v56 = vld [vmem:[%s3353_s24 + $0x8] sm:$0xff] }
 0x4ab   : > { %s2283_s22 = scalar_lea.vmem %s4316_s30, %s3095_s19  ;;  %v2325_v57 = vld [vmem:[%s3353_s24 + $0x10] sm:$0xff]  ;;  %v2327_v58 = vld [vmem:[%s3353_s24 + $0x18] sm:$0xff] }
 0x4ac   : > { %2297 = vst [vmem:[%s2283_s22] sm:$0xff] %v2296_v52  ;;  %2299 = vst [vmem:[%s2283_s22 + $0x8] sm:$0xff] %v2298_v53 }
 0x4ad   : > { %s2308_s0 = scalar_lea.vmem %s4317_s1, %s3095_s19  ;;  %2301 = vst [vmem:[%s2283_s22 + $0x10] sm:$0xff] %v2300_v54  ;;  %2303 = vst [vmem:[%s2283_s22 + $0x18] sm:$0xff] %v2302_v55 }
 0x4ae   : > { %2322 = vst [vmem:[%s2308_s0] sm:$0xff] %v2321_v36  ;;  %2324 = vst [vmem:[%s2308_s0 + $0x8] sm:$0xff] %v2323_v56 }
 0x4af   : > { %2326 = vst [vmem:[%s2308_s0 + $0x10] sm:$0xff] %v2325_v57  ;;  %2328 = vst [vmem:[%s2308_s0 + $0x18] sm:$0xff] %v2327_v58 }
 0x4b0 PF: > { %s4318_s11 = sld [smem:[#allocation26_spill]]  ;;  %s4319_s30 = sld [smem:[#allocation25_spill]] }
 0x4b1   : > { %s4320_s10 = sld [smem:[#allocation27_spill]] }
 0x4b6   : > { %p13_p13 = scmp.ge.s32.totalorder %s4318_s11, 4  }
 0x4b8   :  { %15 = sbr.rel (!%p13_p13) target bundleno = 9 (0x9), region = 603 }

// kernel: custom-call.55
= control target key start
LH: loop header
LB: loop body
LE: loop exit
PB: predicated region body
PF: predicated region fallthrough
CT: control target
= control target key end

     0   :  { %s1704_s30 = smov 0   ;;  %s1706_s10 = smov 0   ;;  %s2030_s0 = inlined_call_operand.vmem [shape: f32[2,2,2], index: 0, kind: input, shape index: {}]   ;;  %s2031_s1 = inlined_call_operand.vmem [shape: f32[2,2,2], index: 1, kind: input, shape index: {}]   ;;  %s2032_s2 = inlined_call_operand.vmem [shape: f32[2,2,2], index: 2, kind: input, shape index: {}]   ;;  %s2033_s3 = inlined_call_operand.vmem [shape: f32[2,2,2], index: 3, kind: input, shape index: {}]   ;;  %s2034_s4 = inlined_call_operand.vmem [shape: f32[2,2], index: 4, kind: output, shape index: {0}]   ;;  %s2035_s5 = inlined_call_operand.vmem [shape: f32[2,2], index: 5, kind: output, shape index: {1}]   ;;  %s2036_s6 = inlined_call_operand.vmem [shape: f32[2,2,2], index: 6, kind: output, shape index: {2}]   ;;  %s2037_s7 = inlined_call_operand.vmem [shape: f32[2,2,2], index: 7, kind: output, shape index: {3}]   ;;  %s2038_s8 = inlined_call_operand.vmem [shape: f32[2,2,2], index: 8, kind: output, shape index: {4}]   ;;  %s2039_s9 = inlined_call_operand.vmem [shape: f32[2,2,2], index: 9, kind: output, shape index: {5}]  }
   0x1   :  { %s1708_s11 = smov 0  }
   0x2 LB: > { %s1720_s12 = sadd.s32 4294967295, %s1641_s11   ;;  %s1723_s13 = sadd.s32 1, %s1641_s11   ;;  %s1641_s11 = sphi %s1708_s11, %s2058_s11   ;;  %s1637_s10 = sphi %s1706_s10, %s2057_s10   ;;  %s1633_s30 = sphi %s1704_s30, %s2056_s30  }
   0x3   : > { %s20_s14 = sshrl.u32 %s1641_s11, 3  ;;  %s21_s15 = sshrl.u32 %s1723_s13, 3 }
   0x4   : > { %s22_s16 = ssub.s32 %s20_s14, %s21_s15  ;;  %s25_s17 = sadd.s32 1, %s1637_s10 }
   0x5   : > { %p23_p0 = scmp.eq.s32.totalorder %s22_s16, 0  ;;  %p35_p1 = scmp.ne.s32.totalorder %s1637_s10, %s1633_s30 }
   0x6   : > { %p36_p2 = scmp.eq.s32.totalorder %s1720_s12, 1  ;;  %p1502_p4 = scmp.ge.s32.totalorder %s1641_s11, 2 }
   0x7   : > { %s1732_s18 = scalar_select %p23_p0, %s1637_s10, %s25_s17  }
   0x8   : > { %p1734_p3 = por %p36_p2, %p35_p1  ;;  %86 = sbr.rel (%p1502_p4) target bundleno = 17 (0x11), region = 16 }
   0x9   : > { %2040 = sst [smem:[#allocation33_spill]] %s1732_s18  ;;  %s88_s20 = sand.u32 (!%p1502_p4), 1, %s1641_s11  }
   0xa   : > { %s1504_s21 = sshll.u32 (!%p1502_p4), %s1641_s11, 1  ;;  %s1503_s22 = sshll.u32 (!%p1502_p4), %s88_s20, 1 }
   0xb   : > { %s92_s25 = scalar_lea.vmem (!%p1502_p4), %s2030_s0, %s1504_s21  ;;  %s90_s26 = scalar_lea.vmem (!%p1502_p4), [#allocation1], %s1503_s22 }
   0xc   : > { %v108_v0 = vld [vmem:[%s92_s25] sm:$0x3] (!%p1502_p4)  ;;  %s129_s29 = scalar_lea.vmem (!%p1502_p4), %s2031_s1, %s1504_s21  ;;  %s166_s16 = scalar_lea.vmem (!%p1502_p4), %s2032_s2, %s1504_s21 }
   0xd   : > { %109 = vst [vmem:[%s90_s26] sm:$0x3] (!%p1502_p4), %v108_v0  ;;  %v145_v1 = vld [vmem:[%s129_s29] sm:$0x3] (!%p1502_p4)  ;;  %s127_s17 = scalar_lea.vmem (!%p1502_p4), [#allocation3], %s1503_s22  ;;  %s203_s23 = scalar_lea.vmem (!%p1502_p4), %s2033_s3, %s1504_s21 }
   0xe   : > { %146 = vst [vmem:[%s127_s17] sm:$0x3] (!%p1502_p4), %v145_v1  ;;  %v182_v2 = vld [vmem:[%s166_s16] sm:$0x3] (!%p1502_p4)  ;;  %s164_s24 = scalar_lea.vmem (!%p1502_p4), [#allocation5], %s1503_s22  ;;  %s201_s25 = scalar_lea.vmem (!%p1502_p4), [#allocation7], %s1503_s22 }
   0xf   : > { %183 = vst [vmem:[%s164_s24] sm:$0x3] %v182_v2  ;;  %v219_v3 = vld [vmem:[%s203_s23] sm:$0x3] }
  0x10   : > { %220 = vst [vmem:[%s201_s25] sm:$0x3] %v219_v3 }
  0x11 PF: > { %p1511_p5 = scmp.ge.s32.totalorder %s1641_s11, 1  ;;  %p236_p6 = scmp.lt.s32.totalorder %s1641_s11, 3 }
  0x13   : > { %p237_p7 = pnand %p1511_p5, %p236_p6 }
  0x15   : > { %240 = sbr.rel (%p237_p7) target bundleno = 999 (0x3e7), region = 140 }
  0x1c   : > { %s259_s26 = sand.u32 1, %s1720_s12   ;;  %s277_s27 = sand.u32 1, %s1633_s30   ;;  %v337_v4 = vlaneseq  ;;  %v1651_v5 = vmov 0.0  }
  0x1d   : > { %s1757_s28 = sshll.u32 %s259_s26, 1  ;;  %s1759_s18 = sshll.u32 %s277_s27, 1  ;;  %332 = vst [vmem:[#allocation12] sm:$0xff] %v1651_v5  ;;  %333 = vst [vmem:[#allocation14] sm:$0xff] %v1651_v5 }
  0x1e   : > { %334 = vst [vmem:[#allocation16] sm:$0xff] %v1651_v5  ;;  %335 = vst [vmem:[#allocation18] sm:$0xff] %v1651_v5  ;;  %v1761_v6 = vand.u32 127, %v337_v4  ;;  %v1763_v7 = vshrl.u32 %v337_v4, 7  ;;  %s261_s11 = scalar_lea.vmem [#allocation1], %s1757_s28  ;;  %s265_s30 = scalar_lea.vmem [#allocation3], %s1757_s28 }
  0x1f   : > { %v304_v8 = vld [vmem:[%s261_s11] sm:$0x3]  ;;  %v308_v9 = vld [vmem:[%s265_s30] sm:$0x3]  ;;  %s269_s21 = scalar_lea.vmem [#allocation5], %s1757_s28  ;;  %s273_s22 = scalar_lea.vmem [#allocation7], %s1757_s28 }
  0x20   : > { %305 = vst [vmem:[#allocation0] sm:$0x3] %v304_v8  ;;  %309 = vst [vmem:[#allocation2] sm:$0x3] %v308_v9  ;;  %v312_v10 = vld [vmem:[%s269_s21] sm:$0x3]  ;;  %v339_v6 = vmov %v1761_v6  ;;  %v342_v7 = vmov %v1763_v7 }
  0x21   : > { %v316_v11 = vld [vmem:[%s273_s22] sm:$0x3]  ;;  %313 = vst [vmem:[#allocation4] sm:$0x3] %v312_v10  ;;  %v352_v6 = vmov %v1761_v6  ;;  %v355_v7 = vmov %v1763_v7  ;;  %s320_s29 = smov [#allocation20]  ;;  %s323_s14 = smov [#allocation21]  ;;  %vm346_vm0 = vcmp.eq.s32.totalorder %v342_v7, %v339_v6 }
  0x22   : > { %317 = vst [vmem:[#allocation6] sm:$0x3] %v316_v11  ;;  %vm359_vm1 = vcmp.eq.s32.totalorder %v355_v7, %v352_v6  ;;  %s336_s15 = smov [#allocation12]  ;;  %s349_s16 = smov [#allocation18]  ;;  %vm1391_vm2 = vcmp.lt.s32.totalorder %v1761_v6, 2  ;;  %v1383_v6 = vmov %v1761_v6  ;;  %v1386_v7 = vmov %v1763_v7 }
  0x23   : > { %s326_s17 = smov [#allocation22]  ;;  %s329_s20 = smov [#allocation23]  ;;  %vm1396_vm3 = vcmp.eq.s32.totalorder %v1386_v7, %v1383_v6  ;;  %v1434_v6 = vmov %v1761_v6  ;;  %v1403_v7 = vmov %v1763_v7 }
  0x24   : > { %v343_v12 = vld [vmem:[%s336_s15] sm:$0x3]  ;;  %s1387_s30 = smov [#allocation20]  ;;  %s1404_s21 = smov [#allocation21]  ;;  %v1400_v6 = vmov %v1761_v6  ;;  %v1437_v7 = vmov %v1763_v7 }
  0x25   : > { %v356_v13 = vld [vmem:[%s349_s16] sm:$0x3]  ;;  %v347_v16 = vsel %vm346_vm0, 1.0, %v343_v12  ;;  %s1421_s22 = smov [#allocation22]  ;;  %v1417_v6 = vmov %v1761_v6  ;;  %v1420_v7 = vmov %v1763_v7  ;;  %vm1447_vm4 = vcmp.eq.s32.totalorder %v1437_v7, %v1434_v6 }
  0x26   : > { %v360_v17 = vsel %vm359_vm1, 1.0, %v356_v13  ;;  %348 = vst [vmem:[%s336_s15] sm:$0x3] %v347_v16 }
  0x27   : > { %v321_v14 = vld [vmem:[#allocation0] sm:$0xff]  ;;  %v324_v15 = vld [vmem:[#allocation2] sm:$0xff]  ;;  %361 = vst [vmem:[%s349_s16] sm:$0x3] %v360_v17 }
  0x28   : > { %322 = vst [vmem:[%s320_s29] sm:$0xff] %v321_v14  ;;  %325 = vst [vmem:[%s323_s14] sm:$0xff] %v324_v15  ;;  %v327_v18 = vld [vmem:[#allocation4] sm:$0xff]  ;;  %s1438_s29 = smov [#allocation23] }
  0x29   : > { %v330_v19 = vld [vmem:[#allocation6] sm:$0xff]  ;;  %328 = vst [vmem:[%s326_s17] sm:$0xff] %v327_v18 }
  0x2a   : > { %331 = vst [vmem:[%s329_s20] sm:$0xff] %v330_v19 }
  0x2f   : > { %v1393_v20 = vld [vmem:[%s1387_s30] sm:$0x3] }
  0x30   : > { %v1410_v21 = vld [vmem:[%s1404_s21] sm:$0x3]  ;;  %v1394_v22 = vsel %vm1391_vm2, %v1393_v20, 0.0 }
  0x31   : > { %v1411_v23 = vsel %vm1391_vm2, %v1410_v21, 0.0  ;;  %v1427_v24 = vld [vmem:[%s1421_s22] sm:$0x3]  ;;  %v1395_v26 = vmul.f32 %v1394_v22, %v1394_v22 }
  0x32   : > { %v1444_v25 = vld [vmem:[%s1438_s29] sm:$0x3]  ;;  %v1412_v27 = vmul.f32 %v1411_v23, %v1411_v23  ;;  %v1428_v28 = vsel %vm1391_vm2, %v1427_v24, 0.0 }
  0x33   : > { %v1445_v29 = vsel %vm1391_vm2, %v1444_v25, 0.0  ;;  %v1429_v30 = vmul.f32 %v1428_v28, %v1428_v28  ;;  %v1397_v33 = vsel %vm1396_vm3, 0.0, %v1395_v26 }
  0x34   : > { %v1414_v31 = vadd.f32 %v1412_v27, %v1395_v26  ;;  %v1446_v32 = vmul.f32 %v1445_v29, %v1445_v29  ;;  %v1413_v34 = vadd.f32 %v1412_v27, %v1397_v33 }
  0x36   : > { %v1431_v35 = vadd.f32 %v1429_v30, %v1414_v31  ;;  %v1430_v36 = vadd.f32 %v1429_v30, %v1413_v34  ;;  %v1448_v37 = vsel %vm1447_vm4, 0.0, %v1446_v32 }
  0x38   : > { %v1450_v38 = vadd.f32 %v1446_v32, %v1431_v35  ;;  %v1449_v39 = vadd.f32 %v1448_v37, %v1430_v36 }
  0x3a   : > { %1451 = vadd.xlane.f32.xlu0 %v1450_v38 }
  0x3e   : > { %1459 = vadd.xlane.f32.xlu0 %v1449_v39 }
  0xc7   : > { %v1452_v40 = vpop.xlane.xlu0 %1451 }
  0xc8   : > { %v1453_v41 = vrot.slane %v1452_v40, 4 }
  0xca   : > { %v1454_v42 = vadd.f32 %v1453_v41, %v1452_v40 }
  0xcb   : > { %v1460_v43 = vpop.xlane.xlu0 %1459 }
  0xcc   : > { %v1455_v44 = vrot.slane %v1454_v42, 2  ;;  %v1461_v45 = vrot.slane %v1460_v43, 4 }
  0xce   : > { %v1462_v46 = vadd.f32 %v1461_v45, %v1460_v43  ;;  %v1456_v47 = vadd.f32 %v1455_v44, %v1454_v42 }
  0xd0   : > { %v1463_v48 = vrot.slane %v1462_v46, 2  ;;  %v1457_v50 = vrot.slane %v1456_v47, 1 }
  0xd2   : > { %v1464_v49 = vadd.f32 %v1463_v48, %v1462_v46  ;;  %v1458_v53 = vadd.f32 %v1457_v50, %v1456_v47 }
  0xd4   : > { %v1465_v51 = vrot.slane %v1464_v49, 1 }
  0xd6   : > { %v1466_v52 = vadd.f32 %v1465_v51, %v1464_v49 }
  0xd8   : > { %1552 = vpush %v1466_v52 }
  0xd9   : > { %1554 = vpush %v1458_v53 }
 0x109   : > { %s1553_s14 = spop %1552 }
 0x10a   : > { %s1555_s15 = spop %1554 }
 0x10b   : > { %s1469_s16 = smul.f32 1e-10, %s1555_s15 }
 0x10d   : > { %p1470_p8 = scmp.le.f32.partialorder %s1553_s14, %s1469_s16 }
 0x10e   : > { %s1797_s17 = smov (!%p1470_p8), 0  }
 0x10f   : > { %1473 = sbr.rel (%p1470_p8) target bundleno = 953 (0x3b9), region = 467 }
 0x116 LB: >> { %s1802_s20 = smov 0   ;;  %s1645_s17 = sphi %s1797_s17, %s2042_s17  }
 0x117 LB: >>> { %s466_s30 = smov [#allocation20]  ;;  %v470_v6 = vmov %v1761_v6  ;;  %v473_v7 = vmov %v1763_v7  ;;  %s486_s21 = smov [#allocation21]  ;;  %vm789_vm14 = vcmp.eq.s32.totalorder %v1763_v7, 0  ;;  %vm801_vm15 = vcmp.eq.s32.totalorder %v1763_v7, 1  ;;  %s1649_s20 = sphi %s1802_s20, %s465_s20  }
 0x118   : >>> { %v490_v6 = vmov %v1761_v6  ;;  %v493_v7 = vmov %v1763_v7  ;;  %v474_v54 = vld [vmem:[%s466_s30] sm:$0x3]  ;;  %vm477_vm5 = vcmp.eq.s32.totalorder %v473_v7, %v470_v6  ;;  %s506_s22 = smov [#allocation23]  ;;  %s467_s29 = smov [#allocation24] }
 0x119   : >>> { %vm497_vm6 = vcmp.eq.s32.totalorder %v493_v7, %v490_v6  ;;  %v510_v6 = vmov %v1761_v6  ;;  %v513_v7 = vmov %v1763_v7  ;;  %v478_v55 = vsel %vm477_vm5, %v474_v54, 0.0  ;;  %v494_v56 = vld [vmem:[%s486_s21] sm:$0x3]  ;;  %s487_s14 = smov [#allocation25]  ;;  %s507_s15 = smov [#allocation26] }
 0x11a   : >>> { %vm517_vm7 = vcmp.eq.s32.totalorder %v513_v7, %v510_v6  ;;  %v479_v57 = vrot.slane %v478_v55, 4  ;;  %v498_v58 = vsel %vm497_vm6, %v494_v56, 0.0  ;;  %v514_v59 = vld [vmem:[%s506_s22] sm:$0x3]  ;;  %s530_s16 = smov [#allocation25]  ;;  %s528_s30 = smov [#allocation24]  ;;  %v579_v6 = vmov %v1761_v6 }
 0x11b   : >>> { %v499_v60 = vrot.slane %v498_v58, 4  ;;  %v518_v61 = vsel %vm517_vm7, %v514_v59, 0.0  ;;  %s532_s21 = smov [#allocation26]  ;;  %s567_s22 = smov [#allocation27]  ;;  %v582_v7 = vmov %v1763_v7  ;;  %v594_v6 = vmov %v1761_v6 }
 0x11c   : >>> { %v480_v62 = vadd.f32 %v479_v57, %v478_v55  ;;  %v519_v63 = vrot.slane %v518_v61, 4  ;;  %v597_v7 = vmov %v1763_v7  ;;  %vm584_vm12 = vcmp.eq.s32.totalorder %v582_v7, %v579_v6  ;;  %s1821_s24 = smov [#allocation22]  ;;  %s1827_s23 = smov [#allocation14] }
 0x11d   : >>> { %v500_v0 = vadd.f32 %v499_v60, %v498_v58  ;;  %vm599_vm13 = vcmp.eq.s32.totalorder %v597_v7, %v594_v6  ;;  %s829_s11 = smov [#allocation31]  ;;  %s1833_s27 = smov [#allocation18]  ;;  %v615_v55 = vld [vmem:[%s1821_s24] sm:$0x3]  ;;  %v692_v6 = vmov %v1761_v6  ;;  %v695_v7 = vmov %v1763_v7 }
 0x11e   : >>> { %v481_v1 = vrot.slane %v480_v62, 2  ;;  %v520_v2 = vadd.f32 %v519_v63, %v518_v61  ;;  %v838_v58 = vld [vmem:[%s1827_s23] sm:$0x3]  ;;  %s607_s26 = smov [#allocation32]  ;;  %s831_s25 = smov [#allocation32]  ;;  %v706_v6 = vmov %v1761_v6  ;;  %v709_v7 = vmov %v1763_v7 }
 0x11f   : >>> { %v501_v3 = vrot.slane %v500_v0, 2  ;;  %v840_v61 = vld [vmem:[%s1833_s27] sm:$0x3]  ;;  %vm699_vm0 = vcmp.eq.s32.totalorder %v695_v7, %v692_v6  ;;  %v665_v6 = vmov %v1761_v6  ;;  %v668_v7 = vmov %v1763_v7  ;;  %s465_s20 = sadd.s32 1, %s1649_s20  }
 0x120   : >>> { %v482_v4 = vadd.f32 %v481_v1, %v480_v62  ;;  %v521_v5 = vrot.slane %v520_v2, 2  ;;  %v679_v6 = vmov %v1761_v6  ;;  %v682_v7 = vmov %v1763_v7  ;;  %p462_p9 = scmp.ge.s32.totalorder %s465_s20, 3  }
 0x121   : >>> { %v502_v8 = vadd.f32 %v501_v3, %v500_v0  ;;  %vm714_vm1 = vcmp.eq.s32.totalorder %v709_v7, %v706_v6  ;;  %vm673_vm3 = vcmp.eq.s32.totalorder %v668_v7, %v665_v6  ;;  %vm686_vm4 = vcmp.eq.s32.totalorder %v682_v7, %v679_v6 }
 0x122   : >>> { %v483_v9 = vrot.slane %v482_v4, 1  ;;  %v522_v10 = vadd.f32 %v521_v5, %v520_v2  ;;  %vm728_vm5 = vcmp.eq.s32.totalorder %v1761_v6, 0  ;;  %vm732_vm6 = vcmp.eq.s32.totalorder %v1761_v6, 1 }
 0x123   : >>> { %v503_v11 = vrot.slane %v502_v8, 1  ;;  %v366_v6 = vmov (%p462_p9), %v1761_v6  ;;  %v369_v7 = vmov (%p462_p9), %v1763_v7 }
 0x124   : >>> { %v484_v12 = vadd.f32 %v483_v9, %v482_v4  ;;  %v523_v13 = vrot.slane %v522_v10, 1  ;;  %v419_v6 = vmov (%p462_p9), %v1761_v6  ;;  %vm381_vm7 = vcmp.eq.s32.totalorder (%p462_p9), %v369_v7, %v366_v6 }
 0x125   : >>> { %v504_v14 = vadd.f32 %v503_v11, %v502_v8  ;;  %v422_v7 = vmov (%p462_p9), %v1763_v7  ;;  %v385_v6 = vmov (%p462_p9), %v1761_v6 }
 0x126   : >>> { %485 = vst [vmem:[%s467_s29] sm:$0x1] %v484_v12  ;;  %v524_v15 = vadd.f32 %v523_v13, %v522_v10  ;;  %s569_s29 = smov [#allocation28]  ;;  %v388_v7 = vmov (%p462_p9), %v1763_v7  ;;  %v402_v6 = vmov (%p462_p9), %v1761_v6 }
 0x127   : >>> { %505 = vst [vmem:[%s487_s14] sm:$0x1] %v504_v14  ;;  %s526_s14 = smov [#allocation29]  ;;  %v405_v7 = vmov (%p462_p9), %v1763_v7 }
 0x128   : >>> { %525 = vst [vmem:[%s507_s15] sm:$0x1] %v524_v15  ;;  %s527_s15 = smov [#allocation30]  ;;  %s571_s14 = smov %s526_s14 }
 0x129   : >>> { %s573_s15 = smov %s527_s15 }
 0x12d   : >>> { %v529_v18 = vld [vmem:[%s528_s30] sm:$0xff]  ;;  %s590_s30 = smov [#allocation30] }
 0x12e   : >>> { %v531_v16 = vld [vmem:[%s530_s16] sm:$0xff]  ;;  %v552_v31 = vand.u32 2147483647, %v529_v18  ;;  %s575_s16 = smov [#allocation29] }
 0x12f   : >>> { %v535_v17 = vmul.f32 2.0, %v531_v16  ;;  %v533_v19 = vld [vmem:[%s532_s21] sm:$0xff]  ;;  %v553_v36 = vand.u32 2147483647, %v531_v16  ;;  %s588_s21 = smov [#allocation31] }
 0x130   : >>> { %v534_v20 = vsub.f32 %v533_v19, %v529_v18  ;;  %v554_v32 = vand.u32 2147483647, %v533_v19 }
 0x131   : >>> { %1603 = vrcp.f32 %v535_v17 }
 0x132   : >>> { %v555_v35 = vmin.f32 %v552_v31, %v554_v32 }
 0x134   : >>> { %v556_v37 = vmul.f32 1.1920929e-08, %v555_v35 }
 0x136   : >>> { %vm557_vm11 = vcmp.le.f32.partialorder %v553_v36, %v556_v37 }
 0x13b   : >>> { %v1604_v21 = vpop.eup %1603 }
 0x13c   : >>> { %v537_v22 = vmul.f32 %v1604_v21, %v534_v20 }
 0x13e   : >>> { %v539_v23 = vmul.f32 %v537_v22, %v537_v22  ;;  %vm538_vm10 = vcmp.ge.f32.partialorder %v537_v22, 0.0 }
 0x140   : >>> { %v540_v24 = vadd.f32 1.0, %v539_v23 }
 0x142   : >>> { %1605 = vrsqrt.f32 %v540_v24  ;;  %vm543_vm8 = vcmp.eq.f32.partialorder %v540_v24, inf  ;;  %v546_v26 = vand.u32 2147483648, %v540_v24  ;;  %vm545_vm9 = vcmp.eq.f32.partialorder %v540_v24, 0.0 }
 0x14c   : >>> { %v1606_v25 = vpop.eup %1605 }
 0x14d   : >>> { %v542_v27 = vmul.f32 %v1606_v25, %v540_v24 }
 0x14f   : >>> { %v544_v28 = vsel %vm543_vm8, %v540_v24, %v542_v27  ;;  %vm434_vm8 = vcmp.eq.s32.totalorder (%p462_p9), %v422_v7, %v419_v6 }
 0x150   : >>> { %v547_v29 = vsel %vm545_vm9, %v546_v26, %v544_v28 }
 0x151   : >>> { %v548_v30 = vxor.u32 2147483648, %v547_v29 }
 0x153   : >>> { %v549_v33 = vsel %vm538_vm10, %v547_v29, %v548_v30 }
 0x154   : >>> { %v550_v34 = vadd.f32 %v549_v33, %v537_v22 }
 0x156   : >>> { %1607 = vrcp.f32 %v550_v34 }
 0x160   : >>> { %v1608_v38 = vpop.eup %1607 }
 0x161   : >>> { %v558_v39 = vsel %vm557_vm11, 0.0, %v1608_v38 }
 0x162   : >>> { %v559_v40 = vmul.f32 %v558_v39, %v558_v39  ;;  %v563_v41 = vmul.f32 %v558_v39, %v531_v16 }
 0x164   : >>> { %v560_v42 = vadd.f32 1.0, %v559_v40  ;;  %v564_v43 = vsub.f32 %v529_v18, %v563_v41  ;;  %v566_v44 = vadd.f32 %v563_v41, %v533_v19 }
 0x166   : >>> { %1609 = vrsqrt.f32 %v560_v42  ;;  %568 = vst [vmem:[%s567_s22] sm:$0xff] %v564_v43  ;;  %570 = vst [vmem:[%s569_s29] sm:$0xff] %v566_v44  ;;  %s605_s22 = smov [#allocation31]  ;;  %s1817_s29 = smov [#allocation20] }
 0x167   : >>> { %v613_v53 = vld [vmem:[%s1817_s29] sm:$0x3] }
 0x170   : >>> { %v1610_v45 = vpop.eup %1609 }
 0x171   : >>> { %572 = vst [vmem:[%s571_s14] sm:$0xff] %v1610_v45  ;;  %v562_v46 = vmul.f32 %v1610_v45, %v558_v39  ;;  %s603_s14 = smov [#allocation32] }
 0x173   : >>> { %574 = vst [vmem:[%s573_s15] sm:$0xff] %v562_v46  ;;  %s1819_s15 = smov [#allocation21] }
 0x174   : >>> { %v614_v54 = vld [vmem:[%s1819_s15] sm:$0x3] }
 0x178   : >>> { %v576_v47 = vld [vmem:[%s575_s16] ss:$0 sm:$0xff]  ;;  %s1823_s16 = smov [#allocation23] }
 0x179   : >>> { %v585_v48 = vsel %vm584_vm12, %v576_v47, 0.0  ;;  %v616_v56 = vld [vmem:[%s1823_s16] sm:$0x3] }
 0x17a   : >>> { %586 = vadd.xlane.f32.xlu0 %v585_v48  ;;  %v591_v49 = vld [vmem:[%s590_s30] ss:$0 sm:$0xff]  ;;  %s1825_s30 = smov [#allocation12] }
 0x17b   : >>> { %v600_v50 = vsel %vm599_vm13, %v591_v49, 0.0  ;;  %v837_v57 = vld [vmem:[%s1825_s30] sm:$0x3] }
 0x17e   : >>> { %601 = vadd.xlane.f32.xlu0 %v600_v50 }
 0x207   : >>> { %v587_v51 = vpop.xlane.xlu0 %586 }
 0x208   : >>> { %589 = vst [vmem:[%s588_s21] sm:$0xff] %v587_v51  ;;  %s1829_s21 = smov [#allocation16] }
 0x209   : >>> { %v839_v59 = vld [vmem:[%s1829_s21] sm:$0x3] }
 0x20b   : >>> { %v602_v52 = vpop.xlane.xlu0 %601 }
 0x20c   : >>> { %604 = vst [vmem:[%s603_s14] sm:$0xff] %v602_v52  ;;  %s1853_s14 = smov [#allocation23] }
 0x20f   : >>> { %v606_v60 = vld [vmem:[%s605_s22] sm:$0xff]  ;;  %s1851_s22 = smov [#allocation22] }
 0x210   : >>> { %v830_v62 = vld [vmem:[%s829_s11] sm:$0xff]  ;;  %v617_v63 = vmul.f32 %v613_v53, %v606_v60  ;;  %v620_v0 = vmul.f32 %v614_v54, %v606_v60  ;;  %v624_v1 = vmul.f32 %v615_v55, %v606_v60  ;;  %v627_v2 = vmul.f32 %v616_v56, %v606_v60  ;;  %s1849_s11 = smov [#allocation12] }
 0x211   : >>> { %v841_v3 = vmul.f32 %v837_v57, %v830_v62  ;;  %v844_v4 = vmul.f32 %v838_v58, %v830_v62  ;;  %v848_v5 = vmul.f32 %v839_v59, %v830_v62  ;;  %v851_v8 = vmul.f32 %v840_v61, %v830_v62 }
 0x213   : >>> { %v608_v9 = vld [vmem:[%s607_s26] sm:$0xff]  ;;  %s635_s26 = smov [#allocation30] }
 0x214   : >>> { %v832_v10 = vld [vmem:[%s831_s25] sm:$0xff]  ;;  %v618_v11 = vmul.f32 %v615_v55, %v608_v9  ;;  %v621_v12 = vmul.f32 %v616_v56, %v608_v9  ;;  %v623_v13 = vmul.f32 %v613_v53, %v608_v9  ;;  %v626_v14 = vmul.f32 %v614_v54, %v608_v9  ;;  %s633_s25 = smov [#allocation29] }
 0x215   : >>> { %v842_v15 = vmul.f32 %v839_v59, %v832_v10  ;;  %v845_v16 = vmul.f32 %v840_v61, %v832_v10  ;;  %v847_v17 = vmul.f32 %v837_v57, %v832_v10  ;;  %v850_v18 = vmul.f32 %v838_v58, %v832_v10  ;;  %v634_v27 = vld [vmem:[%s633_s25] ss:$0 sm:$0xff]  ;;  %s662_s25 = smov [#allocation27] }
 0x216   : >>> { %v619_v19 = vsub.f32 %v617_v63, %v618_v11  ;;  %v622_v20 = vsub.f32 %v620_v0, %v621_v12  ;;  %v625_v21 = vadd.f32 %v624_v1, %v623_v13  ;;  %v628_v22 = vadd.f32 %v627_v2, %v626_v14  ;;  %v636_v28 = vld [vmem:[%s635_s26] ss:$0 sm:$0xff]  ;;  %s661_s26 = smov [#allocation20] }
 0x217   : >>> { %v843_v23 = vsub.f32 %v841_v3, %v842_v15  ;;  %v846_v24 = vsub.f32 %v844_v4, %v845_v16  ;;  %v849_v25 = vadd.f32 %v848_v5, %v847_v17  ;;  %v852_v26 = vadd.f32 %v851_v8, %v850_v18  ;;  %v669_v63 = vld [vmem:[%s662_s25] ss:$0 sm:$0xff]  ;;  %s905_s25 = sadd.s32 (%p462_p9), 1, %s1645_s17  }
 0x218   : >>> { %630 = vst [vmem:[%s1819_s15] sm:$0x3] %v622_v20  ;;  %632 = vst [vmem:[%s1823_s16] sm:$0x3] %v628_v22  ;;  %s1855_s15 = smov [#allocation20]  ;;  %s703_s16 = smov [#allocation28] }
 0x219   : >>> { %629 = vst [vmem:[%s1817_s29] sm:$0x3] %v619_v19  ;;  %631 = vst [vmem:[%s1821_s24] sm:$0x3] %v625_v21  ;;  %s1857_s24 = smov [#allocation16]  ;;  %s1865_s29 = smov [#allocation21]  ;;  %v710_v59 = vld [vmem:[%s703_s16] ss:$0 sm:$0xff] }
 0x21a   : >>> { %853 = vst [vmem:[%s1825_s30] sm:$0x3] %v843_v23  ;;  %854 = vst [vmem:[%s1827_s23] sm:$0x3] %v846_v24  ;;  %s1859_s23 = smov [#allocation14]  ;;  %s689_s30 = smov [#allocation22] }
 0x21b   : >>> { %855 = vst [vmem:[%s1829_s21] sm:$0x3] %v849_v25  ;;  %856 = vst [vmem:[%s1833_s27] sm:$0x3] %v852_v26  ;;  %s1863_s27 = smov [#allocation18]  ;;  %s702_s21 = smov [#allocation23] }
 0x21c   : >>> { %s805_s16 = smov [#allocation21]  ;;  %p458_p10 = scmp.ge.s32.totalorder (%p462_p9), %s905_s25, 15 }
 0x21d   : >> { %s2042_s17 = smov (%p462_p9), %s905_s25 }
 0x21f   : >>> { %v644_v30 = vld [vmem:[%s1853_s14] sm:$0x3] }
 0x220   : >>> { %v643_v29 = vld [vmem:[%s1851_s22] sm:$0x3]  ;;  %v652_v36 = vmul.f32 %v644_v30, %v636_v28  ;;  %v655_v42 = vmul.f32 %v644_v30, %v634_v27 }
 0x221   : >>> { %v641_v31 = vld [vmem:[%s1855_s15] sm:$0x3]  ;;  %v651_v35 = vmul.f32 %v643_v29, %v634_v27  ;;  %v654_v37 = vmul.f32 %v643_v29, %v636_v28 }
 0x222   : >>> { %v859_v32 = vld [vmem:[%s1849_s11] ss:$0 sm:$0xff]  ;;  %v1531_v34 = vld [vmem:[%s1849_s11 + $0x1] ss:$0 sm:$0xff]  ;;  %v645_v48 = vmul.f32 %v641_v31, %v634_v27  ;;  %v648_v49 = vmul.f32 %v641_v31, %v636_v28 }
 0x223   : >>> { %v1530_v33 = vld [vmem:[%s1849_s11 - $0x1] sm:$0x2]  ;;  %v1533_v40 = vld [vmem:[%s1857_s24 + $0x1] sm:$0x1]  ;;  %v653_v47 = vsub.f32 %v651_v35, %v652_v36  ;;  %v656_v53 = vadd.f32 %v655_v42, %v654_v37 }
 0x224   : >>> { %v866_v38 = vsel %vm789_vm14, %v859_v32, %v1530_v33  ;;  %v870_v39 = vld [vmem:[%s1857_s24] ss:$0 sm:$0xff]  ;;  %v878_v43 = vsel %vm801_vm15, %v1531_v34, %v1533_v40  ;;  %v1535_v45 = vld [vmem:[%s1859_s23 + $0x1] ss:$0 sm:$0xff] }
 0x225   : >>> { %v883_v41 = vld [vmem:[%s1859_s23] ss:$0 sm:$0xff]  ;;  %869 = vst [vmem:[%s1849_s11] sm:$0x3] %v866_v38  ;;  %880 = vst [vmem:[%s1857_s24] sm:$0x3] %v878_v43  ;;  %v1537_v51 = vld [vmem:[%s1863_s27 + $0x1] sm:$0x1] }
 0x226   : >>> { %v1534_v44 = vld [vmem:[%s1859_s23 - $0x1] sm:$0x2]  ;;  %1532 = vst [vmem:[%s1849_s11 + $0x1] sm:$0x1] %v870_v39  ;;  %v902_v54 = vsel %vm801_vm15, %v1535_v45, %v1537_v51  ;;  %659 = vst [vmem:[%s1851_s22] sm:$0x3] %v653_v47  ;;  %s676_s11 = smov [#allocation21] }
 0x227   : >>> { %v894_v46 = vld [vmem:[%s1863_s27] ss:$0 sm:$0xff]  ;;  %v890_v50 = vsel %vm789_vm14, %v883_v41, %v1534_v44  ;;  %660 = vst [vmem:[%s1853_s14] sm:$0x3] %v656_v53  ;;  %s1907_s22 = smov [#allocation22]  ;;  %s1652_s14 = smov 1  }
 0x228   : >>> { %v642_v52 = vld [vmem:[%s1865_s29] sm:$0x3]  ;;  %893 = vst [vmem:[%s1859_s23] sm:$0x3] %v890_v50  ;;  %904 = vst [vmem:[%s1863_s27] sm:$0x3] %v902_v54  ;;  %s718_s24 = smov [#allocation21]  ;;  %s1910_s27 = smov [#allocation23] }
 0x229   : >>> { %v646_v55 = vmul.f32 %v642_v52, %v636_v28  ;;  %v649_v56 = vmul.f32 %v642_v52, %v634_v27  ;;  %1536 = vst [vmem:[%s1859_s23 + $0x1] sm:$0x1] %v894_v46  ;;  %s1653_s23 = smov 127  }
 0x22b   : >>> { %v647_v57 = vsub.f32 %v645_v48, %v646_v55  ;;  %v650_v58 = vadd.f32 %v649_v56, %v648_v49 }
 0x22d   : >>> { %657 = vst [vmem:[%s1855_s15] sm:$0x3] %v647_v57  ;;  %658 = vst [vmem:[%s1865_s29] sm:$0x3] %v650_v58  ;;  %v696_v60 = vld [vmem:[%s689_s30] sm:$0x3]  ;;  %s717_s15 = smov [#allocation20]  ;;  %s781_s29 = smov [#allocation20] }
 0x22e   : >>> { %v700_v61 = vsel %vm699_vm0, 0.0, %v696_v60  ;;  %v711_v62 = vld [vmem:[%s702_s21] sm:$0x3] }
 0x22f   : >>> { %701 = vst [vmem:[%s689_s30] sm:$0x3] %v700_v61  ;;  %v715_v0 = vsel %vm714_vm1, %v710_v59, %v711_v62  ;;  %s782_s30 = smov [#allocation22] }
 0x230   : >>> { %716 = vst [vmem:[%s702_s21] sm:$0x3] %v715_v0  ;;  %s806_s21 = smov [#allocation23] }
 0x234   : >>> { %v670_v1 = vld [vmem:[%s661_s26] sm:$0x3] }
 0x235   : >>> { %v683_v2 = vld [vmem:[%s676_s11] sm:$0x3]  ;;  %v674_v3 = vsel %vm673_vm3, %v669_v63, %v670_v1 }
 0x236   : >>> { %v687_v4 = vsel %vm686_vm4, 0.0, %v683_v2  ;;  %675 = vst [vmem:[%s661_s26] sm:$0x3] %v674_v3  ;;  %v755_v5 = vld [vmem:[%s1907_s22] sm:$0x3]  ;;  %s370_s26 = smov (%p462_p9), [#allocation20] }
 0x237   : >>> { %688 = vst [vmem:[%s676_s11] sm:$0x3] %v687_v4  ;;  %756 = vrot.lane.b32.xlu0 %v755_v5, %s1652_s14  ;;  %v751_v11 = vld [vmem:[%s1910_s27] sm:$0x3]  ;;  %s389_s11 = smov (%p462_p9), [#allocation21] }
 0x238   : >>> { %v772_v12 = vld [vmem:[%s1910_s27] sm:$0x3] }
 0x239   : >>> { %v754_v30 = vld [vmem:[%s1907_s22] sm:$0x3] }
 0x23d   : >>> { %v723_v8 = vld [vmem:[%s717_s15] sm:$0x3] }
 0x23e   : >>> { %724 = vrot.lane.b32.xlu1 %v723_v8, %s1652_s14  ;;  %v719_v9 = vld [vmem:[%s718_s24] sm:$0x3] }
 0x23f   : >>> { %v740_v10 = vld [vmem:[%s718_s24] sm:$0x3] }
 0x240   : >>> { %v722_v18 = vld [vmem:[%s717_s15] sm:$0x3] }
 0x242   : >>> { %720 = vrot.lane.b32.xlu1 %v719_v9, %s1652_s14 }
 0x246   : >>> { %741 = vrot.lane.b32.xlu1 %v740_v10, %s1653_s23 }
 0x24a   : >>> { %752 = vrot.lane.b32.xlu1 %v751_v11, %s1652_s14  ;;  %s423_s14 = smov (%p462_p9), [#allocation23] }
 0x24e   : >>> { %773 = vrot.lane.b32.xlu1 %v772_v12, %s1653_s23 }
 0x2a9   : >>> { %v757_v20 = vpop.permute.xlu0 %756 }
 0x2aa   : >>> { %v761_v22 = vsel %vm728_vm5, %v755_v5, %v757_v20 }
 0x2b0   : >>> { %v725_v13 = vpop.permute.xlu1 %724 }
 0x2b1   : >>> { %v729_v14 = vsel %vm728_vm5, %v723_v8, %v725_v13 }
 0x2b4   : >>> { %v721_v15 = vpop.permute.xlu1 %720 }
 0x2b5   : >>> { %v733_v16 = vsel %vm732_vm6, %v721_v15, %v729_v14 }
 0x2b6   : >>> { %v739_v17 = vsel %vm1391_vm2, %v733_v16, 0.0 }
 0x2b7   : >>> { %747 = vst [vmem:[%s717_s15] sm:$0x3] %v739_v17 }
 0x2b8   : >>> { %v742_v19 = vpop.permute.xlu1 %741 }
 0x2b9   : >>> { %v746_v21 = vsel %vm732_vm6, %v722_v18, %v742_v19 }
 0x2ba   : >>> { %748 = vst [vmem:[%s718_s24] sm:$0x3] %v746_v21 }
 0x2bc   : >>> { %v753_v23 = vpop.permute.xlu1 %752 }
 0x2bd   : >>> { %v765_v24 = vsel %vm732_vm6, %v753_v23, %v761_v22 }
 0x2be   : >>> { %v783_v25 = vld [vmem:[%s781_s29] ss:$0 sm:$0xff]  ;;  %v1523_v27 = vld [vmem:[%s781_s29 + $0x1] ss:$0 sm:$0xff]  ;;  %v771_v29 = vsel %vm1391_vm2, %v765_v24, 0.0 }
 0x2bf   : >>> { %v1522_v26 = vld [vmem:[%s781_s29 - $0x1] sm:$0x2]  ;;  %779 = vst [vmem:[%s1907_s22] sm:$0x3] %v771_v29  ;;  %s406_s22 = smov (%p462_p9), [#allocation22] }
 0x2c0   : >>> { %v790_v28 = vsel %vm789_vm14, %v783_v25, %v1522_v26  ;;  %v774_v31 = vpop.permute.xlu1 %773 }
 0x2c1   : >>> { %793 = vst [vmem:[%s781_s29] sm:$0x3] %v790_v28  ;;  %v807_v32 = vld [vmem:[%s805_s16] ss:$0 sm:$0xff]  ;;  %v1527_v34 = vld [vmem:[%s805_s16 + $0x1] ss:$0 sm:$0xff]  ;;  %v778_v35 = vsel %vm732_vm6, %v754_v30, %v774_v31 }
 0x2c2   : >>> { %v1526_v33 = vld [vmem:[%s805_s16 - $0x1] sm:$0x2]  ;;  %780 = vst [vmem:[%s1910_s27] sm:$0x3] %v778_v35 }
 0x2c3   : >>> { %v814_v36 = vsel %vm789_vm14, %v807_v32, %v1526_v33 }
 0x2c4   : >>> { %817 = vst [vmem:[%s805_s16] sm:$0x3] %v814_v36 }
 0x2c6   : >>> { %v794_v37 = vld [vmem:[%s782_s30] ss:$0 sm:$0xff]  ;;  %v1525_v38 = vld [vmem:[%s782_s30 + $0x1] sm:$0x1] }
 0x2c7   : >>> { %1524 = vst [vmem:[%s781_s29 + $0x1] sm:$0x1] %v794_v37  ;;  %v802_v39 = vsel %vm801_vm15, %v1523_v27, %v1525_v38  ;;  %464 = sbr.rel (!%p462_p9) target bundleno = 279 (0x117), region = 462 }
 0x2c8   : >>> { %804 = vst [vmem:[%s782_s30] sm:$0x3] %v802_v39 }
 0x2c9   : >>> { %v818_v40 = vld [vmem:[%s806_s21] ss:$0 sm:$0xff]  ;;  %v1529_v41 = vld [vmem:[%s806_s21 + $0x1] sm:$0x1] }
 0x2ca   : >>> { %1528 = vst [vmem:[%s805_s16 + $0x1] sm:$0x1] %v818_v40  ;;  %v826_v42 = vsel %vm801_vm15, %v1527_v34, %v1529_v41 }
 0x2cb   : >>> { %828 = vst [vmem:[%s806_s21] sm:$0x3] %v826_v42 }
 0x2ce   : >> { %v376_v43 = vld [vmem:[%s370_s26] sm:$0x3] }
 0x2cf   : >> { %v377_v45 = vsel %vm1391_vm2, %v376_v43, 0.0  ;;  %v412_v47 = vld [vmem:[%s406_s22] sm:$0x3] }
 0x2d0   : >> { %v378_v49 = vmul.f32 %v377_v45, %v377_v45  ;;  %v413_v51 = vsel %vm1391_vm2, %v412_v47, 0.0 }
 0x2d1   : >> { %v395_v44 = vld [vmem:[%s389_s11] sm:$0x3]  ;;  %v414_v53 = vmul.f32 %v413_v51, %v413_v51 }
 0x2d2   : >> { %v396_v46 = vsel %vm1391_vm2, %v395_v44, 0.0  ;;  %v429_v48 = vld [vmem:[%s423_s14] sm:$0x3]  ;;  %v382_v56 = vsel %vm381_vm7, 0.0, %v378_v49 }
 0x2d3   : >> { %v397_v50 = vmul.f32 %v396_v46, %v396_v46  ;;  %v430_v52 = vsel %vm1391_vm2, %v429_v48, 0.0 }
 0x2d4   : >> { %v431_v55 = vmul.f32 %v430_v52, %v430_v52 }
 0x2d5   : >> { %v399_v54 = vadd.f32 %v397_v50, %v378_v49  ;;  %v398_v57 = vadd.f32 %v397_v50, %v382_v56 }
 0x2d6   : >> { %v435_v60 = vsel %vm434_vm8, 0.0, %v431_v55 }
 0x2d7   : >> { %v416_v58 = vadd.f32 %v414_v53, %v399_v54  ;;  %v415_v59 = vadd.f32 %v414_v53, %v398_v57 }
 0x2d9   : >> { %v437_v61 = vadd.f32 %v431_v55, %v416_v58  ;;  %v436_v62 = vadd.f32 %v435_v60, %v415_v59 }
 0x2db   : >> { %438 = vadd.xlane.f32.xlu0 %v437_v61 }
 0x2df   : >> { %446 = vadd.xlane.f32.xlu0 %v436_v62 }
 0x368   : >> { %v439_v63 = vpop.xlane.xlu0 %438 }
 0x369   : >> { %v440_v0 = vrot.slane %v439_v63, 4 }
 0x36b   : >> { %v441_v1 = vadd.f32 %v440_v0, %v439_v63 }
 0x36c   : >> { %v447_v2 = vpop.xlane.xlu0 %446 }
 0x36d   : >> { %v442_v3 = vrot.slane %v441_v1, 2  ;;  %v448_v4 = vrot.slane %v447_v2, 4 }
 0x36f   : >> { %v449_v5 = vadd.f32 %v448_v4, %v447_v2  ;;  %v443_v8 = vadd.f32 %v442_v3, %v441_v1 }
 0x371   : >> { %v450_v9 = vrot.slane %v449_v5, 2  ;;  %v444_v11 = vrot.slane %v443_v8, 1 }
 0x373   : >> { %v451_v10 = vadd.f32 %v450_v9, %v449_v5  ;;  %v445_v14 = vadd.f32 %v444_v11, %v443_v8 }
 0x375   : >> { %v452_v12 = vrot.slane %v451_v10, 1 }
 0x377   : >> { %v453_v13 = vadd.f32 %v452_v12, %v451_v10 }
 0x379   : >> { %1556 = vpush %v453_v13 }
 0x37a   : >> { %1558 = vpush %v445_v14 }
 0x3aa   : >> { %s1557_s20 = spop %1556 }
 0x3ab   : >> { %s1559_s15 = spop %1558 }
 0x3ac   : >> { %s456_s24 = smul.f32 1e-10, %s1559_s15 }
 0x3ae   : >> { %p457_p11 = scmp.le.f32.partialorder %s1557_s20, %s456_s24 }
 0x3b0   : >> { %p459_p12 = por %p458_p10, %p457_p11 }
 0x3b2   : > { %907 = sbr.rel (!%p459_p12) target bundleno = 278 (0x116), region = 473 }
 0x3b9 PF: > { %s912_s23 = smov [#allocation20]  ;;  %v916_v6 = vmov %v1761_v6  ;;  %v919_v7 = vmov %v1763_v7  ;;  %v967_v15 = vld [vmem:[#allocation12] sm:$0x3]  ;;  %v973_v16 = vld [vmem:[#allocation14] sm:$0x3]  ;;  %s2043_s17 = scalar_lea.vmem [#allocation13], %s1757_s28 }
 0x3ba   : > { %v936_v6 = vmov %v1761_v6  ;;  %v939_v7 = vmov %v1763_v7  ;;  %v920_v17 = vld [vmem:[%s912_s23] sm:$0x3]  ;;  %vm923_vm9 = vcmp.eq.s32.totalorder %v919_v7, %v916_v6  ;;  %969 = vst [vmem:[%s2043_s17] sm:$0x3] %v967_v15  ;;  %s2044_s27 = scalar_lea.vmem [#allocation15], %s1757_s28  ;;  %s932_s29 = smov [#allocation23] }
 0x3bb   : > { %vm943_vm10 = vcmp.eq.s32.totalorder %v939_v7, %v936_v6  ;;  %975 = vst [vmem:[%s2044_s27] sm:$0x3] %v973_v16  ;;  %v979_v18 = vld [vmem:[#allocation16] sm:$0x3]  ;;  %v924_v19 = vsel %vm923_vm9, %v920_v17, 0.0  ;;  %s2045_s16 = scalar_lea.vmem [#allocation17], %s1757_s28  ;;  %s2046_s30 = scalar_lea.vmem [#allocation19], %s1757_s28 }
 0x3bc   : > { %981 = vst [vmem:[%s2045_s16] sm:$0x3] %v979_v18  ;;  %v985_v20 = vld [vmem:[#allocation18] sm:$0x3]  ;;  %v925_v21 = vrot.slane %v924_v19, 4  ;;  %v940_v22 = vld [vmem:[%s932_s29] sm:$0x3] }
 0x3bd   : > { %987 = vst [vmem:[%s2046_s30] sm:$0x3] %v985_v20  ;;  %v944_v23 = vsel %vm943_vm10, %v940_v22, 0.0  ;;  %s908_s21 = sand.u32 7, %s1720_s12   ;;  %s2047_s11 = scalar_lea.vmem [#allocation9], %s1759_s18 }
 0x3be   : > { %v926_v24 = vadd.f32 %v925_v21, %v924_v19  ;;  %v945_v25 = vrot.slane %v944_v23, 4  ;;  %s909_s25 = scalar_lea.vmem [#allocation8], %s908_s21  ;;  %s911_s26 = scalar_lea.vmem [#allocation10], %s908_s21 }
 0x3bf   : > { %s913_s25 = smov %s909_s25  ;;  %s933_s26 = smov %s911_s26 }
 0x3c0   : > { %v927_v26 = vrot.slane %v926_v24, 2  ;;  %v946_v6 = vadd.f32 %v945_v25, %v944_v23  ;;  %s2048_s22 = scalar_lea.vmem [#allocation11], %s1759_s18  ;;  %s1015_s14 = sshrl.u32 (%p1734_p3), %s1720_s12, 3 }
 0x3c1   : > { %s2049_s20 = scalar_lea.vmem (%p1734_p3), [#allocation9], %s1759_s18  ;;  %s1544_s15 = sshll.u32 (%p1734_p3), %s1015_s14, 1 }
 0x3c2   : > { %v928_v7 = vadd.f32 %v927_v26, %v926_v24  ;;  %v947_v27 = vrot.slane %v946_v6, 2  ;;  %s1017_s17 = scalar_lea.vmem (%p1734_p3), %s2034_s4, %s1544_s15 }
 0x3c4   : > { %v929_v28 = vrot.slane %v928_v7, 1  ;;  %v948_v29 = vadd.f32 %v947_v27, %v946_v6 }
 0x3c6   : > { %v930_v30 = vadd.f32 %v929_v28, %v928_v7  ;;  %v949_v31 = vrot.slane %v948_v29, 1 }
 0x3c8   : > { %931 = vst [vmem:[%s913_s25] sm:$0x1] %v930_v30  ;;  %v950_v32 = vadd.f32 %v949_v31, %v948_v29 }
 0x3ca   : > { %951 = vst [vmem:[%s933_s26] sm:$0x1] %v950_v32 }
 0x3cc   : > { %1014 = sbr.rel (!%p1734_p3) target bundleno = 985 (0x3d9), region = 158 }
 0x3cf   : > { %v955_v33 = vld [vmem:[#allocation8] sm:$0x3] }
 0x3d0   : > { %957 = vst [vmem:[%s2047_s11] sm:$0x3] %v955_v33 }
 0x3d1   : > { %v961_v34 = vld [vmem:[#allocation10] sm:$0x3] }
 0x3d2   : > { %963 = vst [vmem:[%s2048_s22] sm:$0x3] %v961_v34 }
 0x3d7   : > { %v1033_v35 = vld [vmem:[%s2049_s20] sm:$0x3] }
 0x3d8   : > { %1034 = vst [vmem:[%s1017_s17] sm:$0x3] %v1033_v35 }
 0x3d9 PF: > { %1051 = sbr.rel (!%p1734_p3) target bundleno = 993 (0x3e1), region = 192  ;;  %s1052_s27 = sshrl.u32 (%p1734_p3), %s1720_s12, 3 }
 0x3da   : > { %s2050_s29 = scalar_lea.vmem (%p1734_p3), [#allocation11], %s1759_s18  ;;  %s1545_s16 = sshll.u32 (%p1734_p3), %s1052_s27, 1 }
 0x3db   : > { %s1054_s25 = scalar_lea.vmem (%p1734_p3), %s2035_s5, %s1545_s16 }
 0x3df   : > { %v1070_v36 = vld [vmem:[%s2050_s29] sm:$0x3] (%p1734_p3) }
 0x3e0   : > { %1071 = vst [vmem:[%s1054_s25] sm:$0x3] %v1070_v36 }
 0x3e1 PF: > { %s1546_s26 = sshll.u32 %s1720_s12, 1  ;;  %s2051_s19 = scalar_lea.vmem [#allocation13], %s1757_s28 }
 0x3e2   : > { %v1103_v37 = vld [vmem:[%s2051_s19] sm:$0x3]  ;;  %s2052_s11 = scalar_lea.vmem [#allocation15], %s1757_s28  ;;  %s1087_s14 = scalar_lea.vmem %s2036_s6, %s1546_s26 }
 0x3e3   : > { %v1136_v38 = vld [vmem:[%s2052_s11] sm:$0x3]  ;;  %s1120_s24 = scalar_lea.vmem %s2037_s7, %s1546_s26  ;;  %s2053_s23 = scalar_lea.vmem [#allocation17], %s1757_s28  ;;  %1104 = vst [vmem:[%s1087_s14] sm:$0x3] %v1103_v37 }
 0x3e4   : > { %v1169_v39 = vld [vmem:[%s2053_s23] sm:$0x3]  ;;  %s2054_s17 = scalar_lea.vmem [#allocation19], %s1757_s28  ;;  %1137 = vst [vmem:[%s1120_s24] sm:$0x3] %v1136_v38  ;;  %s1153_s29 = scalar_lea.vmem %s2038_s8, %s1546_s26 }
 0x3e5   : > { %v1202_v40 = vld [vmem:[%s2054_s17] sm:$0x3]  ;;  %s1186_s21 = scalar_lea.vmem %s2039_s9, %s1546_s26  ;;  %1170 = vst [vmem:[%s1153_s29] sm:$0x3] %v1169_v39 }
 0x3e6   : > { %1203 = vst [vmem:[%s1186_s21] sm:$0x3] %v1202_v40 }
 0x3e7 PF: > { %s2055_s25 = sld [smem:[#allocation33_spill]]  ;;  %p13_p13 = scmp.ge.s32.totalorder %s1723_s13, 4  }
 0x3e8   : > { %s2056_s30 = smov %s1637_s10  ;;  %s2058_s11 = smov %s1723_s13 }
 0x3e9   :  { %15 = sbr.rel (!%p13_p13) target bundleno = 2 (0x2), region = 484 }
 0x3ed   : > { %s2057_s10 = smov %s2055_s25 }

// kernel: reverse.1
= control target key start
LH: loop header
LB: loop body
LE: loop exit
PB: predicated region body
PF: predicated region fallthrough
CT: control target
= control target key end

     0   :  { %v55_v2 = vld [vmem:[#allocation1 + $0x8] sm:$0xf]  ;;  %v62_v3 = vld [vmem:[#allocation1] sm:$0xf]  ;;  %v72_v6 = vlaneseq  ;;  %s177_s0 = inlined_call_operand.vmem [shape: f32[2,4,3], index: 0, kind: input, shape index: {}]   ;;  %s178_s1 = inlined_call_operand.vmem [shape: f32[2,4,3], index: 1, kind: output, shape index: {}]  }
   0x1   :  { %v18_v0 = vld [vmem:[%s177_s0] sm:$0xf]  ;;  %v20_v1 = vld [vmem:[%s177_s0 + $0x4] sm:$0xf]  ;;  %57 = vst [vmem:[#allocation0 + $0x10] sm:$0xf] %v55_v2 }
   0x2   :  { %19 = vst [vmem:[#allocation1 + $0x4] sm:$0xf] %v18_v0  ;;  %21 = vst [vmem:[#allocation1 + $0xc] sm:$0xf] %v20_v1  ;;  %v73_v11 = vshrl.u32 %v72_v6, 7 }
   0x3   :  { %63 = vst [vmem:[#allocation0] sm:$0xf] %v62_v3 }
   0x4   :  { %vm74_vm0 = vcmp.lt.s32.totalorder %v73_v11, 3 }
   0x8   :  { %v79_v7 = vld [vmem:[#allocation0 + $0x17] ss:$-1 sm:$0xff] }
   0x9   :  { %v50_v4 = vld [vmem:[#allocation1 + $0xc] sm:$0xf]  ;;  %v59_v5 = vld [vmem:[#allocation1 + $0x4] sm:$0xf]  ;;  %v80_v9 = vrot.slane %v79_v7, 5 }
   0xa   :  { %52 = vst [vmem:[#allocation0 + $0x18] sm:$0xf] %v50_v4  ;;  %61 = vst [vmem:[#allocation0 + $0x8] sm:$0xf] %v59_v5  ;;  %v65_v8 = vld [vmem:[#allocation0 + $0x7] ss:$-1 sm:$0xff] }
   0xb   :  { %v66_v10 = vrot.slane %v65_v8, 5  ;;  %81 = vst [vmem:[#allocation2 + $0x8] sm:$0xff] %v80_v9 }
   0xd   :  { %67 = vst [vmem:[#allocation2] sm:$0xff] %v66_v10 }
  0x11   :  { %v70_v12 = vld [vmem:[#allocation0 + $0xf] ss:$-1 sm:$0xff]  ;;  %v84_v13 = vld [vmem:[#allocation0 + $0x1f] ss:$-1 sm:$0xff] }
  0x12   :  { %v71_v14 = vrot.slane %v70_v12, 5  ;;  %v85_v15 = vrot.slane %v84_v13, 5 }
  0x14   :  { %75 = vst.msk [vmem:[#allocation2] sm:$0xff] %vm74_vm0, %v71_v14  ;;  %89 = vst.msk [vmem:[#allocation2 + $0x8] sm:$0xff] %vm74_vm0, %v85_v15 }
  0x1b   :  { %v93_v16 = vld [vmem:[#allocation2] sm:$0xf]  ;;  %v97_v17 = vld [vmem:[#allocation2 + $0x8] sm:$0xf] }
  0x1c   :  { %95 = vst [vmem:[#allocation3] sm:$0xf] %v93_v16  ;;  %100 = vst [vmem:[#allocation3 + $0x4] sm:$0xf] %v97_v17 }
  0x23   :  { %v116_v18 = vld [vmem:[#allocation3] sm:$0xff]  }
  0x24   :  { %117 = vst [vmem:[%s178_s1] sm:$0xff] %v116_v18  }

// kernel: custom-call.78
= control target key start
LH: loop header
LB: loop body
LE: loop exit
PB: predicated region body
PF: predicated region fallthrough
CT: control target
= control target key end

     0   :  { %5 = vsyncpa [#allocation6], 0  ;;  %s896_s0 = inlined_call_operand.vmem [shape: f32[2,3,3], index: 0, kind: input, shape index: {}]   ;;  %s897_s1 = inlined_call_operand.vmem [shape: f32[2,3,3], index: 1, kind: output, shape index: {0}]   ;;  %s898_s2 = inlined_call_operand.hbm [shape: s32[2,3], index: 2, kind: output, shape index: {1}]   ;;  %s899_s3 = inlined_call_operand.vmem [shape: s32[2,3], index: 3, kind: output, shape index: {2}]  }
   0x1   :  { %7 = vsyncpa [#allocation6 + $0x1], 0  ;;  %s715_s12 = smov 0   ;;  %s717_s13 = smov 0  }
   0x2   :  { %s719_s14 = smov 0   ;;  %s721_s15 = smov 0  }
   0x3 LB: > { %s736_s16 = sadd.s32 4294967295, %s687_s15   ;;  %s550_s17 = sadd.s32 4294967294, %s687_s15   ;;  %s687_s15 = sphi %s721_s15, %s907_s15   ;;  %s683_s14 = sphi %s719_s14, %s906_s14   ;;  %s679_s13 = sphi %s717_s13, %s905_s13   ;;  %s675_s12 = sphi %s715_s12, %s904_s12  }
   0x4   : > { %s740_s18 = sadd.s32 1, %s687_s15   ;;  %s17_s19 = sshrl.u32 %s687_s15, 3 }
   0x5   : > { %s18_s20 = sshrl.u32 %s740_s18, 3  ;;  %s22_s21 = sadd.s32 1, %s683_s14 }
   0x6   : > { %s19_s22 = ssub.s32 %s17_s19, %s18_s20  ;;  %p32_p0 = scmp.ne.s32.totalorder %s683_s14, %s679_s13 }
   0x7   : > { %p20_p1 = scmp.eq.s32.totalorder %s19_s22, 0  ;;  %p33_p2 = scmp.eq.s32.totalorder %s736_s16, 1 }
   0x8   : > { %p38_p3 = scmp.ne.s32.totalorder %s679_s13, %s675_s12  ;;  %p39_p4 = scmp.eq.s32.totalorder %s550_s17, 1 }
   0x9   : > { %s751_s23 = scalar_select %p20_p1, %s683_s14, %s22_s21  }
   0xa   : > { %p753_p5 = por %p33_p2, %p32_p0  ;;  %p757_p6 = por %p39_p4, %p38_p3 }
   0xb   : > { %p552_p7 = scmp.ge.s32.totalorder %s687_s15, 2 }
   0xc   : > { %s85_s26 = sand.u32 (!%p552_p7), 1, %s687_s15   ;;  %s554_s27 = sshll.u32 (!%p552_p7), %s687_s15, 2 }
   0xd   : > { %83 = sbr.rel (%p552_p7) target bundleno = 20 (0x14), region = 16  ;;  %s553_s28 = sshll.u32 (!%p552_p7), %s85_s26, 2 }
   0xe   : > { %s89_s4 = scalar_lea.vmem (!%p552_p7), %s896_s0, %s554_s27  ;;  %s87_s5 = scalar_lea.vmem (!%p552_p7), [#allocation1], %s553_s28 }
   0xf   : > { %v105_v0 = vld [vmem:[%s89_s4] sm:$0xf] (!%p552_p7) }
  0x10   : > { %106 = vst [vmem:[%s87_s5] sm:$0xf] (!%p552_p7), %v105_v0 }
  0x14 PF: > { %p555_p8 = scmp.ge.s32.totalorder %s687_s15, 1  ;;  %p122_p9 = scmp.lt.s32.totalorder %s687_s15, 3 }
  0x16   : > { %p123_p10 = pnand %p555_p8, %p122_p9 }
  0x18   : > { %126 = sbr.rel (%p123_p10) target bundleno = 451 (0x1c3), region = 50 }
  0x1f   : > { %s133_s6 = sand.u32 1, %s736_s16   ;;  %s144_s7 = sand.u32 1, %s679_s13   ;;  %v166_v1 = vlaneseq  ;;  %v693_v4 = vmov 0  }
  0x20   : > { %s773_s8 = sshll.u32 %s133_s6, 2  ;;  %s777_s9 = sshll.u32 %s144_s7, 1 }
  0x21   : > { %v780_v2 = vshrl.u32 %v166_v1, 7  ;;  %s135_s10 = scalar_lea.vmem [#allocation1], %s773_s8  ;;  %s161_s11 = sand.u32 7, %s736_s16  }
  0x22   : > { %v155_v3 = vld [vmem:[%s135_s10] sm:$0xf]  ;;  %s785_s17 = scalar_lea.vmem [#allocation4], %s161_s11  ;;  %s139_s19 = scalar_lea.vmem [#allocation3], %s773_s8 }
  0x23   : > { %156 = vst [vmem:[#allocation0] sm:$0xf] %v155_v3  ;;  %170 = vst [vmem:[#allocation9] sm:$0xff] %v780_v2  ;;  %s146_s20 = scalar_lea.vmem [#allocation5], %s777_s9  ;;  %s152_s21 = scalar_lea.vmem [#allocation8], %s777_s9 }
  0x24   : > { %165 = vst [vmem:[%s785_s17] sm:$0x1] %v693_v4  ;;  %s791_s22 = scalar_lea.vmem [#allocation7], %s161_s11  ;;  %s793_s26 = smov 0  }
  0x2a   : > { %v159_v5 = vld [vmem:[#allocation0] sm:$0xff] }
  0x2b   : > { %160 = vst [vmem:[#allocation2] sm:$0xff] %v159_v5 }
  0x2c LB: >> { %vm186_vm0 = vcmp.lt.s32.totalorder %v780_v2, 3  ;;  %v800_v8 = vstv %s691_s26  ;;  %s227_s27 = ssub.s32 128, %s691_s26  ;;  %v233_v38 = vand.u32 127, %v166_v1  ;;  %v236_v40 = vld [vmem:[%s785_s17] ss:$0 sm:$0xff]  ;;  %s239_s28 = scalar_lea.vmem [#allocation2], %s691_s26  ;;  %s691_s26 = sphi %s793_s26, %s176_s26  }
  0x2d   : >> { %vm185_vm1 = vcmp.ge.s32.totalorder %v780_v2, %v800_v8  ;;  %s245_s30 = scalar_lea.vmem [#allocation9], %s691_s26  ;;  %vm265_vm15 = vcmp.gt.s32.totalorder %v780_v2, %v800_v8  ;;  %s176_s26 = sadd.s32 1, %s691_s26  }
  0x2e   : >> { %vm187_vm3 = vmand %vm185_vm1, %vm186_vm0  ;;  %vm257_vm12 = vcmp.gt.s32.totalorder %v233_v38, %v800_v8  ;;  %vm234_vm13 = vcmp.eq.s32.totalorder %v233_v38, %v800_v8  ;;  %v247_v42 = vld [vmem:[%s245_s30] ss:$0 sm:$0xff]  ;;  %p173_p11 = scmp.ge.s32.totalorder %s176_s26, 3  }
  0x2f   : >> { %vm269_vm1 = vmand %vm265_vm15, %vm234_vm13  ;;  %s900_s6 = sshrl.u32 (%p173_p11), %s736_s16, 3  ;;  %s564_s10 = sshll.u32 (%p173_p11), %s736_s16, 2 }
  0x30   : > { %s565_s11 = sshll.u32 (%p173_p11), %s900_s6, 5 }
  0x32   : >> { %v181_v6 = vld [vmem:[#allocation2] sm:$0xff]  ;;  %v241_v41 = vld [vmem:[%s239_s28] ss:$0 sm:$0xff] }
  0x33   : >> { %v182_v7 = vand.u32 2147483647, %v181_v6 }
  0x35   : >> { %vm560_vm2 = vcmp.gt.f32.partialorder %v182_v7, -inf }
  0x36   : >> { %vm189_vm4 = vmand %vm187_vm3, %vm560_vm2 }
  0x37   : >> { %v190_v9 = vsel %vm189_vm4, %v780_v2, %v800_v8  ;;  %v191_v10 = vsel %vm189_vm4, %v182_v7, -inf }
  0x38   : >> { %v192_v11 = vrot.slane %v191_v10, 1  ;;  %v193_v12 = vrot.slane %v190_v9, 1 }
  0x3a   : >> { %vm194_vm5 = vcmp.ge.f32.partialorder %v192_v11, %v191_v10  ;;  %v197_v13 = vrot.slane %v192_v11, 1  ;;  %v198_v14 = vrot.slane %v193_v12, 1 }
  0x3b   : >> { %v195_v15 = vsel %vm194_vm5, %v192_v11, %v191_v10  ;;  %v196_v16 = vsel %vm194_vm5, %v193_v12, %v190_v9 }
  0x3c   : >> { %vm199_vm6 = vcmp.ge.f32.partialorder %v197_v13, %v195_v15  ;;  %v202_v17 = vrot.slane %v197_v13, 1  ;;  %v203_v18 = vrot.slane %v198_v14, 1 }
  0x3d   : >> { %v200_v19 = vsel %vm199_vm6, %v197_v13, %v195_v15  ;;  %v201_v20 = vsel %vm199_vm6, %v198_v14, %v196_v16 }
  0x3e   : >> { %vm204_vm7 = vcmp.ge.f32.partialorder %v202_v17, %v200_v19  ;;  %v207_v21 = vrot.slane %v202_v17, 1  ;;  %v208_v22 = vrot.slane %v203_v18, 1 }
  0x3f   : >> { %v205_v23 = vsel %vm204_vm7, %v202_v17, %v200_v19  ;;  %v206_v24 = vsel %vm204_vm7, %v203_v18, %v201_v20 }
  0x40   : >> { %vm209_vm8 = vcmp.ge.f32.partialorder %v207_v21, %v205_v23  ;;  %v212_v25 = vrot.slane %v207_v21, 1  ;;  %v213_v26 = vrot.slane %v208_v22, 1 }
  0x41   : >> { %v210_v27 = vsel %vm209_vm8, %v207_v21, %v205_v23  ;;  %v211_v28 = vsel %vm209_vm8, %v208_v22, %v206_v24 }
  0x42   : >> { %vm214_vm9 = vcmp.ge.f32.partialorder %v212_v25, %v210_v27  ;;  %v217_v29 = vrot.slane %v212_v25, 1  ;;  %v218_v30 = vrot.slane %v213_v26, 1 }
  0x43   : >> { %v215_v31 = vsel %vm214_vm9, %v212_v25, %v210_v27  ;;  %v216_v32 = vsel %vm214_vm9, %v213_v26, %v211_v28 }
  0x44   : >> { %vm219_vm10 = vcmp.ge.f32.partialorder %v217_v29, %v215_v31  ;;  %v222_v33 = vrot.slane %v217_v29, 1  ;;  %v223_v34 = vrot.slane %v218_v30, 1 }
  0x45   : >> { %v220_v35 = vsel %vm219_vm10, %v217_v29, %v215_v31  ;;  %v221_v36 = vsel %vm219_vm10, %v218_v30, %v216_v32 }
  0x46   : >> { %vm224_vm11 = vcmp.ge.f32.partialorder %v222_v33, %v220_v35 }
  0x47   : >> { %v226_v37 = vsel %vm224_vm11, %v223_v34, %v221_v36 }
  0x48   : >> { %228 = vrot.lane.b32.xlu0 %v226_v37, %s227_s27  ;;  %s357_s27 = scalar_lea.vmem (%p173_p11), %s897_s1, %s564_s10 }
  0xba   : >> { %v229_v39 = vpop.permute.xlu0 %228 }
  0xbb   : >> { %569 = vpush %v229_v39 }
  0xec   : >> { %s570_s29 = spop %569 }
  0xed   : >> { %v235_v43 = vstv %s570_s29  ;;  %s240_s4 = scalar_lea.vmem [#allocation2], %s570_s29  ;;  %s246_s5 = scalar_lea.vmem [#allocation9], %s570_s29 }
  0xee   : >> { %v242_v44 = vld [vmem:[%s240_s4] ss:$0 sm:$0xff]  ;;  %v237_v46 = vsel %vm234_vm13, %v235_v43, %v236_v40 }
  0xef   : >> { %v248_v45 = vld [vmem:[%s246_s5] ss:$0 sm:$0xff]  ;;  %243 = vst [vmem:[%s240_s4] sm:$0x1] %v241_v41  ;;  %vm251_vm14 = vcmp.ne.f32.partialorder %v242_v44, 0.0  ;;  %238 = vst [vmem:[%s785_s17] sm:$0x1] %v237_v46  ;;  %v258_v53 = vsel %vm257_vm12, %v242_v44, 0.0 }
  0xf0   : >> { %249 = vst [vmem:[%s246_s5] sm:$0x1] %v247_v42  ;;  %244 = vst [vmem:[%s239_s28] sm:$0x1] %v242_v44  ;;  %s399_s4 = sshll.u32 (%p173_p11), %s146_s20, 4  ;;  %s348_s5 = scalar_lea.sflag (%p173_p11), [#allocation6], %s144_s7  ;;  %s400_s4 = int_to_ptr.vmem [resolvable:$true] %s399_s4 }
  0xf1   : >> { %250 = vst [vmem:[%s245_s30] sm:$0x1] %v248_v45  ;;  %vm252_vm0 = vmand %vm234_vm13, %vm251_vm14  ;;  %s843_s30 = scalar_lea.hbm (%p173_p11), %s898_s2, %s565_s11  ;;  %s621_s6 = scalar_lea.vmem (%p173_p11), %s400_s4, 32 }
  0xf2   : >> { %v253_v47 = vsel %vm252_vm0, %v242_v44, 1.0  ;;  %p622_p12 = scmp.ne.s32.totalorder (%p173_p11), %s400_s4, %s621_s6  ;;  %s694_s17 = smov (%p173_p11), [#allocation5]  }
  0xf3   : >> { %v266_v48 = vsel %vm265_vm15, %v253_v47, 1.0  ;;  %s625_s10 = sshll.u32 (%p173_p11), %s694_s17, 4  ;;  %s626_s10 = int_to_ptr.vmem [resolvable:$false] %s625_s10 }
  0xf4   : >> { %619 = vrcp.f32 %v266_v48  ;;  %p623_p13 = pnand (%p173_p11), %p622_p12, %p753_p5  ;;  %s627_s8 = scalar_lea.vmem (%p173_p11), %s626_s10, 64 }
  0xf5   : > { %p628_p1 = scmp.lt.s32.totalorder (%p173_p11), %s400_s4, %s626_s10  ;;  %p629_p2 = scmp.lt.s32.totalorder (%p173_p11), %s627_s8, %s621_s6 }
  0xf6   : > { %v334_v59 = vld [vmem:[#allocation4] sm:$0x3] (%p173_p11)  ;;  %p624_p0 = pneg (%p173_p11), %p623_p13 }
  0xf7   : >> { %v262_v50 = vld [vmem:[#allocation2] sm:$0xff]  ;;  %336 = vst [vmem:[%s146_s20] sm:$0x3] (%p173_p11), %v334_v59  ;;  %p630_p3 = por (%p173_p11), %p629_p2, %p628_p1 }
  0xf8   : > { %v276_v57 = vld [vmem:[#allocation9] sm:$0xff] (%p173_p11) }
  0xf9   : > { %p631_p4 = pnand (%p173_p11), %p630_p3, %p624_p0 }
  0xfe   : >> { %v620_v49 = vpop.eup %619 }
  0xff   : >> { %v268_v51 = vmul.f32 %v620_v49, %v262_v50 }
 0x101   : >> { %v270_v52 = vsel %vm269_vm1, %v268_v51, 0.0 }
 0x102   : >> { %271 = vadd.xlane.f32.xlu0 %v270_v52 }
 0x12f   : > { %292 = vxpose.xlu0.b32.start.end [1/1] (short) (narrow) (%p173_p11), %v276_v57, 8 }
 0x18e   : > { %175 = sbr.rel (!%p173_p11) target bundleno = 44 (0x2c), region = 202 }
 0x18f   : >> { %v272_v54 = vpop.xlane.xlu0 %271 }
 0x190   : >> { %v273_v55 = vmul.f32 %v272_v54, %v258_v53 }
 0x192   : >> { %v274_v56 = vsub.f32 %v268_v51, %v273_v55 }
 0x194   : >> { %275 = vst [vmem:[#allocation2] sm:$0xff] %v274_v56 }
 0x19b   : > { %v328_v58 = vld [vmem:[#allocation2] sm:$0xf] }
 0x19c   : > { %330 = vst [vmem:[%s139_s19] sm:$0xf] %v328_v58 }
 0x1a3   : > { %v373_v60 = vld [vmem:[%s139_s19] sm:$0xf] }
 0x1a4   : > { %374 = vst [vmem:[%s357_s27] sm:$0xf] %v373_v60 }
 0x1a5   : > { %634 = shalt.err (!%p631_p4)
}
 0x1a6   : > { %s635_s7 = scalar_lea.hbm %s843_s30, 32  ;;  %s639_s11 = scalar_lea.hbm %s898_s2, 32 }
 0x1a7   : > { %p636_p8 = scmp.ne.s32.totalorder %s843_s30, %s635_s7  ;;  %p640_p11 = scmp.lt.u32.totalorder %s843_s30, %s898_s2 }
 0x1a8   : > { %p641_p12 = scmp.lt.u32.totalorder %s639_s11, %s635_s7  ;;  %p643_p0 = scmp.lt.u32.totalorder %s635_s7, %s843_s30 }
 0x1a9   : > { %p637_p9 = pnand %p636_p8, %p753_p5 }
 0x1aa   : > { %p642_p13 = por %p641_p12, %p640_p11 }
 0x1ab   : > { %p638_p10 = pneg %p637_p9 }
 0x1ac   : > { %p644_p1 = por %p643_p0, %p642_p13 }
 0x1ae   : > { %p645_p2 = pnand %p644_p1, %p638_p10 }
 0x1b0   : > { %648 = shalt.err (!%p645_p2)
}
 0x1b1   : > { %571 = dma.vmem_to_hbm [thread:$0]  (%p753_p5), %s400_s4, 32, %s843_s30, %s348_s5   ;;  %v308_v61 = vpop.trf.xlu0 }
 0x1b2   : > { %324 = vst [vmem:[%s791_s22] sm:$0x1] %v308_v61  ;;  %s903_s6 = sshrl.u32 (%p753_p5), %s736_s16, 3 }
 0x1b3   : > { %s566_s28 = sshll.u32 (%p753_p5), %s903_s6, 1 }
 0x1b4   : > { %405 = sbr.rel (!%p753_p5) target bundleno = 451 (0x1c3), region = 96  ;;  %s408_s10 = scalar_lea.vmem (%p753_p5), %s899_s3, %s566_s28 }
 0x1b9   : > { %v340_v62 = vld [vmem:[#allocation7] sm:$0x3] }
 0x1ba   : > { %342 = vst [vmem:[%s152_s21] sm:$0x3] %v340_v62 }
 0x1c1   : > { %v424_v63 = vld [vmem:[%s152_s21] sm:$0x3] }
 0x1c2   : > { %425 = vst [vmem:[%s408_s10] sm:$0x3] %v424_v63 }
 0x1c3 PF: > { %s452_s22 = sand.u32 1, %s675_s12   ;;  %p574_p5 = pnand %p552_p7, %p757_p6 }
 0x1c4   : > { %s453_s24 = scalar_lea.sflag [#allocation6], %s452_s22 }
 0x1c5   : > { %670 = dma.done.wait (!%p574_p5), %s453_s24, 32  }
 0x1c6   : > { %672 = vsyncadd (!%p574_p5), %s453_s24, 4294967264  ;;  %p10_p3 = scmp.ge.s32.totalorder %s740_s18, 4   ;;  %s904_s12 = smov %s679_s13 }
 0x1c7   : > { %s905_s13 = smov %s683_s14  ;;  %s906_s14 = smov %s751_s23 }
 0x1c8   : > { %s907_s15 = smov %s740_s18  ;;  %12 = sbr.rel (!%p10_p3) target bundleno = 3 (0x3), region = 213 }
 0x1cf   :  { %465 = vsyncpa [#allocation6], 1 }
 0x1d0   :  { %467 = vsyncpa [#allocation6 + $0x1], 1 }

// kernel: custom-call.79
= control target key start
LH: loop header
LB: loop body
LE: loop exit
PB: predicated region body
PF: predicated region fallthrough
CT: control target
= control target key end

     0   :  { %s343_s6 = smov 0   ;;  %s345_s7 = smov 0   ;;  %s390_s0 = inlined_call_operand.vmem [shape: f32[2,1,3,3], index: 0, kind: input, shape index: {}]   ;;  %s391_s1 = inlined_call_operand.vmem [shape: f32[2,1,3,3], index: 1, kind: output, shape index: {}]  }
   0x1   :  { %s347_s8 = smov 0  }
   0x2 LB: > { %s269_s9 = sadd.s32 4294967295, %s330_s8   ;;  %s33_s10 = sadd.s32 1, %s326_s7  ;;  %s330_s8 = sphi %s347_s8, %s7_s8   ;;  %s326_s7 = sphi %s345_s7, %s393_s7   ;;  %s322_s6 = sphi %s343_s6, %s392_s6  }
   0x3   : > { %p35_p0 = scmp.ge.s32.totalorder %s33_s10, 2  ;;  %p271_p1 = scmp.ge.s32.totalorder %s330_s8, 2 }
   0x4   : > { %s49_s11 = sand.u32 (!%p271_p1), 1, %s330_s8   ;;  %s273_s12 = sshll.u32 (!%p271_p1), %s326_s7, 2 }
   0x5   : > { %s395_s10 = smov (%p35_p0, %s33_s10), 0  ;;  %47 = sbr.rel (%p271_p1) target bundleno = 12 (0xc), region = 16 }
   0x6   : > { %s272_s13 = sshll.u32 (!%p271_p1), %s49_s11, 2  ;;  %s56_s16 = scalar_lea.vmem (!%p271_p1), %s390_s0, %s273_s12 }
   0x7   : > { %v72_v0 = vld [vmem:[%s56_s16] sm:$0xf] (!%p271_p1)  ;;  %s51_s17 = scalar_lea.vmem (!%p271_p1), [#allocation1], %s272_s13 }
   0x8   : > { %73 = vst [vmem:[%s51_s17] sm:$0xf] (!%p271_p1), %v72_v0 }
   0xc PF: > { %p274_p2 = scmp.ge.s32.totalorder %s330_s8, 1  ;;  %p89_p3 = scmp.lt.s32.totalorder %s330_s8, 3 }
   0xe   : > { %p90_p4 = pnand %p274_p2, %p89_p3 }
  0x10   : > { %93 = sbr.rel (%p90_p4) target bundleno = 511 (0x1ff), region = 50 }
  0x17   : > { %s370_s18 = sand.u32 1, %s269_s9   ;;  %v111_v1 = vlaneseq  ;;  %v332_v11 = vmov -1.0   ;;  %s278_s22 = sshll.u32 %s322_s6, 2 }
  0x18   : > { %s275_s19 = sshll.u32 %s370_s18, 2  ;;  %s178_s25 = scalar_lea.vmem %s391_s1, %s278_s22 }
  0x19   : > { %s102_s20 = scalar_lea.vmem [#allocation1], %s275_s19  ;;  %v112_v3 = vand.u32 127, %v111_v1  ;;  %v115_v4 = vshrl.u32 %v111_v1, 7  ;;  %s106_s21 = scalar_lea.vmem [#allocation3], %s275_s19 }
  0x1a   : > { %v109_v2 = vld [vmem:[%s102_s20] sm:$0xf] }
  0x1b   : > { %110 = vst [vmem:[#allocation0] sm:$0xf] %v109_v2  ;;  %vm113_vm0 = vcmp.lt.s32.totalorder %v112_v3, 3  ;;  %vm122_vm1 = vcmp.ge.s32.totalorder %v115_v4, %v112_v3  ;;  %vm117_vm2 = vcmp.eq.s32.totalorder %v115_v4, %v112_v3  ;;  %vm136_vm4 = vcmp.eq.s32.totalorder %v112_v3, 0 }
  0x1c   : > { %vm123_vm3 = vmand %vm122_vm1, %vm113_vm0  ;;  %vm133_vm5 = vcmp.eq.s32.totalorder %v112_v3, %v115_v4  ;;  %v137_v12 = vsel %vm136_vm4, 1.0, %v332_v11  ;;  %vm144_vm6 = vcmp.eq.s32.totalorder %v112_v3, 1  ;;  %vm154_vm7 = vcmp.eq.s32.totalorder %v112_v3, 2 }
  0x1d   : > { %v138_v13 = vsel %vm133_vm5, %v137_v12, 0.0 }
  0x22   : > { %v118_v5 = vld [vmem:[#allocation0] sm:$0xff] }
  0x23   : > { %v119_v6 = vsel %vm117_vm2, %v118_v5, 0.0  ;;  %v124_v7 = vsel %vm123_vm3, %v118_v5, 0.0 }
  0x24   : > { %120 = vadd.xlane.f32.xlu0 %v119_v6 }
  0xb1   : > { %v121_v8 = vpop.xlane.xlu0 %120 }
  0xb2   : > { %306 = vrcp.f32 %v121_v8  ;;  %vm161_vm8 = vweird.f32 %v121_v8 }
  0xbc   : > { %v307_v9 = vpop.eup %306 }
  0xbd   : > { %v126_v10 = vmul.f32 %v307_v9, %v124_v7 }
  0xbf   : > { %127 = vst [vmem:[#allocation4] sm:$0xff] %v126_v10 }
  0xc6   : > { %v140_v14 = vld [vmem:[#allocation4 + $0x1] ss:$0 sm:$0xff]  ;;  %v150_v17 = vld [vmem:[#allocation4 + $0x2] ss:$0 sm:$0xff] }
  0xc7   : > { %v141_v15 = vxor.u32 2147483648, %v140_v14  ;;  %v151_v19 = vxor.u32 2147483648, %v150_v17 }
  0xc9   : > { %v145_v16 = vmul.f32 %v141_v15, %v138_v13 }
  0xcb   : > { %146 = vadd.xlane.f32.xlu0 %v145_v16 }
 0x158   : > { %v147_v18 = vpop.xlane.xlu0 %146 }
 0x159   : > { %v148_v20 = vsel %vm144_vm6, %v147_v18, %v138_v13 }
 0x15a   : > { %v155_v21 = vmul.f32 %v151_v19, %v148_v20 }
 0x15c   : > { %156 = vadd.xlane.f32.xlu1 %v155_v21 }
 0x1e9   : > { %v157_v22 = vpop.xlane.xlu1 %156 }
 0x1ea   : > { %v158_v23 = vsel %vm154_vm7, %v157_v22, %v148_v20 }
 0x1eb   : > { %v160_v24 = vmul.f32 %v307_v9, %v158_v23 }
 0x1ed   : > { %v162_v25 = vsel %vm161_vm8, %v158_v23, %v160_v24 }
 0x1ee   : > { %163 = vst [vmem:[#allocation2] sm:$0xff] %v162_v25 }
 0x1f5   : > { %v167_v26 = vld [vmem:[#allocation2] sm:$0xf] }
 0x1f6   : > { %169 = vst [vmem:[%s106_s21] sm:$0xf] %v167_v26 }
 0x1fd   : > { %v194_v27 = vld [vmem:[%s106_s21] sm:$0xf] }
 0x1fe   : > { %195 = vst [vmem:[%s178_s25] sm:$0xf] %v194_v27 }
 0x1ff PF: > { %s7_s8 = sadd.s32 1, %s330_s8   ;;  %s392_s6 = smov %s326_s7 }
 0x200   : > { %p4_p5 = scmp.ge.s32.totalorder %s7_s8, 4   ;;  %s393_s7 = smov %s395_s10 }
 0x202   :  { %6 = sbr.rel (!%p4_p5) target bundleno = 2 (0x2), region = 112 }

// kernel: custom-call.80
= control target key start
LH: loop header
LB: loop body
LE: loop exit
PB: predicated region body
PF: predicated region fallthrough
CT: control target
= control target key end

     0   :  { %s342_s6 = smov 0   ;;  %s344_s7 = smov 0   ;;  %s389_s0 = inlined_call_operand.vmem [shape: f32[2,1,3,3], index: 0, kind: input, shape index: {}]   ;;  %s390_s1 = inlined_call_operand.vmem [shape: f32[2,1,3,3], index: 1, kind: output, shape index: {}]  }
   0x1   :  { %s346_s8 = smov 0  }
   0x2 LB: > { %s268_s9 = sadd.s32 4294967295, %s329_s8   ;;  %s33_s10 = sadd.s32 1, %s325_s7  ;;  %s329_s8 = sphi %s346_s8, %s7_s8   ;;  %s325_s7 = sphi %s344_s7, %s392_s7   ;;  %s321_s6 = sphi %s342_s6, %s391_s6  }
   0x3   : > { %p35_p0 = scmp.ge.s32.totalorder %s33_s10, 2  ;;  %p270_p1 = scmp.ge.s32.totalorder %s329_s8, 2 }
   0x4   : > { %s49_s11 = sand.u32 (!%p270_p1), 1, %s329_s8   ;;  %s272_s12 = sshll.u32 (!%p270_p1), %s325_s7, 2 }
   0x5   : > { %s394_s10 = smov (%p35_p0, %s33_s10), 0  ;;  %47 = sbr.rel (%p270_p1) target bundleno = 12 (0xc), region = 16 }
   0x6   : > { %s271_s13 = sshll.u32 (!%p270_p1), %s49_s11, 2  ;;  %s56_s16 = scalar_lea.vmem (!%p270_p1), %s389_s0, %s272_s12 }
   0x7   : > { %v72_v0 = vld [vmem:[%s56_s16] sm:$0xf] (!%p270_p1)  ;;  %s51_s17 = scalar_lea.vmem (!%p270_p1), [#allocation1], %s271_s13 }
   0x8   : > { %73 = vst [vmem:[%s51_s17] sm:$0xf] (!%p270_p1), %v72_v0 }
   0xc PF: > { %p273_p2 = scmp.ge.s32.totalorder %s329_s8, 1  ;;  %p89_p3 = scmp.lt.s32.totalorder %s329_s8, 3 }
   0xe   : > { %p90_p4 = pnand %p273_p2, %p89_p3 }
  0x10   : > { %93 = sbr.rel (%p90_p4) target bundleno = 511 (0x1ff), region = 50 }
  0x17   : > { %s369_s18 = sand.u32 1, %s268_s9   ;;  %v111_v1 = vlaneseq  ;;  %v331_v11 = vmov -1.0   ;;  %s277_s22 = sshll.u32 %s321_s6, 2 }
  0x18   : > { %s274_s19 = sshll.u32 %s369_s18, 2  ;;  %s177_s25 = scalar_lea.vmem %s390_s1, %s277_s22 }
  0x19   : > { %s102_s20 = scalar_lea.vmem [#allocation1], %s274_s19  ;;  %v112_v3 = vand.u32 127, %v111_v1  ;;  %v115_v4 = vshrl.u32 %v111_v1, 7  ;;  %s106_s21 = scalar_lea.vmem [#allocation3], %s274_s19 }
  0x1a   : > { %v109_v2 = vld [vmem:[%s102_s20] sm:$0xf] }
  0x1b   : > { %110 = vst [vmem:[#allocation0] sm:$0xf] %v109_v2  ;;  %vm113_vm0 = vcmp.lt.s32.totalorder %v112_v3, 3  ;;  %vm122_vm1 = vcmp.le.s32.totalorder %v115_v4, %v112_v3  ;;  %vm117_vm2 = vcmp.eq.s32.totalorder %v115_v4, %v112_v3  ;;  %vm136_vm4 = vcmp.eq.s32.totalorder %v112_v3, 2 }
  0x1c   : > { %vm123_vm3 = vmand %vm122_vm1, %vm113_vm0  ;;  %vm133_vm5 = vcmp.eq.s32.totalorder %v112_v3, %v115_v4  ;;  %v137_v12 = vsel %vm136_vm4, 1.0, %v331_v11  ;;  %vm144_vm6 = vcmp.eq.s32.totalorder %v112_v3, 1  ;;  %vm153_vm7 = vcmp.eq.s32.totalorder %v112_v3, 0 }
  0x1d   : > { %v138_v13 = vsel %vm133_vm5, %v137_v12, 0.0 }
  0x22   : > { %v118_v5 = vld [vmem:[#allocation0] sm:$0xff] }
  0x23   : > { %v119_v6 = vsel %vm117_vm2, %v118_v5, 0.0  ;;  %v124_v7 = vsel %vm123_vm3, %v118_v5, 0.0 }
  0x24   : > { %120 = vadd.xlane.f32.xlu0 %v119_v6 }
  0xb1   : > { %v121_v8 = vpop.xlane.xlu0 %120 }
  0xb2   : > { %305 = vrcp.f32 %v121_v8  ;;  %vm160_vm8 = vweird.f32 %v121_v8 }
  0xbc   : > { %v306_v9 = vpop.eup %305 }
  0xbd   : > { %v126_v10 = vmul.f32 %v306_v9, %v124_v7 }
  0xbf   : > { %127 = vst [vmem:[#allocation4] sm:$0xff] %v126_v10 }
  0xc6   : > { %v140_v14 = vld [vmem:[#allocation4 + $0x1] ss:$0 sm:$0xff]  ;;  %v149_v17 = vld [vmem:[#allocation4] ss:$0 sm:$0xff] }
  0xc7   : > { %v141_v15 = vxor.u32 2147483648, %v140_v14  ;;  %v150_v19 = vxor.u32 2147483648, %v149_v17 }
  0xc9   : > { %v145_v16 = vmul.f32 %v141_v15, %v138_v13 }
  0xcb   : > { %146 = vadd.xlane.f32.xlu0 %v145_v16 }
 0x158   : > { %v147_v18 = vpop.xlane.xlu0 %146 }
 0x159   : > { %v148_v20 = vsel %vm144_vm6, %v147_v18, %v138_v13 }
 0x15a   : > { %v154_v21 = vmul.f32 %v150_v19, %v148_v20 }
 0x15c   : > { %155 = vadd.xlane.f32.xlu1 %v154_v21 }
 0x1e9   : > { %v156_v22 = vpop.xlane.xlu1 %155 }
 0x1ea   : > { %v157_v23 = vsel %vm153_vm7, %v156_v22, %v148_v20 }
 0x1eb   : > { %v159_v24 = vmul.f32 %v306_v9, %v157_v23 }
 0x1ed   : > { %v161_v25 = vsel %vm160_vm8, %v157_v23, %v159_v24 }
 0x1ee   : > { %162 = vst [vmem:[#allocation2] sm:$0xff] %v161_v25 }
 0x1f5   : > { %v166_v26 = vld [vmem:[#allocation2] sm:$0xf] }
 0x1f6   : > { %168 = vst [vmem:[%s106_s21] sm:$0xf] %v166_v26 }
 0x1fd   : > { %v193_v27 = vld [vmem:[%s106_s21] sm:$0xf] }
 0x1fe   : > { %194 = vst [vmem:[%s177_s25] sm:$0xf] %v193_v27 }
 0x1ff PF: > { %s7_s8 = sadd.s32 1, %s329_s8   ;;  %s391_s6 = smov %s325_s7 }
 0x200   : > { %p4_p5 = scmp.ge.s32.totalorder %s7_s8, 4   ;;  %s392_s7 = smov %s394_s10 }
 0x202   :  { %6 = sbr.rel (!%p4_p5) target bundleno = 2 (0x2), region = 111 }

// kernel: dese_layer.2
= control target key start
LH: loop header
LB: loop body
LE: loop exit
PB: predicated region body
PF: predicated region fallthrough
CT: control target
= control target key end

     0   :  { %vm24_vm0 = vcmask 130048   ;;  %v439_v5 = vmov 0.0|0.0   ;;  %vm440_vm1 = vmmov 0   ;;  %v441_v6 = vmov 0.0   ;;  %s523_s0 = inlined_call_operand.vmem [shape: f32[16,64], index: 0, kind: input, shape index: {}]   ;;  %s524_s1 = inlined_call_operand.vmem [shape: f32[16,16], index: 1, kind: input, shape index: {}]   ;;  %s525_s3 = inlined_call_operand.vmem [shape: f32[64,8], index: 3, kind: input, shape index: {}]   ;;  %s526_s2 = inlined_call_operand.vmem [shape: f32[2,16], index: 2, kind: input, shape index: {}]   ;;  %s527_s4 = inlined_call_operand.vmem [shape: f32[8,64], index: 4, kind: input, shape index: {}]   ;;  %s528_s5 = inlined_call_operand.vmem [shape: f32[2,64], index: 5, kind: output, shape index: {}]  }
   0x1   :  { %v22_v0 = vld [vmem:[%s523_s0] sm:$0xff]  ;;  %v23_v1 = vld [vmem:[%s523_s0 + $0x8] sm:$0xff]  ;;  %420 = vmatprep.subr.bf16.mxu0 %v439_v5  ;;  %405 = vmatprep.mubr.msk.f32.mxu0 %vm440_vm1, %v441_v6  ;;  %v184_v9 = vld [vmem:[%s525_s3 + $0x10] sm:$0xff]  ;;  %vm190_vm2 = vcmask 523264   ;;  %vm266_vm3 = vcmask 64512   ;;  %vm346_vm4 = vcmask 517120  }
   0x2   :  { %v20_v2 = vld [vmem:[%s524_s1] sm:$0xff]  ;;  %v413_v3 = vpack.c.bf16 %v23_v1, %v22_v0  ;;  %v21_v4 = vld [vmem:[%s524_s1 + $0x8] sm:$0xff]  ;;  %v185_v11 = vld [vmem:[%s525_s3 + $0x18] sm:$0xff] }
   0x3   :  { %379 = vmatprep.mubr.msk.f32.mxu1 %vm24_vm0, %v20_v2  ;;  %v182_v7 = vld [vmem:[%s525_s3] sm:$0xff]  ;;  %v183_v8 = vld [vmem:[%s525_s3 + $0x8] sm:$0xff]  ;;  %v424_v12 = vpack.c.bf16 %v185_v11, %v184_v9  ;;  %v188_v16 = vld [vmem:[%s525_s3 + $0x30] sm:$0xff] }
   0x4   :  { %414 = vmatprep.subr.bf16.mxu1 %v413_v3  ;;  %v421_v10 = vpack.c.bf16 %v183_v8, %v182_v7  ;;  %v186_v13 = vld [vmem:[%s525_s3 + $0x20] sm:$0xff]  ;;  %v187_v14 = vld [vmem:[%s525_s3 + $0x28] sm:$0xff]  ;;  %v189_v17 = vld [vmem:[%s525_s3 + $0x38] sm:$0xff] }
   0x5   :  { %416 = vmatpush3.bf16.msra.mxu1 %v413_v3  ;;  %v427_v15 = vpack.c.bf16 %v187_v14, %v186_v13  ;;  %v430_v18 = vpack.c.bf16 %v189_v17, %v188_v16  ;;  %v108_v24 = vld [vmem:[%s526_s2] sm:$0x3] }
   0x6   :  { %417 = vmatprep.subr.bf16.mxu1 %v439_v5  ;;  %422 = vmatpush3.bf16.msra.mxu0 %v421_v10  ;;  %v265_v27 = vld [vmem:[%s527_s4] sm:$0xff] }
   0x7   :  { %423 = vmatprep.subr.bf16.mxu0 %v439_v5 }
   0x8   :  { %380 = vmatmul.mubr.msk.f32.vlgmr.msra.gmra.mrb[0].mxu1 %vm24_vm0, %v21_v4 }
   0x9   :  { %386 = vmatprep.mubr.msk.f32.mxu1 %vm440_vm1, %v441_v6 }
   0xa   :  { %425 = vmatpush3.bf16.msra.mxu0 %v424_v12 }
   0xb   :  { %426 = vmatprep.subr.bf16.mxu0 %v439_v5 }
   0xe   :  { %428 = vmatpush3.bf16.msra.mxu0 %v427_v15 }
   0xf   :  { %429 = vmatprep.subr.bf16.mxu0 %v439_v5 }
  0x12   :  { %431 = vmatpush3.bf16.msra.mxu0 %v430_v18 }
  0xdb   :  { %v381_v19 = vpop.f32.mrb[0].mxu1 }
  0xdc   :  { %v107_v20 = vmax.f32 %v381_v19, 0.0  ;;  %v97_v21 = vpop.f32.mrb[1].mxu1 }
  0xdd   :  { %v106_v22 = vmax.f32 %v97_v21, 0.0 }
  0xdf   :  { %v418_v23 = vpack.c.bf16 %v107_v20, %v106_v22 }
  0xe1   :  { %419 = vmatpush3.bf16.msra.mxu1 %v418_v23 }
  0xe2   :  { %408 = vmatprep.subr.mxu1 %v441_v6 }
  0xe4   :  { %387 = vmatmul.mubr.msk.f32.vlgmr.msra.gmra.mrb[2].mxu1 %vm24_vm0, %v108_v24 }
  0xe5   :  { %410 = vmatprep.mubr.msk.f32.mxu1 %vm440_vm1, %v441_v6  ;;  %409 = vmatpush3.msra.mxu1 %v265_v27 }
 0x1b7   :  { %v178_v25 = vpop.f32.mrb[2].mxu1 }
 0x1b8   :  { %v388_v26 = vpop.f32.mrb[3].mxu1  ;;  %406 = vmatmul.mubr.msk.f32.vlgmr.msra.gmra.mrb[0].mxu0 %vm190_vm2, %v178_v25 }
 0x28b   :  { %v260_v28 = vpop.f32.mrb[0].mxu0 }
 0x28c   :  { %v264_v29 = vmax.f32 %v260_v28, 0.0  ;;  %v407_v30 = vpop.f32.mrb[1].mxu0 }
 0x28e   :  { %411 = vmatmul.mubr.msk.f32.vlgmr.msra.gmra.mrb[4].mxu1 %vm266_vm3, %v264_v29 }
 0x361   :  { %v336_v31 = vpop.f32.mrb[4].mxu1 }
 0x362   :  { %v340_v32 = vsub.f32 0.0, %v336_v31  ;;  %v412_v33 = vpop.f32.mrb[5].mxu1 }
 0x364   :  { %v341_v34 = vmul.f32 1.442695, %v340_v32 }
 0x366   :  { %435 = vpow2.f32 %v341_v34 }
 0x370   :  { %v436_v35 = vpop.eup %435 }
 0x371   :  { %v343_v36 = vadd.f32 1.0, %v436_v35 }
 0x373   :  { %437 = vrcp.f32 %v343_v36 }
 0x37d   :  { %v438_v37 = vpop.eup %437 }
 0x37e   :  { %347 = vst.msk [vmem:[%s528_s5] sm:$0x3] %vm346_vm4, %v438_v37 }

// kernel: dese_layer.3
= control target key start
LH: loop header
LB: loop body
LE: loop exit
PB: predicated region body
PF: predicated region fallthrough
CT: control target
= control target key end

     0   :  { %v11_v0 = vlaneseq  ;;  %vm25_vm0 = vcmask 64512   ;;  %v130_v8 = vmov 1.0   ;;  %s164_s0 = inlined_call_operand.vmem [shape: f32[16,8], index: 0, kind: input, shape index: {}]   ;;  %s165_s1 = inlined_call_operand.vmem [shape: f32[16,128], index: 1, kind: input, shape index: {}]   ;;  %s166_s2 = inlined_call_operand.vmem [shape: f32[16,128], index: 2, kind: output, shape index: {}]  }
   0x1   :  { %v23_v1 = vld [vmem:[%s164_s0] sm:$0xff]  ;;  %v24_v7 = vld [vmem:[%s164_s0 + $0x8] sm:$0xff] }
   0x2   :  { %v12_v2 = vand.u32 127, %v11_v0  ;;  %v14_v3 = vshrl.u32 %v11_v0, 7  ;;  %126 = vmatprep.mubr.msk.f32.mxu0 %vm25_vm0, %v23_v1  ;;  %v108_v9 = vld [vmem:[%s165_s1 + $0x8] sm:$0xff]  ;;  %v107_v10 = vld [vmem:[%s165_s1] sm:$0xff] }
   0x4   :  { %v15_v4 = vmul.u32 16, %v14_v3  ;;  %v17_v5 = vadd.s32 1, %v14_v3 }
   0x6   :  { %vm16_vm1 = vcmp.ge.s32.totalorder %v12_v2, %v15_v4  ;;  %v18_v6 = vmul.u32 16, %v17_v5 }
   0x8   :  { %vm19_vm2 = vcmp.lt.s32.totalorder %v12_v2, %v18_v6 }
   0x9   :  { %vm20_vm3 = vmand %vm16_vm1, %vm19_vm2 }
   0xa   :  { %124 = vmatprep.subr.msk.mxu0 %vm20_vm3, %v130_v8 }
   0xb   :  { %125 = vmatpush3.msk.msra.mxu0 %vm20_vm3, %v130_v8 }
   0xc   :  { %127 = vmatmul.mubr.msk.f32.vlgmr.msra.gmra.mrb[0].mxu0 %vm25_vm0, %v24_v7 }
  0xdf   :  { %v128_v11 = vpop.f32.mrb[0].mxu0 }
  0xe0   :  { %v110_v12 = vmul.f32 %v128_v11, %v108_v9  ;;  %v98_v13 = vpop.f32.mrb[1].mxu0 }
  0xe1   :  { %v109_v14 = vmul.f32 %v107_v10, %v98_v13 }
  0xe2   :  { %112 = vst [vmem:[%s166_s2 + $0x8] sm:$0xff] %v110_v12 }
  0xe3   :  { %111 = vst [vmem:[%s166_s2] sm:$0xff] %v109_v14 }

</bundles_post_ra>
